<compile_context>
chip_gen: v6e
topology: v6e:2x2x1
jax: 0.10.0
libtpu: 0.0.40
codegen_flags: <defaults>
</compile_context>

<pallas_src>
import functools

import jax
import jax.numpy as jnp
from jax.experimental import pallas as pl
from jax.experimental.pallas import tpu as pltpu

LN_EPS = 1e-5


def _layernorm(x, g, b, eps):
    mean = jnp.mean(x, axis=-1, keepdims=True)
    var = jnp.mean(jnp.square(x - mean), axis=-1, keepdims=True)
    return (x - mean) * jax.lax.rsqrt(var + eps) * g + b


# ---------------------------------------------------------------------------
# Fused kernel: one batch element per grid step.  All (n_layers + 1) blocks,
# the positional-encoding add, the concat and the proj_x/proj_y merge run
# inside a single invocation with activations resident in VMEM/vregs.
# ---------------------------------------------------------------------------
def composer_kernel(x_ref, y_ref, pos_ref, px_ref, py_ref,
                    ln1g_ref, ln1b_ref, wqkv_ref, bqkv_ref, wo3_ref, bo_ref,
                    ln2g_ref, ln2b_ref, w1_ref, b1_ref, w2_ref, b2_ref,
                    o_ref, *, n_heads, n_body, eps):
    NM = x_ref.shape[1]
    E = x_ref.shape[2]
    d = E // n_heads
    scale = 1.0 / float(d) ** 0.5

    def block(h, l):
        # ---- pre-LN multi-head self-attention over all tokens ----
        hn = _layernorm(h, ln1g_ref[l], ln1b_ref[l], eps)
        qkv = jnp.dot(hn, wqkv_ref[l],
                      preferred_element_type=jnp.float32) + bqkv_ref[l]
        # Head-batched operands (H, S, d); static lane slices stacked along a
        # new leading (major) axis -> no cross-lane concat in the hot path.
        qh = jnp.stack([qkv[:, hd * d:(hd + 1) * d]
                        for hd in range(n_heads)], axis=0) * scale
        kh = jnp.stack([qkv[:, E + hd * d:E + (hd + 1) * d]
                        for hd in range(n_heads)], axis=0)
        vh = jnp.stack([qkv[:, 2 * E + hd * d:2 * E + (hd + 1) * d]
                        for hd in range(n_heads)], axis=0)
        s = jnp.einsum('hqd,hkd->hqk', qh, kh,
                       preferred_element_type=jnp.float32)
        s = s - jnp.max(s, axis=-1, keepdims=True)
        p = jnp.exp(s)
        p = p * pl.reciprocal(jnp.sum(p, axis=-1, keepdims=True), approx=True)
        o3 = jnp.einsum('hqk,hkd->hqd', p, vh,
                        preferred_element_type=jnp.float32)        # (H,S,d)
        # Output projection with head-split weight (H,d,E): batched matmul +
        # cheap sum over the head (major) axis replaces concat + one matmul.
        attn = jnp.einsum('hqd,hde->hqe', o3, wo3_ref[l],
                          preferred_element_type=jnp.float32).sum(axis=0)
        attn = attn + bo_ref[l]
        h = h + attn                                  # resid dropout == id

        # ---- pre-LN MLP ----
        hn2 = _layernorm(h, ln2g_ref[l], ln2b_ref[l], eps)
        m = jnp.dot(hn2, w1_ref[l],
                    preferred_element_type=jnp.float32) + b1_ref[l]
        m = jax.nn.gelu(m, approximate=True)
        m = jnp.dot(m, w2_ref[l],
                    preferred_element_type=jnp.float32) + b2_ref[l]
        return h + m                                  # mlp dropout == id

    # 1-3. positional encodings + concat along the token (sublane) axis.
    xb = x_ref[0] + pos_ref[0]                        # (NM, E)
    yb = y_ref[0] + pos_ref[1]                        # (NM, E)
    z = jnp.concatenate([xb, yb], axis=0)             # (2*NM, E)

    # 4. first block over the 2*N*M grid tokens (layer slab 0).
    z = block(z, 0)

    # 5-6. split halves, project, sum (merge folded into this kernel).
    merged = (jnp.dot(z[:NM], px_ref[...], preferred_element_type=jnp.float32)
              + jnp.dot(z[NM:], py_ref[...],
                        preferred_element_type=jnp.float32))

    # 7. body after merge: layer slabs 1..n_body (static unroll, small).
    h = merged
    for l in range(n_body):
        h = block(h, l + 1)

    # 8. single output store per grid step.
    o_ref[0] = h.astype(o_ref.dtype)


# ---------------------------------------------------------------------------
# Wrapper: one pallas_call for the whole forward.
# ---------------------------------------------------------------------------
def permutation_composer_forward(params, x, y, *, n_heads, ln_eps=LN_EPS):
    B, N, M, E = x.shape
    NM = N * M
    p = params
    L1 = p["wqkv"].shape[0]          # n_layers + 1 stacked blocks

    x2 = x.reshape(B, NM, E)         # contiguous reshape, free in HBM
    y2 = y.reshape(B, NM, E)

    def rep(shape):                  # full-array, grid-invariant block
        n = len(shape)
        return pl.BlockSpec(shape, lambda b, n=n: (0,) * n)

    kern = functools.partial(composer_kernel, n_heads=n_heads,
                             n_body=L1 - 1, eps=ln_eps)

    out = pl.pallas_call(
        kern,
        out_shape=jax.ShapeDtypeStruct((B, NM, E), x.dtype),
        grid=(B,),
        in_specs=[
            pl.BlockSpec((1, NM, E), lambda b: (b, 0, 0)),   # x
            pl.BlockSpec((1, NM, E), lambda b: (b, 0, 0)),   # y
            rep(p["pos_enc"].shape),                         # (2, 1, E)
            rep(p["proj_x"].shape),                          # (E, E)
            rep(p["proj_y"].shape),                          # (E, E)
            rep(p["ln1_g"].shape), rep(p["ln1_b"].shape),    # (L1, 1, E)
            rep(p["wqkv"].shape),  rep(p["bqkv"].shape),     # (L1,E,3E)/(L1,1,3E)
            rep(p["wo3"].shape),   rep(p["bo"].shape),       # (L1,H,d,E)/(L1,1,E)
            rep(p["ln2_g"].shape), rep(p["ln2_b"].shape),    # (L1, 1, E)
            rep(p["w1"].shape),    rep(p["b1"].shape),       # (L1,E,H)/(L1,1,H)
            rep(p["w2"].shape),    rep(p["b2"].shape),       # (L1,H,E)/(L1,1,E)
        ],
        out_specs=pl.BlockSpec((1, NM, E), lambda b: (b, 0, 0)),
        compiler_params=pltpu.CompilerParams(
            dimension_semantics=("parallel",)),              # v7x: 2 TCs busy
    )(x2, y2, p["pos_enc"], p["proj_x"], p["proj_y"],
      p["ln1_g"], p["ln1_b"], p["wqkv"], p["bqkv"], p["wo3"], p["bo"],
      p["ln2_g"], p["ln2_b"], p["w1"], p["b1"], p["w2"], p["b2"])

    return out.reshape(B, N, M, E)


# ---------------------------------------------------------------------------
# Deterministic synthetic parameters: layer 0 = first block, 1..L = body.
# ---------------------------------------------------------------------------
def init_params(key, *, n_embed, n_heads, linear_size_multiplier, n_layers,
                init_std):
    E = n_embed
    H = linear_size_multiplier * E
    d = E // n_heads
    L1 = n_layers + 1
    ks = jax.random.split(key, 7)

    def nrm(k, shape):
        return init_std * jax.random.normal(k, shape, jnp.float32)

    return dict(
        pos_enc=nrm(ks[0], (2, 1, E)),
        proj_x=0.5 * jnp.eye(E, dtype=jnp.float32) + nrm(ks[1], (E, E)),
        proj_y=0.5 * jnp.eye(E, dtype=jnp.float32) + nrm(ks[2], (E, E)),
        ln1_g=jnp.ones((L1, 1, E), jnp.float32),
        ln1_b=jnp.zeros((L1, 1, E), jnp.float32),
        wqkv=nrm(ks[3], (L1, E, 3 * E)),
        bqkv=jnp.zeros((L1, 1, 3 * E), jnp.float32),
        wo3=nrm(ks[4], (L1, n_heads, d, E)),   # head-split output projection
        bo=jnp.zeros((L1, 1, E), jnp.float32),
        ln2_g=jnp.ones((L1, 1, E), jnp.float32),
        ln2_b=jnp.zeros((L1, 1, E), jnp.float32),
        w1=nrm(ks[5], (L1, E, H)),
        b1=jnp.zeros((L1, 1, H), jnp.float32),
        w2=nrm(ks[6], (L1, H, E)),
        b2=jnp.zeros((L1, 1, E), jnp.float32),
    )


if __name__ == "__main__":
    # Small config consistent with the module: n_embed=32, n_heads=4,
    # linear_size_multiplier=4, n_layers=2, grid N=M=4, batch B=2.
    B, N, M, E = 2, 4, 4, 32
    n_heads, mult, n_layers, init_std = 4, 4, 2, 0.02

    key = jax.random.PRNGKey(0)
    kp, kx, ky = jax.random.split(key, 3)
    params = init_params(kp, n_embed=E, n_heads=n_heads,
                         linear_size_multiplier=mult, n_layers=n_layers,
                         init_std=init_std)
    x = jax.random.normal(kx, (B, N, M, E), jnp.float32)
    y = jax.random.normal(ky, (B, N, M, E), jnp.float32)

    fwd = jax.jit(functools.partial(permutation_composer_forward,
                                    n_heads=n_heads))
    out = fwd(params, x, y)
    jax.block_until_ready(out)
    assert out.shape == (B, N, M, E) and out.dtype == jnp.float32
    assert bool(jnp.all(jnp.isfinite(out)))
    print("KERNEL_OK")
</pallas_src>

<mosaic_0001>
module attributes {stable_mosaic.version = 11 : i64} {
  func.func @composer_kernel(%arg0: i32, %arg1: memref<1x16x32xf32, #tpu.memory_space<vmem>>, %arg2: memref<1x16x32xf32, #tpu.memory_space<vmem>>, %arg3: memref<2x1x32xf32, #tpu.memory_space<vmem>>, %arg4: memref<32x32xf32, #tpu.memory_space<vmem>>, %arg5: memref<32x32xf32, #tpu.memory_space<vmem>>, %arg6: memref<3x1x32xf32, #tpu.memory_space<vmem>>, %arg7: memref<3x1x32xf32, #tpu.memory_space<vmem>>, %arg8: memref<3x32x96xf32, #tpu.memory_space<vmem>>, %arg9: memref<3x1x96xf32, #tpu.memory_space<vmem>>, %arg10: memref<3x4x8x32xf32, #tpu.memory_space<vmem>>, %arg11: memref<3x1x32xf32, #tpu.memory_space<vmem>>, %arg12: memref<3x1x32xf32, #tpu.memory_space<vmem>>, %arg13: memref<3x1x32xf32, #tpu.memory_space<vmem>>, %arg14: memref<3x32x128xf32, #tpu.memory_space<vmem>>, %arg15: memref<3x1x128xf32, #tpu.memory_space<vmem>>, %arg16: memref<3x128x32xf32, #tpu.memory_space<vmem>>, %arg17: memref<3x1x32xf32, #tpu.memory_space<vmem>>, %arg18: memref<1x16x32xf32, #tpu.memory_space<vmem>>) attributes {dimension_semantics = [#tpu.dimension_semantics<parallel>], iteration_bounds = array<i64: 2>, scalar_prefetch = 0 : i64, scratch_operands = 0 : i64, tpu.core_type = #tpu.core_type<tc>, window_params = [{transform_indices = @transform_0, window_bounds = array<i64: 1, 16, 32>}, {transform_indices = @transform_1, window_bounds = array<i64: 1, 16, 32>}, {pipeline_mode = #tpu.pipeline_mode<synchronous>, transform_indices = @transform_2, window_bounds = array<i64: 2, 1, 32>}, {pipeline_mode = #tpu.pipeline_mode<synchronous>, transform_indices = @transform_3, window_bounds = array<i64: 32, 32>}, {pipeline_mode = #tpu.pipeline_mode<synchronous>, transform_indices = @transform_4, window_bounds = array<i64: 32, 32>}, {pipeline_mode = #tpu.pipeline_mode<synchronous>, transform_indices = @transform_5, window_bounds = array<i64: 3, 1, 32>}, {pipeline_mode = #tpu.pipeline_mode<synchronous>, transform_indices = @transform_6, window_bounds = array<i64: 3, 1, 32>}, {pipeline_mode = #tpu.pipeline_mode<synchronous>, transform_indices = @transform_7, window_bounds = array<i64: 3, 32, 96>}, {pipeline_mode = #tpu.pipeline_mode<synchronous>, transform_indices = @transform_8, window_bounds = array<i64: 3, 1, 96>}, {pipeline_mode = #tpu.pipeline_mode<synchronous>, transform_indices = @transform_9, window_bounds = array<i64: 3, 4, 8, 32>}, {pipeline_mode = #tpu.pipeline_mode<synchronous>, transform_indices = @transform_10, window_bounds = array<i64: 3, 1, 32>}, {pipeline_mode = #tpu.pipeline_mode<synchronous>, transform_indices = @transform_11, window_bounds = array<i64: 3, 1, 32>}, {pipeline_mode = #tpu.pipeline_mode<synchronous>, transform_indices = @transform_12, window_bounds = array<i64: 3, 1, 32>}, {pipeline_mode = #tpu.pipeline_mode<synchronous>, transform_indices = @transform_13, window_bounds = array<i64: 3, 32, 128>}, {pipeline_mode = #tpu.pipeline_mode<synchronous>, transform_indices = @transform_14, window_bounds = array<i64: 3, 1, 128>}, {pipeline_mode = #tpu.pipeline_mode<synchronous>, transform_indices = @transform_15, window_bounds = array<i64: 3, 128, 32>}, {pipeline_mode = #tpu.pipeline_mode<synchronous>, transform_indices = @transform_16, window_bounds = array<i64: 3, 1, 32>}, {transform_indices = @transform_17, window_bounds = array<i64: 1, 16, 32>}]} {
    %c0 = arith.constant 0 : index
    %c0_0 = arith.constant 0 : index
    %c0_1 = arith.constant 0 : index
    %0 = vector.load %arg1[%c0, %c0_0, %c0_1] : memref<1x16x32xf32, #tpu.memory_space<vmem>>, vector<1x16x32xf32>
    %1 = vector.shape_cast %0 : vector<1x16x32xf32> to vector<16x32xf32>
    %c0_2 = arith.constant 0 : index
    %c0_3 = arith.constant 0 : index
    %c0_4 = arith.constant 0 : index
    %2 = vector.load %arg3[%c0_2, %c0_3, %c0_4] : memref<2x1x32xf32, #tpu.memory_space<vmem>>, vector<1x1x32xf32>
    %3 = vector.shape_cast %2 : vector<1x1x32xf32> to vector<1x32xf32>
    %4 = vector.broadcast %3 : vector<1x32xf32> to vector<16x32xf32>
    %5 = arith.addf %1, %4 : vector<16x32xf32>
    %c0_5 = arith.constant 0 : index
    %c0_6 = arith.constant 0 : index
    %c0_7 = arith.constant 0 : index
    %6 = vector.load %arg2[%c0_5, %c0_6, %c0_7] : memref<1x16x32xf32, #tpu.memory_space<vmem>>, vector<1x16x32xf32>
    %7 = vector.shape_cast %6 : vector<1x16x32xf32> to vector<16x32xf32>
    %c1 = arith.constant 1 : index
    %c0_8 = arith.constant 0 : index
    %c0_9 = arith.constant 0 : index
    %8 = vector.load %arg3[%c1, %c0_8, %c0_9] : memref<2x1x32xf32, #tpu.memory_space<vmem>>, vector<1x1x32xf32>
    %9 = vector.shape_cast %8 : vector<1x1x32xf32> to vector<1x32xf32>
    %10 = vector.broadcast %9 : vector<1x32xf32> to vector<16x32xf32>
    %11 = arith.addf %7, %10 : vector<16x32xf32>
    %12 = tpu.concatenate %5, %11 in 0 : vector<16x32xf32>, vector<16x32xf32> -> vector<32x32xf32>
    %c0_10 = arith.constant 0 : index
    %c0_11 = arith.constant 0 : index
    %c0_12 = arith.constant 0 : index
    %13 = vector.load %arg6[%c0_10, %c0_11, %c0_12] : memref<3x1x32xf32, #tpu.memory_space<vmem>>, vector<1x1x32xf32>
    %14 = vector.shape_cast %13 : vector<1x1x32xf32> to vector<1x32xf32>
    %c0_13 = arith.constant 0 : index
    %c0_14 = arith.constant 0 : index
    %c0_15 = arith.constant 0 : index
    %15 = vector.load %arg7[%c0_13, %c0_14, %c0_15] : memref<3x1x32xf32, #tpu.memory_space<vmem>>, vector<1x1x32xf32>
    %16 = vector.shape_cast %15 : vector<1x1x32xf32> to vector<1x32xf32>
    %cst = arith.constant dense<0.000000e+00> : vector<32xf32>
    %17 = vector.multi_reduction <add>, %12, %cst [1] : vector<32x32xf32> to vector<32xf32>
    %18 = vector.shape_cast %17 : vector<32xf32> to vector<32x1xf32>
    %cst_16 = arith.constant 3.200000e+01 : f32
    %19 = vector.broadcast %cst_16 : f32 to vector<32x1xf32>
    %20 = arith.divf %18, %19 : vector<32x1xf32>
    %21 = vector.broadcast %20 : vector<32x1xf32> to vector<32x32xf32>
    %22 = arith.subf %12, %21 : vector<32x32xf32>
    %23 = arith.mulf %22, %22 : vector<32x32xf32>
    %cst_17 = arith.constant dense<0.000000e+00> : vector<32xf32>
    %24 = vector.multi_reduction <add>, %23, %cst_17 [1] : vector<32x32xf32> to vector<32xf32>
    %25 = vector.shape_cast %24 : vector<32xf32> to vector<32x1xf32>
    %cst_18 = arith.constant 3.200000e+01 : f32
    %26 = vector.broadcast %cst_18 : f32 to vector<32x1xf32>
    %27 = arith.divf %25, %26 : vector<32x1xf32>
    %28 = vector.broadcast %20 : vector<32x1xf32> to vector<32x32xf32>
    %29 = arith.subf %12, %28 : vector<32x32xf32>
    %cst_19 = arith.constant 9.99999974E-6 : f32
    %30 = vector.broadcast %cst_19 : f32 to vector<32x1xf32>
    %31 = arith.addf %27, %30 : vector<32x1xf32>
    %32 = math.rsqrt %31 : vector<32x1xf32>
    %33 = vector.broadcast %32 : vector<32x1xf32> to vector<32x32xf32>
    %34 = arith.mulf %29, %33 : vector<32x32xf32>
    %35 = vector.broadcast %14 : vector<1x32xf32> to vector<32x32xf32>
    %36 = arith.mulf %34, %35 : vector<32x32xf32>
    %37 = vector.broadcast %16 : vector<1x32xf32> to vector<32x32xf32>
    %38 = arith.addf %36, %37 : vector<32x32xf32>
    %c0_20 = arith.constant 0 : index
    %c0_21 = arith.constant 0 : index
    %c0_22 = arith.constant 0 : index
    %39 = vector.load %arg8[%c0_20, %c0_21, %c0_22] : memref<3x32x96xf32, #tpu.memory_space<vmem>>, vector<1x32x96xf32>
    %40 = vector.shape_cast %39 : vector<1x32x96xf32> to vector<32x96xf32>
    %cst_23 = arith.constant dense<0.000000e+00> : vector<32x96xf32>
    %41 = tpu.matmul %38, %40, %cst_23 {dimension_numbers = #tpu.dot_dimension_numbers<[1], [0], [0], [1], [0, 0, 1, 1], [], []>} : vector<32x32xf32>, vector<32x96xf32>, vector<32x96xf32> -> vector<32x96xf32>
    %c0_24 = arith.constant 0 : index
    %c0_25 = arith.constant 0 : index
    %c0_26 = arith.constant 0 : index
    %42 = vector.load %arg9[%c0_24, %c0_25, %c0_26] : memref<3x1x96xf32, #tpu.memory_space<vmem>>, vector<1x1x96xf32>
    %43 = vector.shape_cast %42 : vector<1x1x96xf32> to vector<1x96xf32>
    %44 = vector.broadcast %43 : vector<1x96xf32> to vector<32x96xf32>
    %45 = arith.addf %41, %44 : vector<32x96xf32>
    %46 = vector.extract_strided_slice %45 {offsets = [0, 0], sizes = [32, 8], strides = [1, 1]} : vector<32x96xf32> to vector<32x8xf32>
    %47 = vector.extract_strided_slice %45 {offsets = [0, 8], sizes = [32, 8], strides = [1, 1]} : vector<32x96xf32> to vector<32x8xf32>
    %48 = vector.extract_strided_slice %45 {offsets = [0, 16], sizes = [32, 8], strides = [1, 1]} : vector<32x96xf32> to vector<32x8xf32>
    %49 = vector.extract_strided_slice %45 {offsets = [0, 24], sizes = [32, 8], strides = [1, 1]} : vector<32x96xf32> to vector<32x8xf32>
    %50 = vector.shape_cast %46 : vector<32x8xf32> to vector<1x32x8xf32>
    %51 = vector.shape_cast %47 : vector<32x8xf32> to vector<1x32x8xf32>
    %52 = vector.shape_cast %48 : vector<32x8xf32> to vector<1x32x8xf32>
    %53 = vector.shape_cast %49 : vector<32x8xf32> to vector<1x32x8xf32>
    %54 = tpu.concatenate %50, %51, %52, %53 in 0 : vector<1x32x8xf32>, vector<1x32x8xf32>, vector<1x32x8xf32>, vector<1x32x8xf32> -> vector<4x32x8xf32>
    %cst_27 = arith.constant 0.353553385 : f32
    %55 = vector.broadcast %cst_27 : f32 to vector<4x32x8xf32>
    %56 = arith.mulf %54, %55 : vector<4x32x8xf32>
    %57 = vector.extract_strided_slice %45 {offsets = [0, 32], sizes = [32, 8], strides = [1, 1]} : vector<32x96xf32> to vector<32x8xf32>
    %58 = vector.extract_strided_slice %45 {offsets = [0, 40], sizes = [32, 8], strides = [1, 1]} : vector<32x96xf32> to vector<32x8xf32>
    %59 = vector.extract_strided_slice %45 {offsets = [0, 48], sizes = [32, 8], strides = [1, 1]} : vector<32x96xf32> to vector<32x8xf32>
    %60 = vector.extract_strided_slice %45 {offsets = [0, 56], sizes = [32, 8], strides = [1, 1]} : vector<32x96xf32> to vector<32x8xf32>
    %61 = vector.shape_cast %57 : vector<32x8xf32> to vector<1x32x8xf32>
    %62 = vector.shape_cast %58 : vector<32x8xf32> to vector<1x32x8xf32>
    %63 = vector.shape_cast %59 : vector<32x8xf32> to vector<1x32x8xf32>
    %64 = vector.shape_cast %60 : vector<32x8xf32> to vector<1x32x8xf32>
    %65 = tpu.concatenate %61, %62, %63, %64 in 0 : vector<1x32x8xf32>, vector<1x32x8xf32>, vector<1x32x8xf32>, vector<1x32x8xf32> -> vector<4x32x8xf32>
    %66 = vector.extract_strided_slice %45 {offsets = [0, 64], sizes = [32, 8], strides = [1, 1]} : vector<32x96xf32> to vector<32x8xf32>
    %67 = vector.extract_strided_slice %45 {offsets = [0, 72], sizes = [32, 8], strides = [1, 1]} : vector<32x96xf32> to vector<32x8xf32>
    %68 = vector.extract_strided_slice %45 {offsets = [0, 80], sizes = [32, 8], strides = [1, 1]} : vector<32x96xf32> to vector<32x8xf32>
    %69 = vector.extract_strided_slice %45 {offsets = [0, 88], sizes = [32, 8], strides = [1, 1]} : vector<32x96xf32> to vector<32x8xf32>
    %70 = vector.shape_cast %66 : vector<32x8xf32> to vector<1x32x8xf32>
    %71 = vector.shape_cast %67 : vector<32x8xf32> to vector<1x32x8xf32>
    %72 = vector.shape_cast %68 : vector<32x8xf32> to vector<1x32x8xf32>
    %73 = vector.shape_cast %69 : vector<32x8xf32> to vector<1x32x8xf32>
    %74 = tpu.concatenate %70, %71, %72, %73 in 0 : vector<1x32x8xf32>, vector<1x32x8xf32>, vector<1x32x8xf32>, vector<1x32x8xf32> -> vector<4x32x8xf32>
    "tpu.trace_start"() <{level = 10 : i32, message = "hqd,hkd->hqk"}> : () -> ()
    %cst_28 = arith.constant dense<0.000000e+00> : vector<4x32x32xf32>
    %75 = tpu.matmul %56, %65, %cst_28 {dimension_numbers = #tpu.dot_dimension_numbers<[2], [2], [1], [1], [0, 0, 0, 1, 1, 1], [0], [0]>} : vector<4x32x8xf32>, vector<4x32x8xf32>, vector<4x32x32xf32> -> vector<4x32x32xf32>
    "tpu.trace_stop"() : () -> ()
    %cst_29 = arith.constant dense<0xFF800000> : vector<4x32xf32>
    %76 = vector.multi_reduction <maximumf>, %75, %cst_29 [2] : vector<4x32x32xf32> to vector<4x32xf32>
    %77 = vector.shape_cast %76 : vector<4x32xf32> to vector<4x32x1xf32>
    %78 = vector.broadcast %77 : vector<4x32x1xf32> to vector<4x32x32xf32>
    %79 = arith.subf %75, %78 : vector<4x32x32xf32>
    %80 = math.exp %79 : vector<4x32x32xf32>
    %cst_30 = arith.constant dense<0.000000e+00> : vector<4x32xf32>
    %81 = vector.multi_reduction <add>, %80, %cst_30 [2] : vector<4x32x32xf32> to vector<4x32xf32>
    %82 = vector.shape_cast %81 : vector<4x32xf32> to vector<4x32x1xf32>
    %83 = tpu.reciprocal %82 {approx = true} : vector<4x32x1xf32> -> vector<4x32x1xf32>
    %84 = vector.broadcast %83 : vector<4x32x1xf32> to vector<4x32x32xf32>
    %85 = arith.mulf %80, %84 : vector<4x32x32xf32>
    "tpu.trace_start"() <{level = 10 : i32, message = "hqk,hkd->hqd"}> : () -> ()
    %cst_31 = arith.constant dense<0.000000e+00> : vector<4x32x8xf32>
    %86 = tpu.matmul %85, %74, %cst_31 {dimension_numbers = #tpu.dot_dimension_numbers<[2], [1], [1], [2], [0, 0, 0, 1, 1, 2], [0], [0]>} : vector<4x32x32xf32>, vector<4x32x8xf32>, vector<4x32x8xf32> -> vector<4x32x8xf32>
    "tpu.trace_stop"() : () -> ()
    %c0_32 = arith.constant 0 : index
    %c0_33 = arith.constant 0 : index
    %c0_34 = arith.constant 0 : index
    %c0_35 = arith.constant 0 : index
    %87 = vector.load %arg10[%c0_32, %c0_33, %c0_34, %c0_35] : memref<3x4x8x32xf32, #tpu.memory_space<vmem>>, vector<1x4x8x32xf32>
    %88 = vector.shape_cast %87 : vector<1x4x8x32xf32> to vector<4x8x32xf32>
    "tpu.trace_start"() <{level = 10 : i32, message = "hqd,hde->hqe"}> : () -> ()
    %cst_36 = arith.constant dense<0.000000e+00> : vector<4x32x32xf32>
    %89 = tpu.matmul %86, %88, %cst_36 {dimension_numbers = #tpu.dot_dimension_numbers<[2], [1], [1], [2], [0, 0, 0, 1, 1, 2], [0], [0]>} : vector<4x32x8xf32>, vector<4x8x32xf32>, vector<4x32x32xf32> -> vector<4x32x32xf32>
    "tpu.trace_stop"() : () -> ()
    %cst_37 = arith.constant dense<0.000000e+00> : vector<32x32xf32>
    %90 = vector.multi_reduction <add>, %89, %cst_37 [0] : vector<4x32x32xf32> to vector<32x32xf32>
    %c0_38 = arith.constant 0 : index
    %c0_39 = arith.constant 0 : index
    %c0_40 = arith.constant 0 : index
    %91 = vector.load %arg11[%c0_38, %c0_39, %c0_40] : memref<3x1x32xf32, #tpu.memory_space<vmem>>, vector<1x1x32xf32>
    %92 = vector.shape_cast %91 : vector<1x1x32xf32> to vector<1x32xf32>
    %93 = vector.broadcast %92 : vector<1x32xf32> to vector<32x32xf32>
    %94 = arith.addf %90, %93 : vector<32x32xf32>
    %95 = arith.addf %12, %94 : vector<32x32xf32>
    %c0_41 = arith.constant 0 : index
    %c0_42 = arith.constant 0 : index
    %c0_43 = arith.constant 0 : index
    %96 = vector.load %arg12[%c0_41, %c0_42, %c0_43] : memref<3x1x32xf32, #tpu.memory_space<vmem>>, vector<1x1x32xf32>
    %97 = vector.shape_cast %96 : vector<1x1x32xf32> to vector<1x32xf32>
    %c0_44 = arith.constant 0 : index
    %c0_45 = arith.constant 0 : index
    %c0_46 = arith.constant 0 : index
    %98 = vector.load %arg13[%c0_44, %c0_45, %c0_46] : memref<3x1x32xf32, #tpu.memory_space<vmem>>, vector<1x1x32xf32>
    %99 = vector.shape_cast %98 : vector<1x1x32xf32> to vector<1x32xf32>
    %cst_47 = arith.constant dense<0.000000e+00> : vector<32xf32>
    %100 = vector.multi_reduction <add>, %95, %cst_47 [1] : vector<32x32xf32> to vector<32xf32>
    %101 = vector.shape_cast %100 : vector<32xf32> to vector<32x1xf32>
    %cst_48 = arith.constant 3.200000e+01 : f32
    %102 = vector.broadcast %cst_48 : f32 to vector<32x1xf32>
    %103 = arith.divf %101, %102 : vector<32x1xf32>
    %104 = vector.broadcast %103 : vector<32x1xf32> to vector<32x32xf32>
    %105 = arith.subf %95, %104 : vector<32x32xf32>
    %106 = arith.mulf %105, %105 : vector<32x32xf32>
    %cst_49 = arith.constant dense<0.000000e+00> : vector<32xf32>
    %107 = vector.multi_reduction <add>, %106, %cst_49 [1] : vector<32x32xf32> to vector<32xf32>
    %108 = vector.shape_cast %107 : vector<32xf32> to vector<32x1xf32>
    %cst_50 = arith.constant 3.200000e+01 : f32
    %109 = vector.broadcast %cst_50 : f32 to vector<32x1xf32>
    %110 = arith.divf %108, %109 : vector<32x1xf32>
    %111 = vector.broadcast %103 : vector<32x1xf32> to vector<32x32xf32>
    %112 = arith.subf %95, %111 : vector<32x32xf32>
    %cst_51 = arith.constant 9.99999974E-6 : f32
    %113 = vector.broadcast %cst_51 : f32 to vector<32x1xf32>
    %114 = arith.addf %110, %113 : vector<32x1xf32>
    %115 = math.rsqrt %114 : vector<32x1xf32>
    %116 = vector.broadcast %115 : vector<32x1xf32> to vector<32x32xf32>
    %117 = arith.mulf %112, %116 : vector<32x32xf32>
    %118 = vector.broadcast %97 : vector<1x32xf32> to vector<32x32xf32>
    %119 = arith.mulf %117, %118 : vector<32x32xf32>
    %120 = vector.broadcast %99 : vector<1x32xf32> to vector<32x32xf32>
    %121 = arith.addf %119, %120 : vector<32x32xf32>
    %c0_52 = arith.constant 0 : index
    %c0_53 = arith.constant 0 : index
    %c0_54 = arith.constant 0 : index
    %122 = vector.load %arg14[%c0_52, %c0_53, %c0_54] : memref<3x32x128xf32, #tpu.memory_space<vmem>>, vector<1x32x128xf32>
    %123 = vector.shape_cast %122 : vector<1x32x128xf32> to vector<32x128xf32>
    %cst_55 = arith.constant dense<0.000000e+00> : vector<32x128xf32>
    %124 = tpu.matmul %121, %123, %cst_55 {dimension_numbers = #tpu.dot_dimension_numbers<[1], [0], [0], [1], [0, 0, 1, 1], [], []>} : vector<32x32xf32>, vector<32x128xf32>, vector<32x128xf32> -> vector<32x128xf32>
    %c0_56 = arith.constant 0 : index
    %c0_57 = arith.constant 0 : index
    %c0_58 = arith.constant 0 : index
    %125 = vector.load %arg15[%c0_56, %c0_57, %c0_58] : memref<3x1x128xf32, #tpu.memory_space<vmem>>, vector<1x1x128xf32>
    %126 = vector.shape_cast %125 : vector<1x1x128xf32> to vector<1x128xf32>
    %127 = vector.broadcast %126 : vector<1x128xf32> to vector<32x128xf32>
    %128 = arith.addf %124, %127 : vector<32x128xf32>
    %129 = arith.mulf %128, %128 : vector<32x128xf32>
    %130 = arith.mulf %128, %129 : vector<32x128xf32>
    %cst_59 = arith.constant 4.471500e-02 : f32
    %131 = vector.broadcast %cst_59 : f32 to vector<32x128xf32>
    %132 = arith.mulf %131, %130 : vector<32x128xf32>
    %133 = arith.addf %128, %132 : vector<32x128xf32>
    %cst_60 = arith.constant 0.797884583 : f32
    %134 = vector.broadcast %cst_60 : f32 to vector<32x128xf32>
    %135 = arith.mulf %134, %133 : vector<32x128xf32>
    %136 = math.tanh %135 : vector<32x128xf32>
    %cst_61 = arith.constant 1.000000e+00 : f32
    %137 = vector.broadcast %cst_61 : f32 to vector<32x128xf32>
    %138 = arith.addf %137, %136 : vector<32x128xf32>
    %cst_62 = arith.constant 5.000000e-01 : f32
    %139 = vector.broadcast %cst_62 : f32 to vector<32x128xf32>
    %140 = arith.mulf %139, %138 : vector<32x128xf32>
    %141 = arith.mulf %128, %140 : vector<32x128xf32>
    %c0_63 = arith.constant 0 : index
    %c0_64 = arith.constant 0 : index
    %c0_65 = arith.constant 0 : index
    %142 = vector.load %arg16[%c0_63, %c0_64, %c0_65] : memref<3x128x32xf32, #tpu.memory_space<vmem>>, vector<1x128x32xf32>
    %143 = vector.shape_cast %142 : vector<1x128x32xf32> to vector<128x32xf32>
    %cst_66 = arith.constant dense<0.000000e+00> : vector<32x32xf32>
    %144 = tpu.matmul %141, %143, %cst_66 {dimension_numbers = #tpu.dot_dimension_numbers<[1], [0], [0], [1], [0, 0, 1, 1], [], []>} : vector<32x128xf32>, vector<128x32xf32>, vector<32x32xf32> -> vector<32x32xf32>
    %c0_67 = arith.constant 0 : index
    %c0_68 = arith.constant 0 : index
    %c0_69 = arith.constant 0 : index
    %145 = vector.load %arg17[%c0_67, %c0_68, %c0_69] : memref<3x1x32xf32, #tpu.memory_space<vmem>>, vector<1x1x32xf32>
    %146 = vector.shape_cast %145 : vector<1x1x32xf32> to vector<1x32xf32>
    %147 = vector.broadcast %146 : vector<1x32xf32> to vector<32x32xf32>
    %148 = arith.addf %144, %147 : vector<32x32xf32>
    %149 = arith.addf %95, %148 : vector<32x32xf32>
    %150 = vector.extract_strided_slice %149 {offsets = [0, 0], sizes = [16, 32], strides = [1, 1]} : vector<32x32xf32> to vector<16x32xf32>
    %c0_70 = arith.constant 0 : index
    %c0_71 = arith.constant 0 : index
    %151 = vector.load %arg4[%c0_70, %c0_71] : memref<32x32xf32, #tpu.memory_space<vmem>>, vector<32x32xf32>
    %cst_72 = arith.constant dense<0.000000e+00> : vector<16x32xf32>
    %152 = tpu.matmul %150, %151, %cst_72 {dimension_numbers = #tpu.dot_dimension_numbers<[1], [0], [0], [1], [0, 0, 1, 1], [], []>} : vector<16x32xf32>, vector<32x32xf32>, vector<16x32xf32> -> vector<16x32xf32>
    %153 = vector.extract_strided_slice %149 {offsets = [16, 0], sizes = [16, 32], strides = [1, 1]} : vector<32x32xf32> to vector<16x32xf32>
    %c0_73 = arith.constant 0 : index
    %c0_74 = arith.constant 0 : index
    %154 = vector.load %arg5[%c0_73, %c0_74] : memref<32x32xf32, #tpu.memory_space<vmem>>, vector<32x32xf32>
    %cst_75 = arith.constant dense<0.000000e+00> : vector<16x32xf32>
    %155 = tpu.matmul %153, %154, %cst_75 {dimension_numbers = #tpu.dot_dimension_numbers<[1], [0], [0], [1], [0, 0, 1, 1], [], []>} : vector<16x32xf32>, vector<32x32xf32>, vector<16x32xf32> -> vector<16x32xf32>
    %156 = arith.addf %152, %155 : vector<16x32xf32>
    %c1_76 = arith.constant 1 : index
    %c0_77 = arith.constant 0 : index
    %c0_78 = arith.constant 0 : index
    %157 = vector.load %arg6[%c1_76, %c0_77, %c0_78] : memref<3x1x32xf32, #tpu.memory_space<vmem>>, vector<1x1x32xf32>
    %158 = vector.shape_cast %157 : vector<1x1x32xf32> to vector<1x32xf32>
    %c1_79 = arith.constant 1 : index
    %c0_80 = arith.constant 0 : index
    %c0_81 = arith.constant 0 : index
    %159 = vector.load %arg7[%c1_79, %c0_80, %c0_81] : memref<3x1x32xf32, #tpu.memory_space<vmem>>, vector<1x1x32xf32>
    %160 = vector.shape_cast %159 : vector<1x1x32xf32> to vector<1x32xf32>
    %cst_82 = arith.constant dense<0.000000e+00> : vector<16xf32>
    %161 = vector.multi_reduction <add>, %156, %cst_82 [1] : vector<16x32xf32> to vector<16xf32>
    %162 = vector.shape_cast %161 : vector<16xf32> to vector<16x1xf32>
    %cst_83 = arith.constant 3.200000e+01 : f32
    %163 = vector.broadcast %cst_83 : f32 to vector<16x1xf32>
    %164 = arith.divf %162, %163 : vector<16x1xf32>
    %165 = vector.broadcast %164 : vector<16x1xf32> to vector<16x32xf32>
    %166 = arith.subf %156, %165 : vector<16x32xf32>
    %167 = arith.mulf %166, %166 : vector<16x32xf32>
    %cst_84 = arith.constant dense<0.000000e+00> : vector<16xf32>
    %168 = vector.multi_reduction <add>, %167, %cst_84 [1] : vector<16x32xf32> to vector<16xf32>
    %169 = vector.shape_cast %168 : vector<16xf32> to vector<16x1xf32>
    %cst_85 = arith.constant 3.200000e+01 : f32
    %170 = vector.broadcast %cst_85 : f32 to vector<16x1xf32>
    %171 = arith.divf %169, %170 : vector<16x1xf32>
    %172 = vector.broadcast %164 : vector<16x1xf32> to vector<16x32xf32>
    %173 = arith.subf %156, %172 : vector<16x32xf32>
    %cst_86 = arith.constant 9.99999974E-6 : f32
    %174 = vector.broadcast %cst_86 : f32 to vector<16x1xf32>
    %175 = arith.addf %171, %174 : vector<16x1xf32>
    %176 = math.rsqrt %175 : vector<16x1xf32>
    %177 = vector.broadcast %176 : vector<16x1xf32> to vector<16x32xf32>
    %178 = arith.mulf %173, %177 : vector<16x32xf32>
    %179 = vector.broadcast %158 : vector<1x32xf32> to vector<16x32xf32>
    %180 = arith.mulf %178, %179 : vector<16x32xf32>
    %181 = vector.broadcast %160 : vector<1x32xf32> to vector<16x32xf32>
    %182 = arith.addf %180, %181 : vector<16x32xf32>
    %c1_87 = arith.constant 1 : index
    %c0_88 = arith.constant 0 : index
    %c0_89 = arith.constant 0 : index
    %183 = vector.load %arg8[%c1_87, %c0_88, %c0_89] : memref<3x32x96xf32, #tpu.memory_space<vmem>>, vector<1x32x96xf32>
    %184 = vector.shape_cast %183 : vector<1x32x96xf32> to vector<32x96xf32>
    %cst_90 = arith.constant dense<0.000000e+00> : vector<16x96xf32>
    %185 = tpu.matmul %182, %184, %cst_90 {dimension_numbers = #tpu.dot_dimension_numbers<[1], [0], [0], [1], [0, 0, 1, 1], [], []>} : vector<16x32xf32>, vector<32x96xf32>, vector<16x96xf32> -> vector<16x96xf32>
    %c1_91 = arith.constant 1 : index
    %c0_92 = arith.constant 0 : index
    %c0_93 = arith.constant 0 : index
    %186 = vector.load %arg9[%c1_91, %c0_92, %c0_93] : memref<3x1x96xf32, #tpu.memory_space<vmem>>, vector<1x1x96xf32>
    %187 = vector.shape_cast %186 : vector<1x1x96xf32> to vector<1x96xf32>
    %188 = vector.broadcast %187 : vector<1x96xf32> to vector<16x96xf32>
    %189 = arith.addf %185, %188 : vector<16x96xf32>
    %190 = vector.extract_strided_slice %189 {offsets = [0, 0], sizes = [16, 8], strides = [1, 1]} : vector<16x96xf32> to vector<16x8xf32>
    %191 = vector.extract_strided_slice %189 {offsets = [0, 8], sizes = [16, 8], strides = [1, 1]} : vector<16x96xf32> to vector<16x8xf32>
    %192 = vector.extract_strided_slice %189 {offsets = [0, 16], sizes = [16, 8], strides = [1, 1]} : vector<16x96xf32> to vector<16x8xf32>
    %193 = vector.extract_strided_slice %189 {offsets = [0, 24], sizes = [16, 8], strides = [1, 1]} : vector<16x96xf32> to vector<16x8xf32>
    %194 = vector.shape_cast %190 : vector<16x8xf32> to vector<1x16x8xf32>
    %195 = vector.shape_cast %191 : vector<16x8xf32> to vector<1x16x8xf32>
    %196 = vector.shape_cast %192 : vector<16x8xf32> to vector<1x16x8xf32>
    %197 = vector.shape_cast %193 : vector<16x8xf32> to vector<1x16x8xf32>
    %198 = tpu.concatenate %194, %195, %196, %197 in 0 : vector<1x16x8xf32>, vector<1x16x8xf32>, vector<1x16x8xf32>, vector<1x16x8xf32> -> vector<4x16x8xf32>
    %cst_94 = arith.constant 0.353553385 : f32
    %199 = vector.broadcast %cst_94 : f32 to vector<4x16x8xf32>
    %200 = arith.mulf %198, %199 : vector<4x16x8xf32>
    %201 = vector.extract_strided_slice %189 {offsets = [0, 32], sizes = [16, 8], strides = [1, 1]} : vector<16x96xf32> to vector<16x8xf32>
    %202 = vector.extract_strided_slice %189 {offsets = [0, 40], sizes = [16, 8], strides = [1, 1]} : vector<16x96xf32> to vector<16x8xf32>
    %203 = vector.extract_strided_slice %189 {offsets = [0, 48], sizes = [16, 8], strides = [1, 1]} : vector<16x96xf32> to vector<16x8xf32>
    %204 = vector.extract_strided_slice %189 {offsets = [0, 56], sizes = [16, 8], strides = [1, 1]} : vector<16x96xf32> to vector<16x8xf32>
    %205 = vector.shape_cast %201 : vector<16x8xf32> to vector<1x16x8xf32>
    %206 = vector.shape_cast %202 : vector<16x8xf32> to vector<1x16x8xf32>
    %207 = vector.shape_cast %203 : vector<16x8xf32> to vector<1x16x8xf32>
    %208 = vector.shape_cast %204 : vector<16x8xf32> to vector<1x16x8xf32>
    %209 = tpu.concatenate %205, %206, %207, %208 in 0 : vector<1x16x8xf32>, vector<1x16x8xf32>, vector<1x16x8xf32>, vector<1x16x8xf32> -> vector<4x16x8xf32>
    %210 = vector.extract_strided_slice %189 {offsets = [0, 64], sizes = [16, 8], strides = [1, 1]} : vector<16x96xf32> to vector<16x8xf32>
    %211 = vector.extract_strided_slice %189 {offsets = [0, 72], sizes = [16, 8], strides = [1, 1]} : vector<16x96xf32> to vector<16x8xf32>
    %212 = vector.extract_strided_slice %189 {offsets = [0, 80], sizes = [16, 8], strides = [1, 1]} : vector<16x96xf32> to vector<16x8xf32>
    %213 = vector.extract_strided_slice %189 {offsets = [0, 88], sizes = [16, 8], strides = [1, 1]} : vector<16x96xf32> to vector<16x8xf32>
    %214 = vector.shape_cast %210 : vector<16x8xf32> to vector<1x16x8xf32>
    %215 = vector.shape_cast %211 : vector<16x8xf32> to vector<1x16x8xf32>
    %216 = vector.shape_cast %212 : vector<16x8xf32> to vector<1x16x8xf32>
    %217 = vector.shape_cast %213 : vector<16x8xf32> to vector<1x16x8xf32>
    %218 = tpu.concatenate %214, %215, %216, %217 in 0 : vector<1x16x8xf32>, vector<1x16x8xf32>, vector<1x16x8xf32>, vector<1x16x8xf32> -> vector<4x16x8xf32>
    "tpu.trace_start"() <{level = 10 : i32, message = "hqd,hkd->hqk"}> : () -> ()
    %cst_95 = arith.constant dense<0.000000e+00> : vector<4x16x16xf32>
    %219 = tpu.matmul %200, %209, %cst_95 {dimension_numbers = #tpu.dot_dimension_numbers<[2], [2], [1], [1], [0, 0, 0, 1, 1, 1], [0], [0]>} : vector<4x16x8xf32>, vector<4x16x8xf32>, vector<4x16x16xf32> -> vector<4x16x16xf32>
    "tpu.trace_stop"() : () -> ()
    %cst_96 = arith.constant dense<0xFF800000> : vector<4x16xf32>
    %220 = vector.multi_reduction <maximumf>, %219, %cst_96 [2] : vector<4x16x16xf32> to vector<4x16xf32>
    %221 = vector.shape_cast %220 : vector<4x16xf32> to vector<4x16x1xf32>
    %222 = vector.broadcast %221 : vector<4x16x1xf32> to vector<4x16x16xf32>
    %223 = arith.subf %219, %222 : vector<4x16x16xf32>
    %224 = math.exp %223 : vector<4x16x16xf32>
    %cst_97 = arith.constant dense<0.000000e+00> : vector<4x16xf32>
    %225 = vector.multi_reduction <add>, %224, %cst_97 [2] : vector<4x16x16xf32> to vector<4x16xf32>
    %226 = vector.shape_cast %225 : vector<4x16xf32> to vector<4x16x1xf32>
    %227 = tpu.reciprocal %226 {approx = true} : vector<4x16x1xf32> -> vector<4x16x1xf32>
    %228 = vector.broadcast %227 : vector<4x16x1xf32> to vector<4x16x16xf32>
    %229 = arith.mulf %224, %228 : vector<4x16x16xf32>
    "tpu.trace_start"() <{level = 10 : i32, message = "hqk,hkd->hqd"}> : () -> ()
    %cst_98 = arith.constant dense<0.000000e+00> : vector<4x16x8xf32>
    %230 = tpu.matmul %229, %218, %cst_98 {dimension_numbers = #tpu.dot_dimension_numbers<[2], [1], [1], [2], [0, 0, 0, 1, 1, 2], [0], [0]>} : vector<4x16x16xf32>, vector<4x16x8xf32>, vector<4x16x8xf32> -> vector<4x16x8xf32>
    "tpu.trace_stop"() : () -> ()
    %c1_99 = arith.constant 1 : index
    %c0_100 = arith.constant 0 : index
    %c0_101 = arith.constant 0 : index
    %c0_102 = arith.constant 0 : index
    %231 = vector.load %arg10[%c1_99, %c0_100, %c0_101, %c0_102] : memref<3x4x8x32xf32, #tpu.memory_space<vmem>>, vector<1x4x8x32xf32>
    %232 = vector.shape_cast %231 : vector<1x4x8x32xf32> to vector<4x8x32xf32>
    "tpu.trace_start"() <{level = 10 : i32, message = "hqd,hde->hqe"}> : () -> ()
    %cst_103 = arith.constant dense<0.000000e+00> : vector<4x16x32xf32>
    %233 = tpu.matmul %230, %232, %cst_103 {dimension_numbers = #tpu.dot_dimension_numbers<[2], [1], [1], [2], [0, 0, 0, 1, 1, 2], [0], [0]>} : vector<4x16x8xf32>, vector<4x8x32xf32>, vector<4x16x32xf32> -> vector<4x16x32xf32>
    "tpu.trace_stop"() : () -> ()
    %cst_104 = arith.constant dense<0.000000e+00> : vector<16x32xf32>
    %234 = vector.multi_reduction <add>, %233, %cst_104 [0] : vector<4x16x32xf32> to vector<16x32xf32>
    %c1_105 = arith.constant 1 : index
    %c0_106 = arith.constant 0 : index
    %c0_107 = arith.constant 0 : index
    %235 = vector.load %arg11[%c1_105, %c0_106, %c0_107] : memref<3x1x32xf32, #tpu.memory_space<vmem>>, vector<1x1x32xf32>
    %236 = vector.shape_cast %235 : vector<1x1x32xf32> to vector<1x32xf32>
    %237 = vector.broadcast %236 : vector<1x32xf32> to vector<16x32xf32>
    %238 = arith.addf %234, %237 : vector<16x32xf32>
    %239 = arith.addf %156, %238 : vector<16x32xf32>
    %c1_108 = arith.constant 1 : index
    %c0_109 = arith.constant 0 : index
    %c0_110 = arith.constant 0 : index
    %240 = vector.load %arg12[%c1_108, %c0_109, %c0_110] : memref<3x1x32xf32, #tpu.memory_space<vmem>>, vector<1x1x32xf32>
    %241 = vector.shape_cast %240 : vector<1x1x32xf32> to vector<1x32xf32>
    %c1_111 = arith.constant 1 : index
    %c0_112 = arith.constant 0 : index
    %c0_113 = arith.constant 0 : index
    %242 = vector.load %arg13[%c1_111, %c0_112, %c0_113] : memref<3x1x32xf32, #tpu.memory_space<vmem>>, vector<1x1x32xf32>
    %243 = vector.shape_cast %242 : vector<1x1x32xf32> to vector<1x32xf32>
    %cst_114 = arith.constant dense<0.000000e+00> : vector<16xf32>
    %244 = vector.multi_reduction <add>, %239, %cst_114 [1] : vector<16x32xf32> to vector<16xf32>
    %245 = vector.shape_cast %244 : vector<16xf32> to vector<16x1xf32>
    %cst_115 = arith.constant 3.200000e+01 : f32
    %246 = vector.broadcast %cst_115 : f32 to vector<16x1xf32>
    %247 = arith.divf %245, %246 : vector<16x1xf32>
    %248 = vector.broadcast %247 : vector<16x1xf32> to vector<16x32xf32>
    %249 = arith.subf %239, %248 : vector<16x32xf32>
    %250 = arith.mulf %249, %249 : vector<16x32xf32>
    %cst_116 = arith.constant dense<0.000000e+00> : vector<16xf32>
    %251 = vector.multi_reduction <add>, %250, %cst_116 [1] : vector<16x32xf32> to vector<16xf32>
    %252 = vector.shape_cast %251 : vector<16xf32> to vector<16x1xf32>
    %cst_117 = arith.constant 3.200000e+01 : f32
    %253 = vector.broadcast %cst_117 : f32 to vector<16x1xf32>
    %254 = arith.divf %252, %253 : vector<16x1xf32>
    %255 = vector.broadcast %247 : vector<16x1xf32> to vector<16x32xf32>
    %256 = arith.subf %239, %255 : vector<16x32xf32>
    %cst_118 = arith.constant 9.99999974E-6 : f32
    %257 = vector.broadcast %cst_118 : f32 to vector<16x1xf32>
    %258 = arith.addf %254, %257 : vector<16x1xf32>
    %259 = math.rsqrt %258 : vector<16x1xf32>
    %260 = vector.broadcast %259 : vector<16x1xf32> to vector<16x32xf32>
    %261 = arith.mulf %256, %260 : vector<16x32xf32>
    %262 = vector.broadcast %241 : vector<1x32xf32> to vector<16x32xf32>
    %263 = arith.mulf %261, %262 : vector<16x32xf32>
    %264 = vector.broadcast %243 : vector<1x32xf32> to vector<16x32xf32>
    %265 = arith.addf %263, %264 : vector<16x32xf32>
    %c1_119 = arith.constant 1 : index
    %c0_120 = arith.constant 0 : index
    %c0_121 = arith.constant 0 : index
    %266 = vector.load %arg14[%c1_119, %c0_120, %c0_121] : memref<3x32x128xf32, #tpu.memory_space<vmem>>, vector<1x32x128xf32>
    %267 = vector.shape_cast %266 : vector<1x32x128xf32> to vector<32x128xf32>
    %cst_122 = arith.constant dense<0.000000e+00> : vector<16x128xf32>
    %268 = tpu.matmul %265, %267, %cst_122 {dimension_numbers = #tpu.dot_dimension_numbers<[1], [0], [0], [1], [0, 0, 1, 1], [], []>} : vector<16x32xf32>, vector<32x128xf32>, vector<16x128xf32> -> vector<16x128xf32>
    %c1_123 = arith.constant 1 : index
    %c0_124 = arith.constant 0 : index
    %c0_125 = arith.constant 0 : index
    %269 = vector.load %arg15[%c1_123, %c0_124, %c0_125] : memref<3x1x128xf32, #tpu.memory_space<vmem>>, vector<1x1x128xf32>
    %270 = vector.shape_cast %269 : vector<1x1x128xf32> to vector<1x128xf32>
    %271 = vector.broadcast %270 : vector<1x128xf32> to vector<16x128xf32>
    %272 = arith.addf %268, %271 : vector<16x128xf32>
    %273 = arith.mulf %272, %272 : vector<16x128xf32>
    %274 = arith.mulf %272, %273 : vector<16x128xf32>
    %cst_126 = arith.constant 4.471500e-02 : f32
    %275 = vector.broadcast %cst_126 : f32 to vector<16x128xf32>
    %276 = arith.mulf %275, %274 : vector<16x128xf32>
    %277 = arith.addf %272, %276 : vector<16x128xf32>
    %cst_127 = arith.constant 0.797884583 : f32
    %278 = vector.broadcast %cst_127 : f32 to vector<16x128xf32>
    %279 = arith.mulf %278, %277 : vector<16x128xf32>
    %280 = math.tanh %279 : vector<16x128xf32>
    %cst_128 = arith.constant 1.000000e+00 : f32
    %281 = vector.broadcast %cst_128 : f32 to vector<16x128xf32>
    %282 = arith.addf %281, %280 : vector<16x128xf32>
    %cst_129 = arith.constant 5.000000e-01 : f32
    %283 = vector.broadcast %cst_129 : f32 to vector<16x128xf32>
    %284 = arith.mulf %283, %282 : vector<16x128xf32>
    %285 = arith.mulf %272, %284 : vector<16x128xf32>
    %c1_130 = arith.constant 1 : index
    %c0_131 = arith.constant 0 : index
    %c0_132 = arith.constant 0 : index
    %286 = vector.load %arg16[%c1_130, %c0_131, %c0_132] : memref<3x128x32xf32, #tpu.memory_space<vmem>>, vector<1x128x32xf32>
    %287 = vector.shape_cast %286 : vector<1x128x32xf32> to vector<128x32xf32>
    %cst_133 = arith.constant dense<0.000000e+00> : vector<16x32xf32>
    %288 = tpu.matmul %285, %287, %cst_133 {dimension_numbers = #tpu.dot_dimension_numbers<[1], [0], [0], [1], [0, 0, 1, 1], [], []>} : vector<16x128xf32>, vector<128x32xf32>, vector<16x32xf32> -> vector<16x32xf32>
    %c1_134 = arith.constant 1 : index
    %c0_135 = arith.constant 0 : index
    %c0_136 = arith.constant 0 : index
    %289 = vector.load %arg17[%c1_134, %c0_135, %c0_136] : memref<3x1x32xf32, #tpu.memory_space<vmem>>, vector<1x1x32xf32>
    %290 = vector.shape_cast %289 : vector<1x1x32xf32> to vector<1x32xf32>
    %291 = vector.broadcast %290 : vector<1x32xf32> to vector<16x32xf32>
    %292 = arith.addf %288, %291 : vector<16x32xf32>
    %293 = arith.addf %239, %292 : vector<16x32xf32>
    %c2 = arith.constant 2 : index
    %c0_137 = arith.constant 0 : index
    %c0_138 = arith.constant 0 : index
    %294 = vector.load %arg6[%c2, %c0_137, %c0_138] : memref<3x1x32xf32, #tpu.memory_space<vmem>>, vector<1x1x32xf32>
    %295 = vector.shape_cast %294 : vector<1x1x32xf32> to vector<1x32xf32>
    %c2_139 = arith.constant 2 : index
    %c0_140 = arith.constant 0 : index
    %c0_141 = arith.constant 0 : index
    %296 = vector.load %arg7[%c2_139, %c0_140, %c0_141] : memref<3x1x32xf32, #tpu.memory_space<vmem>>, vector<1x1x32xf32>
    %297 = vector.shape_cast %296 : vector<1x1x32xf32> to vector<1x32xf32>
    %cst_142 = arith.constant dense<0.000000e+00> : vector<16xf32>
    %298 = vector.multi_reduction <add>, %293, %cst_142 [1] : vector<16x32xf32> to vector<16xf32>
    %299 = vector.shape_cast %298 : vector<16xf32> to vector<16x1xf32>
    %cst_143 = arith.constant 3.200000e+01 : f32
    %300 = vector.broadcast %cst_143 : f32 to vector<16x1xf32>
    %301 = arith.divf %299, %300 : vector<16x1xf32>
    %302 = vector.broadcast %301 : vector<16x1xf32> to vector<16x32xf32>
    %303 = arith.subf %293, %302 : vector<16x32xf32>
    %304 = arith.mulf %303, %303 : vector<16x32xf32>
    %cst_144 = arith.constant dense<0.000000e+00> : vector<16xf32>
    %305 = vector.multi_reduction <add>, %304, %cst_144 [1] : vector<16x32xf32> to vector<16xf32>
    %306 = vector.shape_cast %305 : vector<16xf32> to vector<16x1xf32>
    %cst_145 = arith.constant 3.200000e+01 : f32
    %307 = vector.broadcast %cst_145 : f32 to vector<16x1xf32>
    %308 = arith.divf %306, %307 : vector<16x1xf32>
    %309 = vector.broadcast %301 : vector<16x1xf32> to vector<16x32xf32>
    %310 = arith.subf %293, %309 : vector<16x32xf32>
    %cst_146 = arith.constant 9.99999974E-6 : f32
    %311 = vector.broadcast %cst_146 : f32 to vector<16x1xf32>
    %312 = arith.addf %308, %311 : vector<16x1xf32>
    %313 = math.rsqrt %312 : vector<16x1xf32>
    %314 = vector.broadcast %313 : vector<16x1xf32> to vector<16x32xf32>
    %315 = arith.mulf %310, %314 : vector<16x32xf32>
    %316 = vector.broadcast %295 : vector<1x32xf32> to vector<16x32xf32>
    %317 = arith.mulf %315, %316 : vector<16x32xf32>
    %318 = vector.broadcast %297 : vector<1x32xf32> to vector<16x32xf32>
    %319 = arith.addf %317, %318 : vector<16x32xf32>
    %c2_147 = arith.constant 2 : index
    %c0_148 = arith.constant 0 : index
    %c0_149 = arith.constant 0 : index
    %320 = vector.load %arg8[%c2_147, %c0_148, %c0_149] : memref<3x32x96xf32, #tpu.memory_space<vmem>>, vector<1x32x96xf32>
    %321 = vector.shape_cast %320 : vector<1x32x96xf32> to vector<32x96xf32>
    %cst_150 = arith.constant dense<0.000000e+00> : vector<16x96xf32>
    %322 = tpu.matmul %319, %321, %cst_150 {dimension_numbers = #tpu.dot_dimension_numbers<[1], [0], [0], [1], [0, 0, 1, 1], [], []>} : vector<16x32xf32>, vector<32x96xf32>, vector<16x96xf32> -> vector<16x96xf32>
    %c2_151 = arith.constant 2 : index
    %c0_152 = arith.constant 0 : index
    %c0_153 = arith.constant 0 : index
    %323 = vector.load %arg9[%c2_151, %c0_152, %c0_153] : memref<3x1x96xf32, #tpu.memory_space<vmem>>, vector<1x1x96xf32>
    %324 = vector.shape_cast %323 : vector<1x1x96xf32> to vector<1x96xf32>
    %325 = vector.broadcast %324 : vector<1x96xf32> to vector<16x96xf32>
    %326 = arith.addf %322, %325 : vector<16x96xf32>
    %327 = vector.extract_strided_slice %326 {offsets = [0, 0], sizes = [16, 8], strides = [1, 1]} : vector<16x96xf32> to vector<16x8xf32>
    %328 = vector.extract_strided_slice %326 {offsets = [0, 8], sizes = [16, 8], strides = [1, 1]} : vector<16x96xf32> to vector<16x8xf32>
    %329 = vector.extract_strided_slice %326 {offsets = [0, 16], sizes = [16, 8], strides = [1, 1]} : vector<16x96xf32> to vector<16x8xf32>
    %330 = vector.extract_strided_slice %326 {offsets = [0, 24], sizes = [16, 8], strides = [1, 1]} : vector<16x96xf32> to vector<16x8xf32>
    %331 = vector.shape_cast %327 : vector<16x8xf32> to vector<1x16x8xf32>
    %332 = vector.shape_cast %328 : vector<16x8xf32> to vector<1x16x8xf32>
    %333 = vector.shape_cast %329 : vector<16x8xf32> to vector<1x16x8xf32>
    %334 = vector.shape_cast %330 : vector<16x8xf32> to vector<1x16x8xf32>
    %335 = tpu.concatenate %331, %332, %333, %334 in 0 : vector<1x16x8xf32>, vector<1x16x8xf32>, vector<1x16x8xf32>, vector<1x16x8xf32> -> vector<4x16x8xf32>
    %cst_154 = arith.constant 0.353553385 : f32
    %336 = vector.broadcast %cst_154 : f32 to vector<4x16x8xf32>
    %337 = arith.mulf %335, %336 : vector<4x16x8xf32>
    %338 = vector.extract_strided_slice %326 {offsets = [0, 32], sizes = [16, 8], strides = [1, 1]} : vector<16x96xf32> to vector<16x8xf32>
    %339 = vector.extract_strided_slice %326 {offsets = [0, 40], sizes = [16, 8], strides = [1, 1]} : vector<16x96xf32> to vector<16x8xf32>
    %340 = vector.extract_strided_slice %326 {offsets = [0, 48], sizes = [16, 8], strides = [1, 1]} : vector<16x96xf32> to vector<16x8xf32>
    %341 = vector.extract_strided_slice %326 {offsets = [0, 56], sizes = [16, 8], strides = [1, 1]} : vector<16x96xf32> to vector<16x8xf32>
    %342 = vector.shape_cast %338 : vector<16x8xf32> to vector<1x16x8xf32>
    %343 = vector.shape_cast %339 : vector<16x8xf32> to vector<1x16x8xf32>
    %344 = vector.shape_cast %340 : vector<16x8xf32> to vector<1x16x8xf32>
    %345 = vector.shape_cast %341 : vector<16x8xf32> to vector<1x16x8xf32>
    %346 = tpu.concatenate %342, %343, %344, %345 in 0 : vector<1x16x8xf32>, vector<1x16x8xf32>, vector<1x16x8xf32>, vector<1x16x8xf32> -> vector<4x16x8xf32>
    %347 = vector.extract_strided_slice %326 {offsets = [0, 64], sizes = [16, 8], strides = [1, 1]} : vector<16x96xf32> to vector<16x8xf32>
    %348 = vector.extract_strided_slice %326 {offsets = [0, 72], sizes = [16, 8], strides = [1, 1]} : vector<16x96xf32> to vector<16x8xf32>
    %349 = vector.extract_strided_slice %326 {offsets = [0, 80], sizes = [16, 8], strides = [1, 1]} : vector<16x96xf32> to vector<16x8xf32>
    %350 = vector.extract_strided_slice %326 {offsets = [0, 88], sizes = [16, 8], strides = [1, 1]} : vector<16x96xf32> to vector<16x8xf32>
    %351 = vector.shape_cast %347 : vector<16x8xf32> to vector<1x16x8xf32>
    %352 = vector.shape_cast %348 : vector<16x8xf32> to vector<1x16x8xf32>
    %353 = vector.shape_cast %349 : vector<16x8xf32> to vector<1x16x8xf32>
    %354 = vector.shape_cast %350 : vector<16x8xf32> to vector<1x16x8xf32>
    %355 = tpu.concatenate %351, %352, %353, %354 in 0 : vector<1x16x8xf32>, vector<1x16x8xf32>, vector<1x16x8xf32>, vector<1x16x8xf32> -> vector<4x16x8xf32>
    "tpu.trace_start"() <{level = 10 : i32, message = "hqd,hkd->hqk"}> : () -> ()
    %cst_155 = arith.constant dense<0.000000e+00> : vector<4x16x16xf32>
    %356 = tpu.matmul %337, %346, %cst_155 {dimension_numbers = #tpu.dot_dimension_numbers<[2], [2], [1], [1], [0, 0, 0, 1, 1, 1], [0], [0]>} : vector<4x16x8xf32>, vector<4x16x8xf32>, vector<4x16x16xf32> -> vector<4x16x16xf32>
    "tpu.trace_stop"() : () -> ()
    %cst_156 = arith.constant dense<0xFF800000> : vector<4x16xf32>
    %357 = vector.multi_reduction <maximumf>, %356, %cst_156 [2] : vector<4x16x16xf32> to vector<4x16xf32>
    %358 = vector.shape_cast %357 : vector<4x16xf32> to vector<4x16x1xf32>
    %359 = vector.broadcast %358 : vector<4x16x1xf32> to vector<4x16x16xf32>
    %360 = arith.subf %356, %359 : vector<4x16x16xf32>
    %361 = math.exp %360 : vector<4x16x16xf32>
    %cst_157 = arith.constant dense<0.000000e+00> : vector<4x16xf32>
    %362 = vector.multi_reduction <add>, %361, %cst_157 [2] : vector<4x16x16xf32> to vector<4x16xf32>
    %363 = vector.shape_cast %362 : vector<4x16xf32> to vector<4x16x1xf32>
    %364 = tpu.reciprocal %363 {approx = true} : vector<4x16x1xf32> -> vector<4x16x1xf32>
    %365 = vector.broadcast %364 : vector<4x16x1xf32> to vector<4x16x16xf32>
    %366 = arith.mulf %361, %365 : vector<4x16x16xf32>
    "tpu.trace_start"() <{level = 10 : i32, message = "hqk,hkd->hqd"}> : () -> ()
    %cst_158 = arith.constant dense<0.000000e+00> : vector<4x16x8xf32>
    %367 = tpu.matmul %366, %355, %cst_158 {dimension_numbers = #tpu.dot_dimension_numbers<[2], [1], [1], [2], [0, 0, 0, 1, 1, 2], [0], [0]>} : vector<4x16x16xf32>, vector<4x16x8xf32>, vector<4x16x8xf32> -> vector<4x16x8xf32>
    "tpu.trace_stop"() : () -> ()
    %c2_159 = arith.constant 2 : index
    %c0_160 = arith.constant 0 : index
    %c0_161 = arith.constant 0 : index
    %c0_162 = arith.constant 0 : index
    %368 = vector.load %arg10[%c2_159, %c0_160, %c0_161, %c0_162] : memref<3x4x8x32xf32, #tpu.memory_space<vmem>>, vector<1x4x8x32xf32>
    %369 = vector.shape_cast %368 : vector<1x4x8x32xf32> to vector<4x8x32xf32>
    "tpu.trace_start"() <{level = 10 : i32, message = "hqd,hde->hqe"}> : () -> ()
    %cst_163 = arith.constant dense<0.000000e+00> : vector<4x16x32xf32>
    %370 = tpu.matmul %367, %369, %cst_163 {dimension_numbers = #tpu.dot_dimension_numbers<[2], [1], [1], [2], [0, 0, 0, 1, 1, 2], [0], [0]>} : vector<4x16x8xf32>, vector<4x8x32xf32>, vector<4x16x32xf32> -> vector<4x16x32xf32>
    "tpu.trace_stop"() : () -> ()
    %cst_164 = arith.constant dense<0.000000e+00> : vector<16x32xf32>
    %371 = vector.multi_reduction <add>, %370, %cst_164 [0] : vector<4x16x32xf32> to vector<16x32xf32>
    %c2_165 = arith.constant 2 : index
    %c0_166 = arith.constant 0 : index
    %c0_167 = arith.constant 0 : index
    %372 = vector.load %arg11[%c2_165, %c0_166, %c0_167] : memref<3x1x32xf32, #tpu.memory_space<vmem>>, vector<1x1x32xf32>
    %373 = vector.shape_cast %372 : vector<1x1x32xf32> to vector<1x32xf32>
    %374 = vector.broadcast %373 : vector<1x32xf32> to vector<16x32xf32>
    %375 = arith.addf %371, %374 : vector<16x32xf32>
    %376 = arith.addf %293, %375 : vector<16x32xf32>
    %c2_168 = arith.constant 2 : index
    %c0_169 = arith.constant 0 : index
    %c0_170 = arith.constant 0 : index
    %377 = vector.load %arg12[%c2_168, %c0_169, %c0_170] : memref<3x1x32xf32, #tpu.memory_space<vmem>>, vector<1x1x32xf32>
    %378 = vector.shape_cast %377 : vector<1x1x32xf32> to vector<1x32xf32>
    %c2_171 = arith.constant 2 : index
    %c0_172 = arith.constant 0 : index
    %c0_173 = arith.constant 0 : index
    %379 = vector.load %arg13[%c2_171, %c0_172, %c0_173] : memref<3x1x32xf32, #tpu.memory_space<vmem>>, vector<1x1x32xf32>
    %380 = vector.shape_cast %379 : vector<1x1x32xf32> to vector<1x32xf32>
    %cst_174 = arith.constant dense<0.000000e+00> : vector<16xf32>
    %381 = vector.multi_reduction <add>, %376, %cst_174 [1] : vector<16x32xf32> to vector<16xf32>
    %382 = vector.shape_cast %381 : vector<16xf32> to vector<16x1xf32>
    %cst_175 = arith.constant 3.200000e+01 : f32
    %383 = vector.broadcast %cst_175 : f32 to vector<16x1xf32>
    %384 = arith.divf %382, %383 : vector<16x1xf32>
    %385 = vector.broadcast %384 : vector<16x1xf32> to vector<16x32xf32>
    %386 = arith.subf %376, %385 : vector<16x32xf32>
    %387 = arith.mulf %386, %386 : vector<16x32xf32>
    %cst_176 = arith.constant dense<0.000000e+00> : vector<16xf32>
    %388 = vector.multi_reduction <add>, %387, %cst_176 [1] : vector<16x32xf32> to vector<16xf32>
    %389 = vector.shape_cast %388 : vector<16xf32> to vector<16x1xf32>
    %cst_177 = arith.constant 3.200000e+01 : f32
    %390 = vector.broadcast %cst_177 : f32 to vector<16x1xf32>
    %391 = arith.divf %389, %390 : vector<16x1xf32>
    %392 = vector.broadcast %384 : vector<16x1xf32> to vector<16x32xf32>
    %393 = arith.subf %376, %392 : vector<16x32xf32>
    %cst_178 = arith.constant 9.99999974E-6 : f32
    %394 = vector.broadcast %cst_178 : f32 to vector<16x1xf32>
    %395 = arith.addf %391, %394 : vector<16x1xf32>
    %396 = math.rsqrt %395 : vector<16x1xf32>
    %397 = vector.broadcast %396 : vector<16x1xf32> to vector<16x32xf32>
    %398 = arith.mulf %393, %397 : vector<16x32xf32>
    %399 = vector.broadcast %378 : vector<1x32xf32> to vector<16x32xf32>
    %400 = arith.mulf %398, %399 : vector<16x32xf32>
    %401 = vector.broadcast %380 : vector<1x32xf32> to vector<16x32xf32>
    %402 = arith.addf %400, %401 : vector<16x32xf32>
    %c2_179 = arith.constant 2 : index
    %c0_180 = arith.constant 0 : index
    %c0_181 = arith.constant 0 : index
    %403 = vector.load %arg14[%c2_179, %c0_180, %c0_181] : memref<3x32x128xf32, #tpu.memory_space<vmem>>, vector<1x32x128xf32>
    %404 = vector.shape_cast %403 : vector<1x32x128xf32> to vector<32x128xf32>
    %cst_182 = arith.constant dense<0.000000e+00> : vector<16x128xf32>
    %405 = tpu.matmul %402, %404, %cst_182 {dimension_numbers = #tpu.dot_dimension_numbers<[1], [0], [0], [1], [0, 0, 1, 1], [], []>} : vector<16x32xf32>, vector<32x128xf32>, vector<16x128xf32> -> vector<16x128xf32>
    %c2_183 = arith.constant 2 : index
    %c0_184 = arith.constant 0 : index
    %c0_185 = arith.constant 0 : index
    %406 = vector.load %arg15[%c2_183, %c0_184, %c0_185] : memref<3x1x128xf32, #tpu.memory_space<vmem>>, vector<1x1x128xf32>
    %407 = vector.shape_cast %406 : vector<1x1x128xf32> to vector<1x128xf32>
    %408 = vector.broadcast %407 : vector<1x128xf32> to vector<16x128xf32>
    %409 = arith.addf %405, %408 : vector<16x128xf32>
    %410 = arith.mulf %409, %409 : vector<16x128xf32>
    %411 = arith.mulf %409, %410 : vector<16x128xf32>
    %cst_186 = arith.constant 4.471500e-02 : f32
    %412 = vector.broadcast %cst_186 : f32 to vector<16x128xf32>
    %413 = arith.mulf %412, %411 : vector<16x128xf32>
    %414 = arith.addf %409, %413 : vector<16x128xf32>
    %cst_187 = arith.constant 0.797884583 : f32
    %415 = vector.broadcast %cst_187 : f32 to vector<16x128xf32>
    %416 = arith.mulf %415, %414 : vector<16x128xf32>
    %417 = math.tanh %416 : vector<16x128xf32>
    %cst_188 = arith.constant 1.000000e+00 : f32
    %418 = vector.broadcast %cst_188 : f32 to vector<16x128xf32>
    %419 = arith.addf %418, %417 : vector<16x128xf32>
    %cst_189 = arith.constant 5.000000e-01 : f32
    %420 = vector.broadcast %cst_189 : f32 to vector<16x128xf32>
    %421 = arith.mulf %420, %419 : vector<16x128xf32>
    %422 = arith.mulf %409, %421 : vector<16x128xf32>
    %c2_190 = arith.constant 2 : index
    %c0_191 = arith.constant 0 : index
    %c0_192 = arith.constant 0 : index
    %423 = vector.load %arg16[%c2_190, %c0_191, %c0_192] : memref<3x128x32xf32, #tpu.memory_space<vmem>>, vector<1x128x32xf32>
    %424 = vector.shape_cast %423 : vector<1x128x32xf32> to vector<128x32xf32>
    %cst_193 = arith.constant dense<0.000000e+00> : vector<16x32xf32>
    %425 = tpu.matmul %422, %424, %cst_193 {dimension_numbers = #tpu.dot_dimension_numbers<[1], [0], [0], [1], [0, 0, 1, 1], [], []>} : vector<16x128xf32>, vector<128x32xf32>, vector<16x32xf32> -> vector<16x32xf32>
    %c2_194 = arith.constant 2 : index
    %c0_195 = arith.constant 0 : index
    %c0_196 = arith.constant 0 : index
    %426 = vector.load %arg17[%c2_194, %c0_195, %c0_196] : memref<3x1x32xf32, #tpu.memory_space<vmem>>, vector<1x1x32xf32>
    %427 = vector.shape_cast %426 : vector<1x1x32xf32> to vector<1x32xf32>
    %428 = vector.broadcast %427 : vector<1x32xf32> to vector<16x32xf32>
    %429 = arith.addf %425, %428 : vector<16x32xf32>
    %430 = arith.addf %376, %429 : vector<16x32xf32>
    %c0_197 = arith.constant 0 : index
    %c0_198 = arith.constant 0 : index
    %c0_199 = arith.constant 0 : index
    %431 = vector.load %arg18[%c0_197, %c0_198, %c0_199] : memref<1x16x32xf32, #tpu.memory_space<vmem>>, vector<1x16x32xf32>
    %432 = vector.shape_cast %431 : vector<1x16x32xf32> to vector<16x32xf32>
    %433 = vector.shape_cast %430 : vector<16x32xf32> to vector<1x16x32xf32>
    tpu.vector_store %arg18[%c0_197, %c0_198, %c0_199], %433 {strides = array<i32>} : memref<1x16x32xf32, #tpu.memory_space<vmem>>, vector<1x16x32xf32>,
    return
  }
  func.func @transform_0(%arg0: i32) -> (i32, i32, i32) {
    %c0_i32 = arith.constant 0 : i32
    %c0_i32_0 = arith.constant 0 : i32
    %c0_i32_1 = arith.constant 0 : i32
    return %arg0, %c0_i32, %c0_i32_0 : i32, i32, i32
  }
  func.func @transform_1(%arg0: i32) -> (i32, i32, i32) {
    %c0_i32 = arith.constant 0 : i32
    %c0_i32_0 = arith.constant 0 : i32
    %c0_i32_1 = arith.constant 0 : i32
    return %arg0, %c0_i32, %c0_i32_0 : i32, i32, i32
  }
  func.func @transform_2(%arg0: i32) -> (i32, i32, i32) {
    %c0_i32 = arith.constant 0 : i32
    %c0_i32_0 = arith.constant 0 : i32
    %c0_i32_1 = arith.constant 0 : i32
    %c0_i32_2 = arith.constant 0 : i32
    return %c0_i32, %c0_i32_0, %c0_i32_1 : i32, i32, i32
  }
  func.func @transform_3(%arg0: i32) -> (i32, i32) {
    %c0_i32 = arith.constant 0 : i32
    %c0_i32_0 = arith.constant 0 : i32
    %c0_i32_1 = arith.constant 0 : i32
    return %c0_i32, %c0_i32_0 : i32, i32
  }
  func.func @transform_4(%arg0: i32) -> (i32, i32) {
    %c0_i32 = arith.constant 0 : i32
    %c0_i32_0 = arith.constant 0 : i32
    %c0_i32_1 = arith.constant 0 : i32
    return %c0_i32, %c0_i32_0 : i32, i32
  }
  func.func @transform_5(%arg0: i32) -> (i32, i32, i32) {
    %c0_i32 = arith.constant 0 : i32
    %c0_i32_0 = arith.constant 0 : i32
    %c0_i32_1 = arith.constant 0 : i32
    %c0_i32_2 = arith.constant 0 : i32
    return %c0_i32, %c0_i32_0, %c0_i32_1 : i32, i32, i32
  }
  func.func @transform_6(%arg0: i32) -> (i32, i32, i32) {
    %c0_i32 = arith.constant 0 : i32
    %c0_i32_0 = arith.constant 0 : i32
    %c0_i32_1 = arith.constant 0 : i32
    %c0_i32_2 = arith.constant 0 : i32
    return %c0_i32, %c0_i32_0, %c0_i32_1 : i32, i32, i32
  }
  func.func @transform_7(%arg0: i32) -> (i32, i32, i32) {
    %c0_i32 = arith.constant 0 : i32
    %c0_i32_0 = arith.constant 0 : i32
    %c0_i32_1 = arith.constant 0 : i32
    %c0_i32_2 = arith.constant 0 : i32
    return %c0_i32, %c0_i32_0, %c0_i32_1 : i32, i32, i32
  }
  func.func @transform_8(%arg0: i32) -> (i32, i32, i32) {
    %c0_i32 = arith.constant 0 : i32
    %c0_i32_0 = arith.constant 0 : i32
    %c0_i32_1 = arith.constant 0 : i32
    %c0_i32_2 = arith.constant 0 : i32
    return %c0_i32, %c0_i32_0, %c0_i32_1 : i32, i32, i32
  }
  func.func @transform_9(%arg0: i32) -> (i32, i32, i32, i32) {
    %c0_i32 = arith.constant 0 : i32
    %c0_i32_0 = arith.constant 0 : i32
    %c0_i32_1 = arith.constant 0 : i32
    %c0_i32_2 = arith.constant 0 : i32
    %c0_i32_3 = arith.constant 0 : i32
    return %c0_i32, %c0_i32_0, %c0_i32_1, %c0_i32_2 : i32, i32, i32, i32
  }
  func.func @transform_10(%arg0: i32) -> (i32, i32, i32) {
    %c0_i32 = arith.constant 0 : i32
    %c0_i32_0 = arith.constant 0 : i32
    %c0_i32_1 = arith.constant 0 : i32
    %c0_i32_2 = arith.constant 0 : i32
    return %c0_i32, %c0_i32_0, %c0_i32_1 : i32, i32, i32
  }
  func.func @transform_11(%arg0: i32) -> (i32, i32, i32) {
    %c0_i32 = arith.constant 0 : i32
    %c0_i32_0 = arith.constant 0 : i32
    %c0_i32_1 = arith.constant 0 : i32
    %c0_i32_2 = arith.constant 0 : i32
    return %c0_i32, %c0_i32_0, %c0_i32_1 : i32, i32, i32
  }
  func.func @transform_12(%arg0: i32) -> (i32, i32, i32) {
    %c0_i32 = arith.constant 0 : i32
    %c0_i32_0 = arith.constant 0 : i32
    %c0_i32_1 = arith.constant 0 : i32
    %c0_i32_2 = arith.constant 0 : i32
    return %c0_i32, %c0_i32_0, %c0_i32_1 : i32, i32, i32
  }
  func.func @transform_13(%arg0: i32) -> (i32, i32, i32) {
    %c0_i32 = arith.constant 0 : i32
    %c0_i32_0 = arith.constant 0 : i32
    %c0_i32_1 = arith.constant 0 : i32
    %c0_i32_2 = arith.constant 0 : i32
    return %c0_i32, %c0_i32_0, %c0_i32_1 : i32, i32, i32
  }
  func.func @transform_14(%arg0: i32) -> (i32, i32, i32) {
    %c0_i32 = arith.constant 0 : i32
    %c0_i32_0 = arith.constant 0 : i32
    %c0_i32_1 = arith.constant 0 : i32
    %c0_i32_2 = arith.constant 0 : i32
    return %c0_i32, %c0_i32_0, %c0_i32_1 : i32, i32, i32
  }
  func.func @transform_15(%arg0: i32) -> (i32, i32, i32) {
    %c0_i32 = arith.constant 0 : i32
    %c0_i32_0 = arith.constant 0 : i32
    %c0_i32_1 = arith.constant 0 : i32
    %c0_i32_2 = arith.constant 0 : i32
    return %c0_i32, %c0_i32_0, %c0_i32_1 : i32, i32, i32
  }
  func.func @transform_16(%arg0: i32) -> (i32, i32, i32) {
    %c0_i32 = arith.constant 0 : i32
    %c0_i32_0 = arith.constant 0 : i32
    %c0_i32_1 = arith.constant 0 : i32
    %c0_i32_2 = arith.constant 0 : i32
    return %c0_i32, %c0_i32_0, %c0_i32_1 : i32, i32, i32
  }
  func.func @transform_17(%arg0: i32) -> (i32, i32, i32) {
    %c0_i32 = arith.constant 0 : i32
    %c0_i32_0 = arith.constant 0 : i32
    %c0_i32_1 = arith.constant 0 : i32
    return %arg0, %c0_i32, %c0_i32_0 : i32, i32, i32
  }
}

</mosaic_0001>

<bundles_post_ra>
// kernel: permutation_composer_forward.1
= control target key start
LH: loop header
LB: loop body
LE: loop exit
PB: predicated region body
PF: predicated region fallthrough
CT: control target
= control target key end

     0   :  { %s8775_s0 = inlined_call_operand.vmem [shape: f32[2,16,32], index: 0, kind: input, shape index: {}]   ;;  %s8776_s1 = inlined_call_operand.vmem [shape: f32[2,16,32], index: 1, kind: input, shape index: {}]   ;;  %s8777_s2 = inlined_call_operand.vmem [shape: f32[2,1,32], index: 2, kind: input, shape index: {}]   ;;  %s8778_s3 = inlined_call_operand.vmem [shape: f32[32,32], index: 3, kind: input, shape index: {}]   ;;  %s8779_s4 = inlined_call_operand.vmem [shape: f32[32,32], index: 4, kind: input, shape index: {}]   ;;  %s8780_s5 = inlined_call_operand.vmem [shape: f32[3,1,32], index: 5, kind: input, shape index: {}]   ;;  %s8781_s6 = inlined_call_operand.vmem [shape: f32[3,1,32], index: 6, kind: input, shape index: {}]   ;;  %s8782_s7 = inlined_call_operand.vmem [shape: f32[3,32,96], index: 7, kind: input, shape index: {}]   ;;  %s8783_s8 = inlined_call_operand.vmem [shape: f32[3,1,96], index: 8, kind: input, shape index: {}]   ;;  %s8784_s9 = inlined_call_operand.vmem [shape: f32[3,4,8,32], index: 9, kind: input, shape index: {}]   ;;  %s8785_s10 = inlined_call_operand.vmem [shape: f32[3,1,32], index: 10, kind: input, shape index: {}]   ;;  %s8786_s11 = inlined_call_operand.vmem [shape: f32[3,1,32], index: 11, kind: input, shape index: {}]   ;;  %s8787_s12 = inlined_call_operand.vmem [shape: f32[3,1,32], index: 12, kind: input, shape index: {}]   ;;  %s8788_s13 = inlined_call_operand.vmem [shape: f32[3,32,128], index: 13, kind: input, shape index: {}]   ;;  %s8789_s14 = inlined_call_operand.vmem [shape: f32[3,1,128], index: 14, kind: input, shape index: {}]   ;;  %s8790_s15 = inlined_call_operand.vmem [shape: f32[3,128,32], index: 15, kind: input, shape index: {}]   ;;  %s8791_s16 = inlined_call_operand.vmem [shape: f32[3,1,32], index: 16, kind: input, shape index: {}]   ;;  %s8792_s17 = inlined_call_operand.hbm [shape: f32[2,16,32], index: 17, kind: output, shape index: {}]  }
   0x1   :  { %8802 = sst [smem:[#allocation12_spill]] %s8775_s0 }
   0x2   :  { %8803 = sst [smem:[#allocation13_spill]] %s8776_s1 }
   0x3   :  { %8804 = sst [smem:[#allocation14_spill]] %s8792_s17 }
   0x4   :  { %22 = vsyncpa [#allocation3], 0 }
   0x5   :  { %24 = vsyncpa [#allocation3 + $0x1], 0  ;;  %s7503_s24 = smov 0   ;;  %s7505_s25 = smov 0  }
   0x6   :  { %s7507_s26 = smov 0   ;;  %s7509_s27 = smov 0  }
   0x7 LB: > { %8805 = sst [smem:[#allocation5_spill]] %s7391_s24  ;;  %s7524_s28 = sadd.s32 4294967295, %s7403_s27   ;;  %s7403_s27 = sphi %s7509_s27, %s8821_s27   ;;  %s7399_s26 = sphi %s7507_s26, %s8823_s26   ;;  %s7395_s25 = sphi %s7505_s25, %s8825_s25   ;;  %s7391_s24 = sphi %s7503_s24, %s8824_s24  }
   0x8   : > { %8806 = sst [smem:[#allocation6_spill]] %s7399_s26  ;;  %s6071_s29 = sadd.s32 4294967294, %s7403_s27  }
   0x9   : > { %8807 = sst [smem:[#allocation7_spill]] %s7403_s27  ;;  %s7528_s0 = sadd.s32 1, %s7403_s27  }
   0xa   : > { %8808 = sst [smem:[#allocation8_spill]] %s7528_s0  ;;  %s404_s30 = sadd.s32 1, %s7399_s26 }
   0xb   : > { %s401_s18 = ssub.s32 %s7403_s27, %s7528_s0  ;;  %p414_p0 = scmp.ne.s32.totalorder %s7399_s26, %s7395_s25 }
   0xc   : > { %p402_p1 = scmp.eq.s32.totalorder %s401_s18, 0  ;;  %p415_p2 = scmp.eq.s32.totalorder %s7524_s28, 1 }
   0xd   : > { %p420_p3 = scmp.ne.s32.totalorder %s7395_s25, %s7391_s24  ;;  %p421_p4 = scmp.eq.s32.totalorder %s6071_s29, 1 }
   0xe   : > { %s7539_s19 = scalar_select %p402_p1, %s7399_s26, %s404_s30  }
   0xf   : > { %p7541_p5 = por %p415_p2, %p414_p0  ;;  %p7545_p6 = por %p421_p4, %p420_p3 }
  0x10   : > { %8809 = sst [smem:[#allocation9_spill]] %s7539_s19  ;;  %p6074_p7 = scmp.ge.s32.totalorder %s7403_s27, 1 }
  0x11   : > { %s8810_s1 = scalar_select %p7541_p5, 1, 0 }
  0x12   : > { %s8812_s20 = scalar_select %p7545_p6, 1, 0 }
  0x13   : > { %8811 = sst [smem:[#allocation10_spill]] %s8810_s1  ;;  %p500_p8 = scmp.lt.s32.totalorder %s7403_s27, 3 }
  0x14   : > { %8813 = sst [smem:[#allocation11_spill]] %s8812_s20 }
  0x15   : > { %p501_p9 = pnand %p6074_p7, %p500_p8 }
  0x16   : > { %p557_p10 = scmp.lt.s32.totalorder (!%p501_p9), %s7524_s28, 1  ;;  %s8814_s0 = sld [smem:[#allocation12_spill]] (!%p501_p9) }
  0x17   : > { %504 = sbr.rel (%p501_p9) target bundleno = 7488 (0x1d40), region = 88  ;;  %s8815_s17 = sld [smem:[#allocation13_spill]] (!%p501_p9) }
  0x18   : > { %s7406_s24 = smov (!%p501_p9), 112   ;;  %s7407_s26 = smov (!%p501_p9), 104  }
  0x19   : > { %s7408_s27 = smov (!%p501_p9), 96   ;;  %s6334_s19 = sshll.u32 (!%p501_p9), %s7524_s28, 8 }
  0x1a   : > { %s7410_s29 = smov (!%p501_p9), [#allocation2]  }
  0x1c   : > { %s558_s21 = scalar_select %p557_p10, %s7524_s28, 1  ;;  %v6080_v0 = vld [vmem:[%s8777_s2] ss:$0 sm:$0xff]  ;;  %v6082_v1 = vld [vmem:[%s8777_s2 + $0x1] ss:$0 sm:$0xff]  ;;  %vm592_vm0 = vcmask 261120  }
  0x1d   : > { %v669_v34 = vld [vmem:[%s8782_s7 + $0x18] sm:$0xff]  ;;  %v668_v35 = vld [vmem:[%s8782_s7 + $0x10] sm:$0xff]  ;;  %v667_v36 = vld [vmem:[%s8782_s7 + $0x8] sm:$0xff]  ;;  %vm838_vm1 = vcmask 64512   ;;  %vm3354_vm2 = vcmask 130048  }
  0x1e   : > { %s6332_s22 = sshll.u32 %s558_s21, 4  ;;  %6615 = vmatprep.subr.mxu0 %v669_v34  ;;  %v666_v37 = vld [vmem:[%s8782_s7] sm:$0xff]  ;;  %s8817_s21 = sld [smem:[#allocation14_spill]] }
  0x1f   : > { %s561_s20 = scalar_lea.vmem %s8814_s0, %s6332_s22  ;;  %s566_s1 = scalar_lea.vmem %s8815_s17, %s6332_s22  ;;  %6616 = vmatpush3.msra.mxu0 %v669_v34  ;;  %v6083_v51 = vld [vmem:[%s8780_s5] ss:$0 sm:$0xff] }
  0x20   : > { %v567_v2 = vld [vmem:[%s561_s20] sm:$0xff]  ;;  %v568_v4 = vld [vmem:[%s561_s20 + $0x8] sm:$0xff]  ;;  %6617 = vmatprep.subr.mxu0 %v668_v35  ;;  %s7405_s17 = smov 120   ;;  %s7409_s0 = smov 64  }
  0x21   : > { %v578_v3 = vld [vmem:[%s566_s1] sm:$0xff]  ;;  %v7565_v5 = vadd.f32 %v6080_v0, %v567_v2  ;;  %v7569_v7 = vadd.f32 %v6080_v0, %v568_v4  ;;  %v579_v8 = vld [vmem:[%s566_s1 + $0x8] sm:$0xff]  ;;  %6618 = vmatpush3.msra.mxu0 %v668_v35 }
  0x22   : > { %v7567_v6 = vadd.f32 %v6082_v1, %v578_v3  ;;  %v7571_v9 = vadd.f32 %v6082_v1, %v579_v8  ;;  %6619 = vmatprep.subr.mxu0 %v667_v36  ;;  %v6084_v53 = vld [vmem:[%s8781_s6] ss:$0 sm:$0xff] }
  0x23   : > { %v593_v10 = vsel %vm592_vm0, %v7565_v5, 0.0  ;;  %v596_v12 = vsel %vm592_vm0, %v7569_v7, 0.0  ;;  %6620 = vmatpush3.msra.mxu0 %v667_v36  ;;  %v6085_v8 = vld [vmem:[%s8783_s8] ss:$0 sm:$0xff] }
  0x24   : > { %v599_v11 = vsel %vm592_vm0, %v7567_v6, 0.0  ;;  %594 = vadd.xlane.f32.xlu0 %v593_v10  ;;  %v602_v13 = vsel %vm592_vm0, %v7571_v9, 0.0  ;;  %6621 = vmatprep.subr.mxu0 %v666_v37  ;;  %s8728_s22 = scalar_lea.hbm %s8817_s21, %s6334_s19 }
  0x25   : > { %600 = vadd.xlane.f32.xlu1 %v599_v11  ;;  %6622 = vmatpush3.msra.mxu0 %v666_v37 }
  0x28   : > { %597 = vadd.xlane.f32.xlu0 %v596_v12 }
  0x29   : > { %603 = vadd.xlane.f32.xlu1 %v602_v13 }
  0xad   : > { %v595_v14 = vpop.xlane.xlu0 %594 }
  0xae   : > { %v601_v15 = vpop.xlane.xlu1 %600  ;;  %v606_v16 = vmul.f32 0.03125, %v595_v14 }
  0xaf   : > { %v608_v17 = vmul.f32 0.03125, %v601_v15 }
  0xb0   : > { %v610_v18 = vsub.f32 %v7565_v5, %v606_v16 }
  0xb1   : > { %v612_v19 = vsub.f32 %v7567_v6, %v608_v17  ;;  %v598_v20 = vpop.xlane.xlu0 %597 }
  0xb2   : > { %v604_v21 = vpop.xlane.xlu1 %603  ;;  %v607_v22 = vmul.f32 0.03125, %v598_v20  ;;  %v614_v24 = vmul.f32 %v610_v18, %v610_v18 }
  0xb3   : > { %v609_v23 = vmul.f32 0.03125, %v604_v21  ;;  %v616_v25 = vmul.f32 %v612_v19, %v612_v19 }
  0xb4   : > { %v611_v26 = vsub.f32 %v7569_v7, %v607_v22  ;;  %v618_v28 = vsel %vm592_vm0, %v614_v24, 0.0 }
  0xb5   : > { %v613_v27 = vsub.f32 %v7571_v9, %v609_v23  ;;  %619 = vadd.xlane.f32.xlu0 %v618_v28  ;;  %v624_v29 = vsel %vm592_vm0, %v616_v25, 0.0 }
  0xb6   : > { %v615_v30 = vmul.f32 %v611_v26, %v611_v26 }
  0xb7   : > { %v617_v31 = vmul.f32 %v613_v27, %v613_v27 }
  0xb8   : > { %v621_v32 = vsel %vm592_vm0, %v615_v30, 0.0 }
  0xb9   : > { %625 = vadd.xlane.f32.xlu0 %v624_v29  ;;  %622 = vadd.xlane.f32.xlu1 %v621_v32  ;;  %v627_v33 = vsel %vm592_vm0, %v617_v31, 0.0 }
  0xbd   : > { %628 = vadd.xlane.f32.xlu1 %v627_v33 }
 0x13e   : > { %v620_v38 = vpop.xlane.xlu0 %619 }
 0x13f   : > { %v630_v39 = vmul.f32 0.03125, %v620_v38 }
 0x141   : > { %v634_v40 = vadd.f32 1e-05, %v630_v39 }
 0x142   : > { %v623_v41 = vpop.xlane.xlu1 %622  ;;  %v626_v42 = vpop.xlane.xlu0 %625 }
 0x143   : > { %7167 = vrsqrt.f32 %v634_v40  ;;  %v631_v43 = vmul.f32 0.03125, %v623_v41  ;;  %v632_v44 = vmul.f32 0.03125, %v626_v42 }
 0x145   : > { %v635_v45 = vadd.f32 1e-05, %v631_v43  ;;  %v636_v46 = vadd.f32 1e-05, %v632_v44 }
 0x146   : > { %v629_v47 = vpop.xlane.xlu1 %628 }
 0x147   : > { %7169 = vrsqrt.f32 %v635_v45  ;;  %v633_v48 = vmul.f32 0.03125, %v629_v47 }
 0x148   : > { %7171 = vrsqrt.f32 %v636_v46 }
 0x149   : > { %v637_v49 = vadd.f32 1e-05, %v633_v48 }
 0x14b   : > { %7173 = vrsqrt.f32 %v637_v49 }
 0x150   : > { %v7168_v50 = vpop.eup %7167 }
 0x151   : > { %v642_v52 = vmul.f32 %v7168_v50, %v610_v18 }
 0x153   : > { %v652_v54 = vmul.f32 %v6083_v51, %v642_v52 }
 0x154   : > { %v7170_v55 = vpop.eup %7169 }
 0x155   : > { %v7172_v56 = vpop.eup %7171  ;;  %v662_v57 = vadd.f32 %v6084_v53, %v652_v54  ;;  %v643_v58 = vmul.f32 %v7170_v55, %v611_v26 }
 0x156   : > { %v644_v59 = vmul.f32 %v7172_v56, %v612_v19 }
 0x157   : > { %6623 = vmatprep.mubr.msk.f32.mxu0 %vm592_vm0, %v662_v57  ;;  %v653_v60 = vmul.f32 %v6083_v51, %v643_v58 }
 0x158   : > { %v7174_v61 = vpop.eup %7173  ;;  %v654_v62 = vmul.f32 %v6083_v51, %v644_v59 }
 0x159   : > { %v663_v63 = vadd.f32 %v6084_v53, %v653_v60  ;;  %v645_v0 = vmul.f32 %v7174_v61, %v613_v27 }
 0x15a   : > { %v664_v1 = vadd.f32 %v6084_v53, %v654_v62 }
 0x15b   : > { %6624 = vmatmul.mubr.msk.f32.vlgmr.msra.gmra.mxu0 %vm592_vm0, %v663_v63  ;;  %v655_v2 = vmul.f32 %v6083_v51, %v645_v0 }
 0x15c   : > { %6626 = vmatprep.mubr.msk.f32.mxu0 %vm592_vm0, %v664_v1 }
 0x15d   : > { %v665_v3 = vadd.f32 %v6084_v53, %v655_v2 }
 0x15f   : > { %6627 = vmatmul.mubr.msk.f32.gmra.mxu0 %vm592_vm0, %v665_v3 }
 0x21b   : > { %v6625_v4 = vpop.f32.mrf.mxu0 }
 0x21c   : > { %v7623_v17 = vadd.f32 %v6625_v4, %v6085_v8 }
 0x21d   : > { %v755_v10 = vpop.f32.mrf.mxu0 }
 0x21e   : > { %v756_v11 = vadd.f32 %v6085_v8, %v755_v10  ;;  %v815_v35 = vmul.f32 0.35355338, %v7623_v17 }
 0x21f   : > { %v6628_v12 = vpop.f32.mrf.mxu0 }
 0x220   : > { %v7614_v13 = vadd.f32 %v6628_v12, %v6085_v8  ;;  %v814_v14 = vmul.f32 0.35355338, %v756_v11 }
 0x221   : > { %v765_v15 = vpop.f32.mrf.mxu0 }
 0x222   : > { %v7616_v16 = vadd.f32 %v6085_v8, %v765_v15  ;;  %6637 = vmatprep.mubr.msk.f32.mxu0 %vm838_vm1, %v814_v14  ;;  %784 = vrot.lane.b32.xlu0 %v7614_v13, %s7405_s17  ;;  %v817_v37 = vmul.f32 0.35355338, %v7614_v13 }
 0x224   : > { %782 = vrot.lane.b32.xlu1 %v7616_v16, %s7405_s17  ;;  %v816_v36 = vmul.f32 0.35355338, %v7616_v16 }
 0x226   : > { %796 = vrot.lane.b32.xlu0 %v7614_v13, %s7406_s24 }
 0x228   : > { %780 = vrot.lane.b32.xlu1 %v7623_v17, %s7405_s17 }
 0x22a   : > { %808 = vrot.lane.b32.xlu0 %v7614_v13, %s7407_s26 }
 0x22c   : > { %778 = vrot.lane.b32.xlu1 %v756_v11, %s7405_s17 }
 0x22e   : > { %806 = vrot.lane.b32.xlu0 %v7616_v16, %s7407_s26 }
 0x230   : > { %794 = vrot.lane.b32.xlu1 %v7616_v16, %s7406_s24 }
 0x232   : > { %804 = vrot.lane.b32.xlu0 %v7623_v17, %s7407_s26 }
 0x234   : > { %792 = vrot.lane.b32.xlu1 %v7623_v17, %s7406_s24 }
 0x236   : > { %836 = vrot.lane.b32.xlu0 %v7614_v13, %s7408_s27 }
 0x238   : > { %790 = vrot.lane.b32.xlu1 %v756_v11, %s7406_s24 }
 0x23a   : > { %832 = vrot.lane.b32.xlu0 %v7623_v17, %s7408_s27 }
 0x23c   : > { %802 = vrot.lane.b32.xlu1 %v756_v11, %s7407_s26 }
 0x240   : > { %834 = vrot.lane.b32.xlu1 %v7616_v16, %s7408_s27 }
 0x244   : > { %830 = vrot.lane.b32.xlu1 %v756_v11, %s7408_s27 }
 0x294   : > { %v7649_v18 = vpop.permute.xlu0 %784 }
 0x295   : > { %950 = vrot.lane.b32.xlu0 %v7649_v18, %s7408_s27  ;;  %v821_v50 = vmul.f32 0.35355338, %v7649_v18 }
 0x296   : > { %v7653_v19 = vpop.permute.xlu1 %782 }
 0x297   : > { %948 = vrot.lane.b32.xlu1 %v7653_v19, %s7408_s27  ;;  %v820_v47 = vmul.f32 0.35355338, %v7653_v19 }
 0x298   : > { %v7657_v20 = vpop.permute.xlu0 %796 }
 0x299   : > { %v825_v58 = vmul.f32 0.35355338, %v7657_v20 }
 0x29a   : > { %v7659_v21 = vpop.permute.xlu1 %780 }
 0x29b   : > { %946 = vrot.lane.b32.xlu0 %v7659_v21, %s7408_s27  ;;  %v819_v46 = vmul.f32 0.35355338, %v7659_v21 }
 0x29c   : > { %v7663_v22 = vpop.permute.xlu0 %808 }
 0x29d   : > { %v829_v63 = vmul.f32 0.35355338, %v7663_v22 }
 0x29e   : > { %v779_v23 = vpop.permute.xlu1 %778 }
 0x29f   : > { %1063 = vrot.lane.b32.xlu0 %v7657_v20, %s7408_s27  ;;  %944 = vrot.lane.b32.xlu1 %v779_v23, %s7408_s27  ;;  %v818_v38 = vmul.f32 0.35355338, %v779_v23 }
 0x2a0   : > { %v7668_v24 = vpop.permute.xlu0 %806 }
 0x2a1   : > { %v828_v61 = vmul.f32 0.35355338, %v7668_v24 }
 0x2a2   : > { %v7670_v25 = vpop.permute.xlu1 %794 }
 0x2a3   : > { %1176 = vrot.lane.b32.xlu0 %v7663_v22, %s7408_s27  ;;  %1061 = vrot.lane.b32.xlu1 %v7670_v25, %s7408_s27  ;;  %v824_v55 = vmul.f32 0.35355338, %v7670_v25 }
 0x2a4   : > { %v7676_v26 = vpop.permute.xlu0 %804 }
 0x2a5   : > { %v827_v60 = vmul.f32 0.35355338, %v7676_v26 }
 0x2a6   : > { %v7678_v27 = vpop.permute.xlu1 %792 }
 0x2a7   : > { %1174 = vrot.lane.b32.xlu0 %v7668_v24, %s7408_s27  ;;  %1059 = vrot.lane.b32.xlu1 %v7678_v27, %s7408_s27  ;;  %v823_v54 = vmul.f32 0.35355338, %v7678_v27 }
 0x2a8   : > { %v837_v28 = vpop.permute.xlu0 %836 }
 0x2a9   : > { %6629 = vmatprep.subr.msk.mxu0 %vm838_vm1, %v837_v28 }
 0x2aa   : > { %6630 = vmatpush3.xpose.msk.msra.mxu0 %vm838_vm1, %v837_v28  ;;  %v7686_v29 = vpop.permute.xlu1 %790 }
 0x2ab   : > { %1172 = vrot.lane.b32.xlu0 %v7676_v26, %s7408_s27  ;;  %1057 = vrot.lane.b32.xlu1 %v7686_v29, %s7408_s27  ;;  %v822_v30 = vmul.f32 0.35355338, %v7686_v29 }
 0x2ac   : > { %v833_v33 = vpop.permute.xlu0 %832 }
 0x2ad   : > { %6665 = vmatprep.mubr.msk.f32.mxu1 %vm838_vm1, %v822_v30 }
 0x2ae   : > { %v7694_v31 = vpop.permute.xlu1 %802 }
 0x2af   : > { %1465 = vrot.lane.b32.xlu0 %v7614_v13, %s7409_s0  ;;  %1170 = vrot.lane.b32.xlu1 %v7694_v31, %s7408_s27  ;;  %v826_v51 = vmul.f32 0.35355338, %v7694_v31 }
 0x2b2   : > { %v835_v32 = vpop.permute.xlu1 %834 }
 0x2b3   : > { %1459 = vrot.lane.b32.xlu0 %v756_v11, %s7409_s0  ;;  %1463 = vrot.lane.b32.xlu1 %v7616_v16, %s7409_s0 }
 0x2b4   : > { %6631 = vmatprep.subr.msk.mxu0 %vm838_vm1, %v835_v32 }
 0x2b5   : > { %6632 = vmatpush3.xpose.msk.msra.mxu0 %vm838_vm1, %v835_v32 }
 0x2b6   : > { %6633 = vmatprep.subr.msk.mxu0 %vm838_vm1, %v833_v33  ;;  %v831_v34 = vpop.permute.xlu1 %830 }
 0x2b7   : > { %1570 = vrot.lane.b32.xlu0 %v7659_v21, %s7409_s0  ;;  %1461 = vrot.lane.b32.xlu1 %v7623_v17, %s7409_s0 }
 0x2b9   : > { %6634 = vmatpush3.xpose.msk.msra.mxu0 %vm838_vm1, %v833_v33 }
 0x2ba   : > { %6635 = vmatprep.subr.msk.mxu0 %vm838_vm1, %v831_v34 }
 0x2bb   : > { %1568 = vrot.lane.b32.xlu0 %v779_v23, %s7409_s0  ;;  %1574 = vrot.lane.b32.xlu1 %v7649_v18, %s7409_s0 }
 0x2bd   : > { %6636 = vmatpush3.xpose.msk.msra.mxu0 %vm838_vm1, %v831_v34 }
 0x2bf   : > { %1679 = vrot.lane.b32.xlu0 %v7678_v27, %s7409_s0  ;;  %1683 = vrot.lane.b32.xlu1 %v7657_v20, %s7409_s0 }
 0x2c0   : > { %6638 = vmatmul.mubr.msk.f32.vlgmr.msra.gmra.mxu0 %vm838_vm1, %v815_v35 }
 0x2c1   : > { %6640 = vmatprep.mubr.msk.f32.mxu0 %vm838_vm1, %v816_v36 }
 0x2c3   : > { %1792 = vrot.lane.b32.xlu1 %v7663_v22, %s7409_s0 }
 0x2c4   : > { %6641 = vmatmul.mubr.msk.f32.gmra.mxu0 %vm838_vm1, %v817_v37 }
 0x2c5   : > { %6651 = vmatprep.mubr.msk.f32.mxu0 %vm838_vm1, %v818_v38 }
 0x2c7   : > { %1572 = vrot.lane.b32.xlu1 %v7653_v19, %s7409_s0 }
 0x2cb   : > { %1681 = vrot.lane.b32.xlu1 %v7670_v25, %s7409_s0 }
 0x307   : > { %v951_v39 = vpop.permute.xlu0 %950 }
 0x308   : > { %6643 = vmatprep.subr.msk.mxu0 %vm838_vm1, %v951_v39 }
 0x309   : > { %6644 = vmatpush3.xpose.msk.msra.mxu0 %vm838_vm1, %v951_v39  ;;  %v949_v40 = vpop.permute.xlu1 %948 }
 0x30a   : > { %6645 = vmatprep.subr.msk.mxu0 %vm838_vm1, %v949_v40 }
 0x30d   : > { %v947_v41 = vpop.permute.xlu0 %946  ;;  %6646 = vmatpush3.xpose.msk.msra.mxu0 %vm838_vm1, %v949_v40 }
 0x30e   : > { %6647 = vmatprep.subr.msk.mxu0 %vm838_vm1, %v947_v41 }
 0x311   : > { %v1064_v42 = vpop.permute.xlu0 %1063  ;;  %6648 = vmatpush3.xpose.msk.msra.mxu0 %vm838_vm1, %v947_v41  ;;  %v945_v43 = vpop.permute.xlu1 %944 }
 0x312   : > { %6649 = vmatprep.subr.msk.mxu0 %vm838_vm1, %v945_v43  ;;  %6657 = vmatprep.subr.msk.mxu1 %vm838_vm1, %v1064_v42 }
 0x313   : > { %6658 = vmatpush3.xpose.msk.msra.mxu1 %vm838_vm1, %v1064_v42 }
 0x315   : > { %v1177_v44 = vpop.permute.xlu0 %1176  ;;  %6650 = vmatpush3.xpose.msk.msra.mxu0 %vm838_vm1, %v945_v43  ;;  %v1062_v45 = vpop.permute.xlu1 %1061 }
 0x316   : > { %6659 = vmatprep.subr.msk.mxu1 %vm838_vm1, %v1062_v45  ;;  %6671 = vmatprep.subr.msk.mxu0 %vm838_vm1, %v1177_v44 }
 0x317   : > { %6660 = vmatpush3.xpose.msk.msra.mxu1 %vm838_vm1, %v1062_v45 }
 0x318   : > { %6652 = vmatmul.mubr.msk.f32.vlgmr.msra.gmra.mxu0 %vm838_vm1, %v819_v46 }
 0x319   : > { %v1175_v48 = vpop.permute.xlu0 %1174  ;;  %v1060_v49 = vpop.permute.xlu1 %1059  ;;  %6654 = vmatprep.mubr.msk.f32.mxu0 %vm838_vm1, %v820_v47  ;;  %6672 = vmatpush3.xpose.msk.msra.mxu0 %vm838_vm1, %v1177_v44 }
 0x31a   : > { %6661 = vmatprep.subr.msk.mxu1 %vm838_vm1, %v1060_v49  ;;  %6673 = vmatprep.subr.msk.mxu0 %vm838_vm1, %v1175_v48 }
 0x31b   : > { %6662 = vmatpush3.xpose.msk.msra.mxu1 %vm838_vm1, %v1060_v49 }
 0x31c   : > { %6655 = vmatmul.mubr.msk.f32.gmra.mxu0 %vm838_vm1, %v821_v50 }
 0x31d   : > { %v1173_v52 = vpop.permute.xlu0 %1172  ;;  %v1058_v53 = vpop.permute.xlu1 %1057  ;;  %6674 = vmatpush3.xpose.msk.msra.mxu0 %vm838_vm1, %v1175_v48  ;;  %6679 = vmatprep.mubr.msk.f32.mxu0 %vm838_vm1, %v826_v51 }
 0x31e   : > { %6663 = vmatprep.subr.msk.mxu1 %vm838_vm1, %v1058_v53  ;;  %6675 = vmatprep.subr.msk.mxu0 %vm838_vm1, %v1173_v52 }
 0x31f   : > { %6664 = vmatpush3.xpose.msk.msra.mxu1 %vm838_vm1, %v1058_v53 }
 0x321   : > { %v1466_v56 = vpop.permute.xlu0 %1465  ;;  %v1171_v57 = vpop.permute.xlu1 %1170  ;;  %6676 = vmatpush3.xpose.msk.msra.mxu0 %vm838_vm1, %v1173_v52 }
 0x322   : > { %6666 = vmatmul.mubr.msk.f32.vlgmr.msra.gmra.mxu1 %vm838_vm1, %v823_v54  ;;  %6677 = vmatprep.subr.msk.mxu0 %vm838_vm1, %v1171_v57 }
 0x323   : > { %6685 = vmatprep.subr.mxu1 %v1466_v56  ;;  %6668 = vmatprep.mubr.msk.f32.mxu1 %vm838_vm1, %v824_v55 }
 0x324   : > { %6686 = vmatpush3.msra.mxu1 %v1466_v56 }
 0x325   : > { %v1464_v59 = vpop.permute.xlu1 %1463  ;;  %6678 = vmatpush3.xpose.msk.msra.mxu0 %vm838_vm1, %v1171_v57  ;;  %v1460_v0 = vpop.permute.xlu0 %1459 }
 0x326   : > { %6669 = vmatmul.mubr.msk.f32.gmra.mxu1 %vm838_vm1, %v825_v58  ;;  %6687 = vmatprep.subr.mxu1 %v1464_v59 }
 0x327   : > { %6688 = vmatpush3.msra.mxu1 %v1464_v59 }
 0x328   : > { %6680 = vmatmul.mubr.msk.f32.vlgmr.msra.gmra.mxu0 %vm838_vm1, %v827_v60 }
 0x329   : > { %v1462_v62 = vpop.permute.xlu1 %1461  ;;  %6682 = vmatprep.mubr.msk.f32.mxu0 %vm838_vm1, %v828_v61  ;;  %v1571_v4 = vpop.permute.xlu0 %1570 }
 0x32a   : > { %6689 = vmatprep.subr.mxu1 %v1462_v62 }
 0x32b   : > { %6690 = vmatpush3.msra.mxu1 %v1462_v62 }
 0x32c   : > { %6683 = vmatmul.mubr.msk.f32.gmra.mxu0 %vm838_vm1, %v829_v63  ;;  %6691 = vmatprep.subr.mxu1 %v1460_v0 }
 0x32d   : > { %6692 = vmatpush3.msra.mxu1 %v1460_v0  ;;  %v1575_v1 = vpop.permute.xlu1 %1574  ;;  %v1569_v10 = vpop.permute.xlu0 %1568 }
 0x32e   : > { %6699 = vmatprep.subr.mxu0 %v1575_v1 }
 0x32f   : > { %6700 = vmatpush3.msra.mxu0 %v1575_v1 }
 0x331   : > { %v7777_v2 = vpop.permute.xlu1 %1683  ;;  %v7839_v48 = vpop.permute.xlu0 %1679 }
 0x332   : > { %6713 = vmatprep.subr.mxu1 %v7777_v2 }
 0x335   : > { %v7780_v3 = vpop.permute.xlu1 %1792 }
 0x339   : > { %v1573_v8 = vpop.permute.xlu1 %1572 }
 0x33a   : > { %6701 = vmatprep.subr.mxu0 %v1573_v8 }
 0x33b   : > { %6702 = vmatpush3.msra.mxu0 %v1573_v8 }
 0x33c   : > { %6703 = vmatprep.subr.mxu0 %v1571_v4 }
 0x33d   : > { %6704 = vmatpush3.msra.mxu0 %v1571_v4  ;;  %v7837_v47 = vpop.permute.xlu1 %1681 }
 0x33e   : > { %6705 = vmatprep.subr.mxu0 %v1569_v10 }
 0x33f   : > { %6706 = vmatpush3.msra.mxu0 %v1569_v10 }
 0x340   : > { %6727 = vmatprep.subr.mxu0 %v7780_v3 }
 0x380   : > { %v6639_v11 = vpop.f32.mrf.mxu0 }
 0x381   : > { %v1286_v12 = vsel %vm592_vm0, %v6639_v11, -inf }
 0x382   : > { %1287 = vmax.xlane.f32.xlu1 %v1286_v12  ;;  %v925_v13 = vpop.f32.mrf.mxu0 }
 0x383   : > { %v1283_v14 = vsel %vm592_vm0, %v925_v13, -inf }
 0x384   : > { %1284 = vmax.xlane.f32.xlu0 %v1283_v14  ;;  %v6642_v15 = vpop.f32.mrf.mxu0 }
 0x385   : > { %v1292_v16 = vsel %vm592_vm0, %v6642_v15, -inf }
 0x386   : > { %v935_v17 = vpop.f32.mrf.mxu0 }
 0x387   : > { %v1289_v18 = vsel %vm592_vm0, %v935_v17, -inf }
 0x388   : > { %1293 = vmax.xlane.f32.xlu0 %v1292_v16 }
 0x38c   : > { %1290 = vmax.xlane.f32.xlu0 %v1289_v18 }
 0x3d8   : > { %v7787_v19 = vpop.f32.mrf.mxu0 }
 0x3d9   : > { %v1298_v20 = vsel %vm592_vm0, %v7787_v19, -inf }
 0x3da   : > { %1299 = vmax.xlane.f32.xlu1 %v1298_v20  ;;  %v7791_v21 = vpop.f32.mrf.mxu0 }
 0x3db   : > { %v1295_v22 = vsel %vm592_vm0, %v7791_v21, -inf }
 0x3dc   : > { %1296 = vmax.xlane.f32.xlu0 %v1295_v22  ;;  %v7795_v23 = vpop.f32.mrf.mxu0 }
 0x3dd   : > { %v1304_v25 = vsel %vm592_vm0, %v7795_v23, -inf }
 0x3de   : > { %v7805_v32 = vpop.f32.mrf.mxu0 }
 0x3df   : > { %v1301_v38 = vsel %vm592_vm0, %v7805_v32, -inf }
 0x3e0   : > { %1305 = vmax.xlane.f32.xlu0 %v1304_v25 }
 0x3e2   : > { %v7799_v27 = vpop.f32.mrf.mxu1 }
 0x3e3   : > { %v1310_v28 = vsel %vm592_vm0, %v7799_v27, -inf }
 0x3e4   : > { %v7803_v30 = vpop.f32.mrf.mxu1  ;;  %1311 = vmax.xlane.f32.xlu1 %v1310_v28 }
 0x3e5   : > { %v1307_v34 = vsel %vm592_vm0, %v7803_v30, -inf }
 0x3e6   : > { %v7807_v33 = vpop.f32.mrf.mxu1 }
 0x3e7   : > { %v1316_v35 = vsel %vm592_vm0, %v7807_v33, -inf }
 0x3e8   : > { %1308 = vmax.xlane.f32.xlu1 %v1307_v34  ;;  %1317 = vmax.xlane.f32.xlu0 %v1316_v35  ;;  %v7813_v36 = vpop.f32.mrf.mxu0  ;;  %v7821_v40 = vpop.f32.mrf.mxu1 }
 0x3e9   : > { %v1322_v39 = vsel %vm592_vm0, %v7813_v36, -inf  ;;  %v1313_v42 = vsel %vm592_vm0, %v7821_v40, -inf }
 0x3ea   : > { %v7815_v37 = vpop.f32.mrf.mxu0 }
 0x3eb   : > { %v1319_v43 = vsel %vm592_vm0, %v7815_v37, -inf }
 0x3ec   : > { %1302 = vmax.xlane.f32.xlu0 %v1301_v38  ;;  %1323 = vmax.xlane.f32.xlu1 %v1322_v39  ;;  %v7823_v41 = vpop.f32.mrf.mxu0 }
 0x3ed   : > { %v1328_v45 = vsel %vm592_vm0, %v7823_v41, -inf }
 0x3ee   : > { %v7829_v44 = vpop.f32.mrf.mxu0 }
 0x3ef   : > { %v1325_v46 = vsel %vm592_vm0, %v7829_v44, -inf }
 0x3f0   : > { %1314 = vmax.xlane.f32.xlu0 %v1313_v42  ;;  %1320 = vmax.xlane.f32.xlu1 %v1319_v43 }
 0x3f4   : > { %1329 = vmax.xlane.f32.xlu1 %v1328_v45  ;;  %1326 = vmax.xlane.f32.xlu0 %v1325_v46 }
 0x405   : > { %1790 = vrot.lane.b32.xlu1 %v7668_v24, %s7409_s0 }
 0x40a   : > { %1677 = vrot.lane.b32.xlu0 %v7686_v29, %s7409_s0 }
 0x40b   : > { %v1288_v49 = vpop.xlane.xlu1 %1287 }
 0x40c   : > { %v1332_v51 = vsub.f32 %v6639_v11, %v1288_v49 }
 0x40d   : > { %v1285_v50 = vpop.xlane.xlu0 %1284 }
 0x40e   : > { %v1331_v52 = vsub.f32 %v925_v13, %v1285_v50  ;;  %v1349_v54 = vmul.f32 1.442695, %v1332_v51 }
 0x410   : > { %v1347_v55 = vmul.f32 1.442695, %v1331_v52  ;;  %7175 = vpow2.f32 %v1349_v54 }
 0x411   : > { %v1294_v53 = vpop.xlane.xlu0 %1293 }
 0x412   : > { %v1334_v56 = vsub.f32 %v6642_v15, %v1294_v53  ;;  %7177 = vpow2.f32 %v1347_v55 }
 0x414   : > { %v1353_v58 = vmul.f32 1.442695, %v1334_v56 }
 0x415   : > { %v1291_v57 = vpop.xlane.xlu0 %1290 }
 0x416   : > { %v1333_v24 = vsub.f32 %v935_v17, %v1291_v57  ;;  %7179 = vpow2.f32 %v1353_v58 }
 0x418   : > { %v1351_v59 = vmul.f32 1.442695, %v1333_v24 }
 0x41a   : > { %7181 = vpow2.f32 %v1351_v59 }
 0x41d   : > { %v7843_v60 = vpop.eup %7175 }
 0x41e   : > { %v1382_v29 = vsel %vm592_vm0, %v7843_v60, 0.0 }
 0x41f   : > { %v7845_v61 = vpop.eup %7177 }
 0x420   : > { %v1379_v62 = vsel %vm592_vm0, %v7845_v61, 0.0 }
 0x423   : > { %v7851_v63 = vpop.eup %7179 }
 0x424   : > { %v1388_v0 = vsel %vm592_vm0, %v7851_v63, 0.0 }
 0x427   : > { %v7855_v1 = vpop.eup %7181 }
 0x428   : > { %v1385_v4 = vsel %vm592_vm0, %v7855_v1, 0.0 }
 0x429   : > { %1383 = vadd.xlane.f32.xlu1 %v1382_v29  ;;  %1380 = vadd.xlane.f32.xlu0 %v1379_v62 }
 0x42d   : > { %1389 = vadd.xlane.f32.xlu0 %v1388_v0 }
 0x431   : > { %1386 = vadd.xlane.f32.xlu0 %v1385_v4 }
 0x463   : > { %v1300_v8 = vpop.xlane.xlu1 %1299 }
 0x464   : > { %v1336_v10 = vsub.f32 %v7787_v19, %v1300_v8 }
 0x465   : > { %v1297_v11 = vpop.xlane.xlu0 %1296 }
 0x466   : > { %v1357_v12 = vmul.f32 1.442695, %v1336_v10  ;;  %v1335_v15 = vsub.f32 %v7791_v21, %v1297_v11 }
 0x468   : > { %7183 = vpow2.f32 %v1357_v12  ;;  %v1355_v20 = vmul.f32 1.442695, %v1335_v15 }
 0x469   : > { %v1306_v13 = vpop.xlane.xlu0 %1305 }
 0x46a   : > { %v1338_v14 = vsub.f32 %v7795_v23, %v1306_v13 }
 0x46c   : > { %v1361_v16 = vmul.f32 1.442695, %v1338_v14 }
 0x46d   : > { %v1312_v17 = vpop.xlane.xlu1 %1311 }
 0x46e   : > { %7185 = vpow2.f32 %v1361_v16  ;;  %v1340_v18 = vsub.f32 %v7799_v27, %v1312_v17 }
 0x470   : > { %v1365_v22 = vmul.f32 1.442695, %v1340_v18 }
 0x471   : > { %v1309_v25 = vpop.xlane.xlu1 %1308  ;;  %v1318_v28 = vpop.xlane.xlu0 %1317 }
 0x472   : > { %7187 = vpow2.f32 %v1365_v22  ;;  %v1339_v19 = vsub.f32 %v7803_v30, %v1309_v25  ;;  %v1342_v34 = vsub.f32 %v7807_v33, %v1318_v28 }
 0x473   : > { %7189 = vpow2.f32 %v1355_v20 }
 0x474   : > { %v1363_v35 = vmul.f32 1.442695, %v1339_v19  ;;  %v1369_v38 = vmul.f32 1.442695, %v1342_v34 }
 0x475   : > { %v7865_v23 = vpop.eup %7183  ;;  %v1303_v21 = vpop.xlane.xlu0 %1302 }
 0x476   : > { %v1324_v39 = vpop.xlane.xlu1 %1323  ;;  %v1337_v42 = vsub.f32 %v7805_v32, %v1303_v21  ;;  %v1394_v43 = vsel %vm592_vm0, %v7865_v23, 0.0  ;;  %7191 = vpow2.f32 %v1369_v38 }
 0x477   : > { %v1344_v27 = vsub.f32 %v7813_v36, %v1324_v39  ;;  %1395 = vadd.xlane.f32.xlu1 %v1394_v43  ;;  %7193 = vpow2.f32 %v1363_v35 }
 0x478   : > { %v1359_v30 = vmul.f32 1.442695, %v1337_v42 }
 0x479   : > { %v1373_v45 = vmul.f32 1.442695, %v1344_v27  ;;  %v1315_v33 = vpop.xlane.xlu0 %1314 }
 0x47a   : > { %v1321_v46 = vpop.xlane.xlu1 %1320  ;;  %7195 = vpow2.f32 %v1359_v30  ;;  %v1341_v49 = vsub.f32 %v7821_v40, %v1315_v33 }
 0x47b   : > { %v1343_v50 = vsub.f32 %v7815_v37, %v1321_v46  ;;  %v7873_v51 = vpop.eup %7185  ;;  %7197 = vpow2.f32 %v1373_v45 }
 0x47c   : > { %v1367_v32 = vmul.f32 1.442695, %v1341_v49  ;;  %v1400_v52 = vsel %vm592_vm0, %v7873_v51, 0.0 }
 0x47d   : > { %v1371_v36 = vmul.f32 1.442695, %v1343_v50  ;;  %1401 = vadd.xlane.f32.xlu0 %v1400_v52  ;;  %v1327_v54 = vpop.xlane.xlu0 %1326 }
 0x47e   : > { %v1330_v53 = vpop.xlane.xlu1 %1329  ;;  %7199 = vpow2.f32 %v1367_v32  ;;  %v1345_v56 = vsub.f32 %v7829_v44, %v1327_v54 }
 0x47f   : > { %v1346_v55 = vsub.f32 %v7823_v41, %v1330_v53  ;;  %v7879_v57 = vpop.eup %7187  ;;  %7201 = vpow2.f32 %v1371_v36 }
 0x480   : > { %v1375_v40 = vmul.f32 1.442695, %v1345_v56  ;;  %v1406_v58 = vsel %vm592_vm0, %v7879_v57, 0.0  ;;  %v7883_v24 = vpop.eup %7189 }
 0x481   : > { %v1377_v37 = vmul.f32 1.442695, %v1346_v55  ;;  %1407 = vadd.xlane.f32.xlu1 %v1406_v58  ;;  %v1391_v41 = vsel %vm592_vm0, %v7883_v24, 0.0  ;;  %v1678_v22 = vpop.permute.xlu0 %1677 }
 0x482   : > { %7203 = vpow2.f32 %v1375_v40  ;;  %v7923_v20 = vpop.permute.xlu1 %1790 }
 0x483   : > { %v7885_v59 = vpop.eup %7191  ;;  %7205 = vpow2.f32 %v1377_v37 }
 0x484   : > { %v7889_v29 = vpop.eup %7193  ;;  %v1412_v44 = vsel %vm592_vm0, %v7885_v59, 0.0 }
 0x485   : > { %1392 = vadd.xlane.f32.xlu1 %v1391_v41  ;;  %1413 = vadd.xlane.f32.xlu0 %v1412_v44  ;;  %v1403_v0 = vsel %vm592_vm0, %v7889_v29, 0.0 }
 0x487   : > { %v7893_v62 = vpop.eup %7195 }
 0x488   : > { %v1397_v4 = vsel %vm592_vm0, %v7893_v62, 0.0  ;;  %v7899_v8 = vpop.eup %7197 }
 0x489   : > { %1404 = vadd.xlane.f32.xlu1 %v1403_v0  ;;  %1398 = vadd.xlane.f32.xlu0 %v1397_v4  ;;  %v1418_v11 = vsel %vm592_vm0, %v7899_v8, 0.0 }
 0x48b   : > { %v7901_v10 = vpop.eup %7199 }
 0x48c   : > { %v1409_v12 = vsel %vm592_vm0, %v7901_v10, 0.0  ;;  %v7907_v13 = vpop.eup %7201 }
 0x48d   : > { %1419 = vadd.xlane.f32.xlu1 %v1418_v11  ;;  %1410 = vadd.xlane.f32.xlu0 %v1409_v12  ;;  %v1415_v15 = vsel %vm592_vm0, %v7907_v13, 0.0  ;;  %v1895_v11 = vld [vmem:[%s8784_s9] sm:$0xff] }
 0x48f   : > { %v7909_v14 = vpop.eup %7203 }
 0x490   : > { %v7913_v16 = vpop.eup %7205  ;;  %v1421_v17 = vsel %vm592_vm0, %v7909_v14, 0.0 }
 0x491   : > { %1416 = vadd.xlane.f32.xlu1 %v1415_v15  ;;  %1422 = vadd.xlane.f32.xlu0 %v1421_v17  ;;  %v1424_v18 = vsel %vm592_vm0, %v7913_v16, 0.0 }
 0x495   : > { %1425 = vadd.xlane.f32.xlu1 %v1424_v18 }
 0x4a6   : > { %1786 = vrot.lane.b32.xlu1 %v7694_v31, %s7409_s0 }
 0x4a7   : > { %1788 = vrot.lane.b32.xlu0 %v7676_v26, %s7409_s0 }
 0x4b2   : > { %v1384_v25 = vpop.xlane.xlu1 %1383  ;;  %v1381_v28 = vpop.xlane.xlu0 %1380 }
 0x4b3   : > { %7207 = vrcp.f32 %v1384_v25 }
 0x4b4   : > { %7209 = vrcp.f32 %v1381_v28 }
 0x4b6   : > { %v1390_v19 = vpop.xlane.xlu0 %1389 }
 0x4b7   : > { %7211 = vrcp.f32 %v1390_v19 }
 0x4ba   : > { %v1387_v34 = vpop.xlane.xlu0 %1386 }
 0x4bb   : > { %7213 = vrcp.f32 %v1387_v34 }
 0x4c0   : > { %v7208_v35 = vpop.eup %7207 }
 0x4c1   : > { %v7210_v38 = vpop.eup %7209  ;;  %v1444_v21 = vmul.f32 %v7208_v35, %v7843_v60 }
 0x4c2   : > { %v1443_v31 = vmul.f32 %v7210_v38, %v7845_v61 }
 0x4c4   : > { %6693 = vmatprep.mubr.msk.f32.mxu1 %vm592_vm0, %v1443_v31  ;;  %v7212_v26 = vpop.eup %7211 }
 0x4c5   : > { %6694 = vmatmul.mubr.msk.f32.vlgmr.msra.gmra.mxu1 %vm592_vm0, %v1444_v21  ;;  %v1446_v60 = vmul.f32 %v7212_v26, %v7851_v63 }
 0x4c6   : > { %6714 = vmatpush3.msra.mxu1 %v7777_v2 }
 0x4c7   : > { %6715 = vmatprep.subr.mxu1 %v7837_v47 }
 0x4c8   : > { %v7214_v39 = vpop.eup %7213  ;;  %6716 = vmatpush3.msra.mxu1 %v7837_v47 }
 0x4c9   : > { %6717 = vmatprep.subr.mxu1 %v7839_v48  ;;  %v1445_v42 = vmul.f32 %v7214_v39, %v7855_v1 }
 0x4ca   : > { %6718 = vmatpush3.msra.mxu1 %v7839_v48 }
 0x4cb   : > { %6719 = vmatprep.subr.mxu1 %v1678_v22  ;;  %6696 = vmatprep.mubr.msk.f32.mxu1 %vm592_vm0, %v1445_v42 }
 0x4cc   : > { %6720 = vmatpush3.msra.mxu1 %v1678_v22 }
 0x4cd   : > { %7113 = vmatprep.subr.mxu1 %v7780_v3  ;;  %6697 = vmatmul.mubr.msk.f32.gmra.mxu1 %vm592_vm0, %v1446_v60 }
 0x500   : > { %v1396_v2 = vpop.xlane.xlu1 %1395 }
 0x501   : > { %7215 = vrcp.f32 %v1396_v2 }
 0x506   : > { %v1402_v27 = vpop.xlane.xlu0 %1401 }
 0x50a   : > { %v1408_v61 = vpop.xlane.xlu1 %1407 }
 0x50e   : > { %v1393_v47 = vpop.xlane.xlu1 %1392  ;;  %v1414_v43 = vpop.xlane.xlu0 %1413 }
 0x50f   : > { %7217 = vrcp.f32 %v1393_v47  ;;  %v7216_v33 = vpop.eup %7215 }
 0x510   : > { %7219 = vrcp.f32 %v1402_v27  ;;  %v1448_v36 = vmul.f32 %v7216_v33, %v7865_v23 }
 0x511   : > { %7221 = vrcp.f32 %v1408_v61 }
 0x512   : > { %v1405_v48 = vpop.xlane.xlu1 %1404  ;;  %v1399_v1 = vpop.xlane.xlu0 %1398 }
 0x513   : > { %7223 = vrcp.f32 %v1405_v48 }
 0x514   : > { %7225 = vrcp.f32 %v1399_v1 }
 0x515   : > { %7227 = vrcp.f32 %v1414_v43 }
 0x516   : > { %v1420_v30 = vpop.xlane.xlu1 %1419  ;;  %v1411_v63 = vpop.xlane.xlu0 %1410 }
 0x517   : > { %7229 = vrcp.f32 %v1411_v63 }
 0x518   : > { %7231 = vrcp.f32 %v1420_v30 }
 0x51a   : > { %v1417_v45 = vpop.xlane.xlu1 %1416  ;;  %v1423_v46 = vpop.xlane.xlu0 %1422 }
 0x51b   : > { %7233 = vrcp.f32 %v1417_v45 }
 0x51c   : > { %v7218_v49 = vpop.eup %7217  ;;  %7235 = vrcp.f32 %v1423_v46 }
 0x51d   : > { %v1447_v50 = vmul.f32 %v7218_v49, %v7883_v24  ;;  %v7220_v32 = vpop.eup %7219 }
 0x51e   : > { %v1426_v52 = vpop.xlane.xlu1 %1425  ;;  %v7222_v53 = vpop.eup %7221  ;;  %v1450_v58 = vmul.f32 %v7220_v32, %v7873_v51 }
 0x51f   : > { %7237 = vrcp.f32 %v1426_v52  ;;  %6707 = vmatprep.mubr.msk.f32.mxu0 %vm592_vm0, %v1447_v50  ;;  %v1452_v40 = vmul.f32 %v7222_v53, %v7879_v57  ;;  %v1789_v23 = vpop.permute.xlu0 %1788 }
 0x520   : > { %v7224_v54 = vpop.eup %7223  ;;  %6708 = vmatmul.mubr.msk.f32.vlgmr.msra.gmra.mxu0 %vm592_vm0, %v1448_v36 }
 0x521   : > { %v7226_v55 = vpop.eup %7225  ;;  %6728 = vmatpush3.msra.mxu0 %v7780_v3  ;;  %v1451_v56 = vmul.f32 %v7224_v54, %v7889_v29 }
 0x522   : > { %6729 = vmatprep.subr.mxu0 %v7923_v20  ;;  %v1449_v37 = vmul.f32 %v7226_v55, %v7893_v62  ;;  %v7228_v24 = vpop.eup %7227  ;;  %v1787_v29 = vpop.permute.xlu1 %1786 }
 0x523   : > { %6730 = vmatpush3.msra.mxu0 %v7923_v20  ;;  %6721 = vmatprep.mubr.msk.f32.mxu1 %vm592_vm0, %v1451_v56  ;;  %v1454_v62 = vmul.f32 %v7228_v24, %v7885_v59  ;;  %v6154_v24 = vld [vmem:[%s8785_s10] ss:$0 sm:$0xff] }
 0x524   : > { %6710 = vmatprep.mubr.msk.f32.mxu0 %vm592_vm0, %v1449_v37  ;;  %6731 = vmatprep.subr.mxu0 %v1789_v23  ;;  %v7230_v41 = vpop.eup %7229 }
 0x525   : > { %6711 = vmatmul.mubr.msk.f32.gmra.mxu0 %vm592_vm0, %v1450_v58  ;;  %6722 = vmatmul.mubr.msk.f32.vlgmr.msra.gmra.mxu1 %vm592_vm0, %v1452_v40  ;;  %v1453_v57 = vmul.f32 %v7230_v41, %v7901_v10  ;;  %v7232_v44 = vpop.eup %7231 }
 0x526   : > { %7117 = vmatpush3.msra.mxu1 %v7780_v3  ;;  %6732 = vmatpush3.msra.mxu0 %v1789_v23  ;;  %v1456_v10 = vmul.f32 %v7232_v44, %v7899_v8  ;;  %v1896_v8 = vld [vmem:[%s8784_s9 + $0x8] sm:$0xff] }
 0x527   : > { %7114 = vmatprep.subr.mxu1 %v7923_v20  ;;  %6733 = vmatprep.subr.mxu0 %v1787_v29 }
 0x528   : > { %v7234_v51 = vpop.eup %7233  ;;  %7118 = vmatpush3.msra.mxu1 %v7923_v20  ;;  %6734 = vmatpush3.msra.mxu0 %v1787_v29 }
 0x529   : > { %v7236_v0 = vpop.eup %7235  ;;  %6724 = vmatprep.mubr.msk.f32.mxu1 %vm592_vm0, %v1453_v57  ;;  %7115 = vmatprep.subr.mxu1 %v1789_v23  ;;  %v1455_v4 = vmul.f32 %v7234_v51, %v7907_v13  ;;  %v1897_v13 = vld [vmem:[%s8784_s9 + $0x10] sm:$0xff] }
 0x52a   : > { %6725 = vmatmul.mubr.msk.f32.gmra.mxu1 %vm592_vm0, %v1454_v62  ;;  %v1457_v3 = vmul.f32 %v7236_v0, %v7909_v14  ;;  %6749 = vmatprep.subr.mxu0 %v1896_v8  ;;  %v1898_v14 = vld [vmem:[%s8784_s9 + $0x18] sm:$0xff] }
 0x52b   : > { %7119 = vmatpush3.msra.mxu1 %v1789_v23  ;;  %6735 = vmatprep.mubr.msk.f32.mxu0 %vm592_vm0, %v1455_v4 }
 0x52c   : > { %v7238_v59 = vpop.eup %7237  ;;  %7116 = vmatprep.subr.mxu1 %v1787_v29  ;;  %6738 = vmatprep.mubr.msk.f32.mxu1 %vm592_vm0, %v1457_v3 }
 0x52d   : > { %v1458_v12 = vmul.f32 %v7238_v59, %v7913_v16  ;;  %7120 = vmatpush3.msra.mxu1 %v1787_v29  ;;  %6736 = vmatmul.mubr.msk.f32.vlgmr.msra.gmra.mxu0 %vm592_vm0, %v1456_v10 }
 0x52e   : > { %6741 = vmatprep.subr.mxu1 %v1895_v11  ;;  %6750 = vmatpush3.msra.mxu0 %v1896_v8 }
 0x52f   : > { %6739 = vmatmul.mubr.msk.f32.vlgmr.msra.gmra.mxu1 %vm592_vm0, %v1458_v12  ;;  %6765 = vmatprep.subr.mxu0 %v1898_v14 }
 0x530   : > { %6742 = vmatpush3.msra.mxu1 %v1895_v11 }
 0x531   : > { %6757 = vmatprep.subr.mxu1 %v1897_v13 }
 0x585   : > { %v6695_v15 = vpop.f32.mrf.mxu1 }
 0x587   : > { %v1549_v16 = vpop.f32.mrf.mxu1 }
 0x588   : > { %6743 = vmatprep.mubr.msk.f32.mxu1 %vm838_vm1, %v1549_v16 }
 0x589   : > { %6744 = vmatmul.mubr.msk.f32.vlgmr.msra.gmra.mxu1 %vm838_vm1, %v6695_v15 }
 0x58a   : > { %6758 = vmatpush3.msra.mxu1 %v1897_v13 }
 0x58d   : > { %v6698_v17 = vpop.f32.mrf.mxu1 }
 0x58f   : > { %v1559_v18 = vpop.f32.mrf.mxu1 }
 0x590   : > { %6746 = vmatprep.mubr.msk.f32.mxu1 %vm838_vm1, %v1559_v18 }
 0x591   : > { %6747 = vmatmul.mubr.msk.f32.gmra.mxu1 %vm838_vm1, %v6698_v17 }
 0x5e0   : > { %v6709_v20 = vpop.f32.mrf.mxu0 }
 0x5e2   : > { %v1658_v22 = vpop.f32.mrf.mxu0 }
 0x5e3   : > { %6751 = vmatprep.mubr.msk.f32.mxu0 %vm838_vm1, %v1658_v22 }
 0x5e4   : > { %6752 = vmatmul.mubr.msk.f32.vlgmr.msra.gmra.mxu0 %vm838_vm1, %v6709_v20 }
 0x5e5   : > { %v6712_v25 = vpop.f32.mrf.mxu0  ;;  %v6723_v28 = vpop.f32.mrf.mxu1  ;;  %6766 = vmatpush3.msra.mxu0 %v1898_v14 }
 0x5e7   : > { %v1668_v19 = vpop.f32.mrf.mxu0  ;;  %v1767_v34 = vpop.f32.mrf.mxu1 }
 0x5e8   : > { %6754 = vmatprep.mubr.msk.f32.mxu0 %vm838_vm1, %v1668_v19  ;;  %6759 = vmatprep.mubr.msk.f32.mxu1 %vm838_vm1, %v1767_v34 }
 0x5e9   : > { %6755 = vmatmul.mubr.msk.f32.gmra.mxu0 %vm838_vm1, %v6712_v25  ;;  %6760 = vmatmul.mubr.msk.f32.vlgmr.msra.gmra.mxu1 %vm838_vm1, %v6723_v28 }
 0x5ea   : > { %v6726_v35 = vpop.f32.mrf.mxu1 }
 0x5ec   : > { %v1777_v38 = vpop.f32.mrf.mxu1 }
 0x5ed   : > { %6762 = vmatprep.mubr.msk.f32.mxu1 %vm838_vm1, %v1777_v38  ;;  %v6737_v21 = vpop.f32.mrf.mxu0 }
 0x5ee   : > { %6763 = vmatmul.mubr.msk.f32.gmra.mxu1 %vm838_vm1, %v6726_v35 }
 0x5ef   : > { %v1876_v31 = vpop.f32.mrf.mxu0  ;;  %v6740_v26 = vpop.f32.mrf.mxu1 }
 0x5f0   : > { %6767 = vmatprep.mubr.msk.f32.mxu0 %vm838_vm1, %v1876_v31 }
 0x5f1   : > { %6768 = vmatmul.mubr.msk.f32.vlgmr.msra.gmra.mxu0 %vm838_vm1, %v6737_v21  ;;  %v1886_v39 = vpop.f32.mrf.mxu1 }
 0x5f2   : > { %6770 = vmatprep.mubr.msk.f32.mxu0 %vm838_vm1, %v1886_v39 }
 0x5f5   : > { %6771 = vmatmul.mubr.msk.f32.gmra.mxu0 %vm838_vm1, %v6740_v26 }
 0x649   : > { %v6745_v42 = vpop.f32.mrf.mxu1 }
 0x64a   : > { %v2294_v63 = vsel %vm592_vm0, %v6745_v42, 0.0 }
 0x64b   : > { %v1977_v60 = vpop.f32.mrf.mxu1 }
 0x64c   : > { %v2287_v32 = vsel %vm592_vm0, %v1977_v60, 0.0 }
 0x651   : > { %v6748_v2 = vpop.f32.mrf.mxu1 }
 0x652   : > { %v2308_v37 = vsel %vm592_vm0, %v6748_v2, 0.0 }
 0x653   : > { %v1987_v27 = vpop.f32.mrf.mxu1 }
 0x654   : > { %v2301_v51 = vsel %vm592_vm0, %v1987_v27, 0.0 }
 0x6a4   : > { %v6753_v61 = vpop.f32.mrf.mxu0 }
 0x6a5   : > { %v2295_v30 = vsel %vm592_vm0, %v6753_v61, 0.0 }
 0x6a6   : > { %v2074_v47 = vpop.f32.mrf.mxu0  ;;  %v2296_v49 = vadd.f32 %v2295_v30, %v2294_v63 }
 0x6a7   : > { %v2288_v45 = vsel %vm592_vm0, %v2074_v47, 0.0 }
 0x6a8   : > { %v2289_v53 = vadd.f32 %v2288_v45, %v2287_v32  ;;  %v2404_v32 = vld [vmem:[%s8788_s13] sm:$0xff] }
 0x6a9   : > { %v6761_v43 = vpop.f32.mrf.mxu1  ;;  %v6756_v48 = vpop.f32.mrf.mxu0 }
 0x6aa   : > { %v2297_v33 = vsel %vm592_vm0, %v6761_v43, 0.0  ;;  %v2309_v36 = vsel %vm592_vm0, %v6756_v48, 0.0 }
 0x6ab   : > { %v2171_v1 = vpop.f32.mrf.mxu1  ;;  %v2084_v50 = vpop.f32.mrf.mxu0  ;;  %v2298_v54 = vadd.f32 %v2297_v33, %v2296_v49  ;;  %v2310_v41 = vadd.f32 %v2309_v36, %v2308_v37  ;;  %v2406_v49 = vld [vmem:[%s8788_s13 + $0x10] sm:$0xff] }
 0x6ac   : > { %v2290_v52 = vsel %vm592_vm0, %v2171_v1, 0.0  ;;  %v2302_v40 = vsel %vm592_vm0, %v2084_v50, 0.0  ;;  %v2405_v50 = vld [vmem:[%s8788_s13 + $0x8] sm:$0xff] }
 0x6ad   : > { %v2291_v29 = vadd.f32 %v2290_v52, %v2289_v53  ;;  %v2303_v4 = vadd.f32 %v2302_v40, %v2301_v51 }
 0x6ae   : > { %v6764_v46 = vpop.f32.mrf.mxu1 }
 0x6af   : > { %v2311_v23 = vsel %vm592_vm0, %v6764_v46, 0.0  ;;  %v2407_v46 = vld [vmem:[%s8788_s13 + $0x18] sm:$0xff] }
 0x6b0   : > { %v2181_v55 = vpop.f32.mrf.mxu1  ;;  %v2312_v3 = vadd.f32 %v2311_v23, %v2310_v41  ;;  %6773 = vmatprep.subr.mxu1 %v2407_v46 }
 0x6b1   : > { %v6769_v56 = vpop.f32.mrf.mxu0  ;;  %v2304_v62 = vsel %vm592_vm0, %v2181_v55, 0.0  ;;  %6774 = vmatpush3.msra.mxu1 %v2407_v46 }
 0x6b2   : > { %v2299_v58 = vsel %vm592_vm0, %v6769_v56, 0.0  ;;  %v2305_v8 = vadd.f32 %v2304_v62, %v2303_v4  ;;  %6775 = vmatprep.subr.mxu1 %v2406_v49  ;;  %v6156_v4 = vld [vmem:[%s8787_s12] ss:$0 sm:$0xff] }
 0x6b3   : > { %v2300_v57 = vadd.f32 %v2299_v58, %v2298_v54  ;;  %v2268_v44 = vpop.f32.mrf.mxu0  ;;  %6776 = vmatpush3.msra.mxu1 %v2406_v49 }
 0x6b4   : > { %v2292_v0 = vsel %vm592_vm0, %v2268_v44, 0.0  ;;  %6777 = vmatprep.subr.mxu1 %v2405_v50  ;;  %v6155_v44 = vld [vmem:[%s8786_s11] ss:$0 sm:$0xff] }
 0x6b5   : > { %v2323_v10 = vadd.f32 %v6154_v24, %v2300_v57  ;;  %v2293_v11 = vadd.f32 %v2292_v0, %v2291_v29  ;;  %v6772_v59 = vpop.f32.mrf.mxu0  ;;  %6778 = vmatpush3.msra.mxu1 %v2405_v50 }
 0x6b6   : > { %v2313_v12 = vsel %vm592_vm0, %v6772_v59, 0.0  ;;  %6779 = vmatprep.subr.mxu1 %v2404_v32 }
 0x6b7   : > { %v2322_v13 = vadd.f32 %v6154_v24, %v2293_v11  ;;  %v2314_v14 = vadd.f32 %v2313_v12, %v2312_v3  ;;  %v2278_v15 = vpop.f32.mrf.mxu0  ;;  %v8016_v16 = vadd.f32 %v2323_v10, %v7569_v7  ;;  %6780 = vmatpush3.msra.mxu1 %v2404_v32 }
 0x6b8   : > { %v2306_v17 = vsel %vm592_vm0, %v2278_v15, 0.0 }
 0x6b9   : > { %v2307_v18 = vadd.f32 %v2306_v17, %v2305_v8  ;;  %v2335_v20 = vsel %vm592_vm0, %v8016_v16, 0.0  ;;  %v8022_v22 = vadd.f32 %v2322_v13, %v7565_v5  ;;  %v2325_v25 = vadd.f32 %v6154_v24, %v2314_v14 }
 0x6ba   : > { %2336 = vadd.xlane.f32.xlu1 %v2335_v20  ;;  %v2563_v20 = vld [vmem:[%s8790_s15 + $0x78] sm:$0xff] }
 0x6bb   : > { %v2324_v28 = vadd.f32 %v6154_v24, %v2307_v18  ;;  %v2332_v19 = vsel %vm592_vm0, %v8022_v22, 0.0  ;;  %v8032_v35 = vadd.f32 %v2325_v25, %v7571_v9  ;;  %6787 = vmatprep.subr.mxu0 %v2563_v20  ;;  %v2562_v25 = vld [vmem:[%s8790_s15 + $0x70] sm:$0xff] }
 0x6bc   : > { %2333 = vadd.xlane.f32.xlu0 %v2332_v19  ;;  %6788 = vmatpush3.msra.mxu0 %v2563_v20  ;;  %v2560_v19 = vld [vmem:[%s8790_s15 + $0x60] sm:$0xff] }
 0x6bd   : > { %v8027_v34 = vadd.f32 %v2324_v28, %v7567_v6  ;;  %v2341_v5 = vsel %vm592_vm0, %v8032_v35, 0.0  ;;  %6789 = vmatprep.subr.mxu0 %v2562_v25  ;;  %v2561_v28 = vld [vmem:[%s8790_s15 + $0x68] sm:$0xff] }
 0x6be   : > { %6790 = vmatpush3.msra.mxu0 %v2562_v25  ;;  %v2667_v25 = vld [vmem:[%s8779_s4 + $0x18] sm:$0xff] }
 0x6bf   : > { %v2338_v7 = vsel %vm592_vm0, %v8027_v34, 0.0  ;;  %6791 = vmatprep.subr.mxu0 %v2561_v28  ;;  %6825 = vmatprep.subr.mxu1 %v2667_v25 }
 0x6c0   : > { %2339 = vadd.xlane.f32.xlu0 %v2338_v7  ;;  %6792 = vmatpush3.msra.mxu0 %v2561_v28  ;;  %v2559_v7 = vld [vmem:[%s8790_s15 + $0x58] sm:$0xff]  ;;  %v2666_v28 = vld [vmem:[%s8779_s4 + $0x10] sm:$0xff] }
 0x6c1   : > { %6793 = vmatprep.subr.mxu0 %v2560_v19 }
 0x6c2   : > { %6794 = vmatpush3.msra.mxu0 %v2560_v19  ;;  %v2665_v19 = vld [vmem:[%s8779_s4 + $0x8] sm:$0xff] }
 0x6c3   : > { %6795 = vmatprep.subr.mxu0 %v2559_v7 }
 0x6c4   : > { %2342 = vadd.xlane.f32.xlu0 %v2341_v5  ;;  %6796 = vmatpush3.msra.mxu0 %v2559_v7  ;;  %v2558_v5 = vld [vmem:[%s8790_s15 + $0x50] sm:$0xff]  ;;  %v2664_v7 = vld [vmem:[%s8779_s4] sm:$0xff] }
 0x6c5   : > { %6797 = vmatprep.subr.mxu0 %v2558_v5 }
 0x6c6   : > { %6798 = vmatpush3.msra.mxu0 %v2558_v5  ;;  %v2663_v5 = vld [vmem:[%s8778_s3 + $0x18] sm:$0xff] }
 0x743   : > { %v2337_v38 = vpop.xlane.xlu1 %2336 }
 0x744   : > { %v2345_v21 = vmul.f32 0.03125, %v2337_v38  ;;  %v2557_v38 = vld [vmem:[%s8790_s15 + $0x48] sm:$0xff] }
 0x745   : > { %v2334_v31 = vpop.xlane.xlu0 %2333  ;;  %6799 = vmatprep.subr.mxu0 %v2557_v38 }
 0x746   : > { %v2349_v26 = vsub.f32 %v8016_v16, %v2345_v21  ;;  %v2344_v39 = vmul.f32 0.03125, %v2334_v31  ;;  %6800 = vmatpush3.msra.mxu0 %v2557_v38  ;;  %v2556_v21 = vld [vmem:[%s8790_s15 + $0x40] sm:$0xff]  ;;  %v2555_v31 = vld [vmem:[%s8790_s15 + $0x38] sm:$0xff] }
 0x747   : > { %6801 = vmatprep.subr.mxu0 %v2556_v21 }
 0x748   : > { %v2348_v6 = vsub.f32 %v8022_v22, %v2344_v39  ;;  %v2353_v42 = vmul.f32 %v2349_v26, %v2349_v26  ;;  %6802 = vmatpush3.msra.mxu0 %v2556_v21  ;;  %v2553_v39 = vld [vmem:[%s8790_s15 + $0x28] sm:$0xff] }
 0x749   : > { %v2340_v60 = vpop.xlane.xlu0 %2339  ;;  %6803 = vmatprep.subr.mxu0 %v2555_v31 }
 0x74a   : > { %v2346_v2 = vmul.f32 0.03125, %v2340_v60  ;;  %v2359_v61 = vsel %vm592_vm0, %v2353_v42, 0.0  ;;  %v2352_v9 = vmul.f32 %v2348_v6, %v2348_v6  ;;  %6804 = vmatpush3.msra.mxu0 %v2555_v31  ;;  %v2551_v42 = vld [vmem:[%s8790_s15 + $0x18] sm:$0xff]  ;;  %v2550_v60 = vld [vmem:[%s8790_s15 + $0x10] sm:$0xff] }
 0x74b   : > { %2360 = vadd.xlane.f32.xlu1 %v2359_v61  ;;  %v2548_v61 = vld [vmem:[%s8790_s15] sm:$0xff] }
 0x74c   : > { %v2350_v27 = vsub.f32 %v8027_v34, %v2346_v2  ;;  %v2356_v47 = vsel %vm592_vm0, %v2352_v9, 0.0  ;;  %v2549_v2 = vld [vmem:[%s8790_s15 + $0x8] sm:$0xff]  ;;  %v6157_v9 = vld [vmem:[%s8789_s14] ss:$0 sm:$0xff] }
 0x74d   : > { %2357 = vadd.xlane.f32.xlu0 %v2356_v47  ;;  %v2343_v43 = vpop.xlane.xlu0 %2342 }
 0x74e   : > { %v2347_v48 = vmul.f32 0.03125, %v2343_v43  ;;  %v2354_v1 = vmul.f32 %v2350_v27, %v2350_v27 }
 0x750   : > { %v2351_v30 = vsub.f32 %v8032_v35, %v2347_v48  ;;  %v2362_v63 = vsel %vm592_vm0, %v2354_v1, 0.0 }
 0x751   : > { %2363 = vadd.xlane.f32.xlu0 %v2362_v63 }
 0x752   : > { %v2355_v45 = vmul.f32 %v2351_v30, %v2351_v30 }
 0x754   : > { %v2365_v33 = vsel %vm592_vm0, %v2355_v45, 0.0 }
 0x755   : > { %2366 = vadd.xlane.f32.xlu1 %v2365_v33 }
 0x7d4   : > { %v2361_v36 = vpop.xlane.xlu1 %2360 }
 0x7d5   : > { %v2369_v52 = vmul.f32 0.03125, %v2361_v36 }
 0x7d6   : > { %v2358_v53 = vpop.xlane.xlu0 %2357 }
 0x7d7   : > { %v2373_v54 = vadd.f32 1e-05, %v2369_v52  ;;  %v2368_v55 = vmul.f32 0.03125, %v2358_v53 }
 0x7d9   : > { %7239 = vrsqrt.f32 %v2373_v54  ;;  %v2372_v56 = vadd.f32 1e-05, %v2368_v55 }
 0x7da   : > { %v2364_v37 = vpop.xlane.xlu0 %2363 }
 0x7db   : > { %7241 = vrsqrt.f32 %v2372_v56  ;;  %v2370_v40 = vmul.f32 0.03125, %v2364_v37 }
 0x7dd   : > { %v2374_v23 = vadd.f32 1e-05, %v2370_v40 }
 0x7de   : > { %v2367_v58 = vpop.xlane.xlu1 %2366 }
 0x7df   : > { %7243 = vrsqrt.f32 %v2374_v23  ;;  %v2371_v24 = vmul.f32 0.03125, %v2367_v58 }
 0x7e1   : > { %v2375_v41 = vadd.f32 1e-05, %v2371_v24 }
 0x7e3   : > { %7245 = vrsqrt.f32 %v2375_v41 }
 0x7e6   : > { %v7240_v29 = vpop.eup %7239 }
 0x7e7   : > { %v2381_v57 = vmul.f32 %v7240_v29, %v2349_v26  ;;  %v2554_v26 = vld [vmem:[%s8790_s15 + $0x30] sm:$0xff] }
 0x7e8   : > { %v7242_v51 = vpop.eup %7241  ;;  %6805 = vmatprep.subr.mxu0 %v2554_v26 }
 0x7e9   : > { %v2380_v62 = vmul.f32 %v7242_v51, %v2348_v6  ;;  %v2391_v0 = vmul.f32 %v6155_v44, %v2381_v57  ;;  %6806 = vmatpush3.msra.mxu0 %v2554_v26  ;;  %v2552_v6 = vld [vmem:[%s8790_s15 + $0x20] sm:$0xff] }
 0x7ea   : > { %6807 = vmatprep.subr.mxu0 %v2553_v39  ;;  %v6162_v26 = vld [vmem:[%s8791_s16] ss:$0 sm:$0xff] }
 0x7eb   : > { %v2390_v3 = vmul.f32 %v6155_v44, %v2380_v62  ;;  %v2401_v12 = vadd.f32 %v6156_v4, %v2391_v0  ;;  %6808 = vmatpush3.msra.mxu0 %v2553_v39 }
 0x7ec   : > { %v7244_v10 = vpop.eup %7243  ;;  %6809 = vmatprep.subr.mxu0 %v2552_v6 }
 0x7ed   : > { %v2400_v11 = vadd.f32 %v6156_v4, %v2390_v3  ;;  %v2382_v59 = vmul.f32 %v7244_v10, %v2350_v27  ;;  %6810 = vmatpush3.msra.mxu0 %v2552_v6 }
 0x7ee   : > { %6811 = vmatprep.subr.mxu0 %v2551_v42 }
 0x7ef   : > { %6781 = vmatprep.mubr.msk.f32.mxu1 %vm592_vm0, %v2400_v11  ;;  %v2392_v8 = vmul.f32 %v6155_v44, %v2382_v59  ;;  %6812 = vmatpush3.msra.mxu0 %v2551_v42 }
 0x7f0   : > { %v7246_v13 = vpop.eup %7245  ;;  %6782 = vmatmul.mubr.msk.f32.vlgmr.msra.gmra.mxu1 %vm592_vm0, %v2401_v12  ;;  %6813 = vmatprep.subr.mxu0 %v2550_v60 }
 0x7f1   : > { %v2402_v14 = vadd.f32 %v6156_v4, %v2392_v8  ;;  %v2383_v15 = vmul.f32 %v7246_v13, %v2351_v30  ;;  %6814 = vmatpush3.msra.mxu0 %v2550_v60  ;;  %6826 = vmatpush3.msra.mxu1 %v2667_v25 }
 0x7f2   : > { %6815 = vmatprep.subr.mxu0 %v2549_v2  ;;  %6827 = vmatprep.subr.mxu1 %v2666_v28 }
 0x7f3   : > { %6784 = vmatprep.mubr.msk.f32.mxu1 %vm592_vm0, %v2402_v14  ;;  %v2393_v17 = vmul.f32 %v6155_v44, %v2383_v15  ;;  %6816 = vmatpush3.msra.mxu0 %v2549_v2 }
 0x7f4   : > { %6817 = vmatprep.subr.mxu0 %v2548_v61  ;;  %6828 = vmatpush3.msra.mxu1 %v2666_v28 }
 0x7f5   : > { %v2403_v18 = vadd.f32 %v6156_v4, %v2393_v17  ;;  %6818 = vmatpush3.msra.mxu0 %v2548_v61  ;;  %6829 = vmatprep.subr.mxu1 %v2665_v19 }
 0x7f6   : > { %6830 = vmatpush3.msra.mxu1 %v2665_v19 }
 0x7f7   : > { %6785 = vmatmul.mubr.msk.f32.gmra.mxu1 %vm592_vm0, %v2403_v18  ;;  %6831 = vmatprep.subr.mxu1 %v2664_v7 }
 0x7f8   : > { %6832 = vmatpush3.msra.mxu1 %v2664_v7 }
 0x7f9   : > { %6836 = vmatprep.subr.mxu1 %v2663_v5 }
 0x8b0   : > { %v6783_v27 = vpop.f32.mrf.mxu1 }
 0x8b1   : > { %v2499_v47 = vadd.f32 %v6783_v27, %v6157_v9  ;;  %v2662_v27 = vld [vmem:[%s8778_s3 + $0x10] sm:$0xff] }
 0x8b2   : > { %v2493_v43 = vpop.f32.mrf.mxu1 }
 0x8b3   : > { %v2513_v48 = vmul.f32 %v2499_v47, %v2499_v47  ;;  %v2494_v1 = vadd.f32 %v6157_v9, %v2493_v43 }
 0x8b5   : > { %v2517_v30 = vmul.f32 %v2513_v48, %v2499_v47  ;;  %v2512_v63 = vmul.f32 %v2494_v1, %v2494_v1 }
 0x8b7   : > { %v2521_v45 = vmul.f32 0.044715, %v2517_v30  ;;  %v2516_v33 = vmul.f32 %v2512_v63, %v2494_v1  ;;  %v6786_v46 = vpop.f32.mrf.mxu1 }
 0x8b8   : > { %v2509_v49 = vadd.f32 %v6786_v46, %v6157_v9 }
 0x8b9   : > { %v2525_v50 = vadd.f32 %v2521_v45, %v2499_v47  ;;  %v2520_v32 = vmul.f32 0.044715, %v2516_v33  ;;  %v2503_v36 = vpop.f32.mrf.mxu1 }
 0x8ba   : > { %v2515_v52 = vmul.f32 %v2509_v49, %v2509_v49  ;;  %v2504_v53 = vadd.f32 %v6157_v9, %v2503_v36 }
 0x8bb   : > { %v2529_v54 = vmul.f32 0.7978846, %v2525_v50  ;;  %v2524_v55 = vadd.f32 %v2520_v32, %v2494_v1 }
 0x8bc   : > { %v2519_v56 = vmul.f32 %v2515_v52, %v2509_v49  ;;  %v2514_v37 = vmul.f32 %v2504_v53, %v2504_v53 }
 0x8bd   : > { %7247 = vtanh.f32 %v2529_v54  ;;  %v2528_v40 = vmul.f32 0.7978846, %v2524_v55 }
 0x8be   : > { %v2523_v23 = vmul.f32 0.044715, %v2519_v56  ;;  %v2518_v58 = vmul.f32 %v2514_v37, %v2504_v53  ;;  %v6174_v37 = vld [vmem:[%s8782_s7 + $0x38] sm:$0xff] }
 0x8bf   : > { %7249 = vtanh.f32 %v2528_v40  ;;  %v6173_v40 = vld [vmem:[%s8782_s7 + $0x30] sm:$0xff] }
 0x8c0   : > { %v2527_v24 = vadd.f32 %v2523_v23, %v2509_v49  ;;  %v2522_v41 = vmul.f32 0.044715, %v2518_v58  ;;  %v6172_v23 = vld [vmem:[%s8782_s7 + $0x28] sm:$0xff]  ;;  %v6171_v58 = vld [vmem:[%s8782_s7 + $0x20] sm:$0xff] }
 0x8c2   : > { %v2531_v29 = vmul.f32 0.7978846, %v2527_v24  ;;  %v2526_v57 = vadd.f32 %v2522_v41, %v2504_v53 }
 0x8c4   : > { %7251 = vtanh.f32 %v2531_v29  ;;  %v2530_v44 = vmul.f32 0.7978846, %v2526_v57 }
 0x8c6   : > { %7253 = vtanh.f32 %v2530_v44 }
 0x8ca   : > { %v7248_v51 = vpop.eup %7247 }
 0x8cb   : > { %v2537_v62 = vadd.f32 1.0, %v7248_v51 }
 0x8cc   : > { %v7250_v0 = vpop.eup %7249 }
 0x8cd   : > { %v2536_v4 = vadd.f32 1.0, %v7250_v0  ;;  %v2541_v3 = vmul.f32 0.5, %v2537_v62  ;;  %v6169_v0 = vld [vmem:[%s8780_s5 + $0x1] ss:$0 sm:$0xff] }
 0x8cf   : > { %v2540_v10 = vmul.f32 0.5, %v2536_v4  ;;  %v2545_v12 = vmul.f32 %v2541_v3, %v2499_v47  ;;  %v2661_v47 = vld [vmem:[%s8778_s3 + $0x8] sm:$0xff] }
 0x8d1   : > { %v7252_v11 = vpop.eup %7251  ;;  %v2544_v59 = vmul.f32 %v2540_v10, %v2494_v1 }
 0x8d2   : > { %v2539_v8 = vadd.f32 1.0, %v7252_v11 }
 0x8d3   : > { %v7254_v13 = vpop.eup %7253  ;;  %6819 = vmatprep.mubr.f32.mxu0 %v2544_v59  ;;  %v6170_v59 = vld [vmem:[%s8781_s6 + $0x1] ss:$0 sm:$0xff] }
 0x8d4   : > { %6820 = vmatmul.mubr.f32.vlgmr.msra.gmra.mxu0 %v2545_v12  ;;  %v2538_v14 = vadd.f32 1.0, %v7254_v13  ;;  %v2543_v15 = vmul.f32 0.5, %v2539_v8 }
 0x8d6   : > { %v2542_v17 = vmul.f32 0.5, %v2538_v14  ;;  %v2547_v20 = vmul.f32 %v2543_v15, %v2509_v49  ;;  %v6176_v14 = vld [vmem:[%s8783_s8 + $0x1] ss:$0 sm:$0xff] }
 0x8d8   : > { %v2546_v18 = vmul.f32 %v2542_v17, %v2504_v53 }
 0x8da   : > { %6822 = vmatprep.mubr.f32.mxu0 %v2546_v18 }
 0x8db   : > { %6823 = vmatmul.mubr.f32.gmra.mxu0 %v2547_v20 }
 0x994   : > { %v6821_v38 = vpop.f32.mrf.mxu0 }
 0x996   : > { %v2637_v21 = vpop.f32.mrf.mxu0 }
 0x997   : > { %v2638_v42 = vadd.f32 %v6162_v26, %v2637_v21 }
 0x999   : > { %v2656_v9 = vadd.f32 %v2638_v42, %v8022_v22  ;;  %v2660_v22 = vld [vmem:[%s8778_s3] sm:$0xff] }
 0x99b   : > { %v6824_v31 = vpop.f32.mrf.mxu0 }
 0x99c   : > { %v2653_v39 = vadd.f32 %v6824_v31, %v6162_v26 }
 0x99d   : > { %v2647_v6 = vpop.f32.mrf.mxu0 }
 0x99e   : > { %v2648_v60 = vadd.f32 %v6162_v26, %v2647_v6  ;;  %v2659_v61 = vadd.f32 %v2653_v39, %v8032_v35 }
 0x9a0   : > { %v2658_v2 = vadd.f32 %v2648_v60, %v8027_v34  ;;  %v2643_v34 = vadd.f32 %v6821_v38, %v6162_v26 }
 0x9a2   : > { %6833 = vmatprep.mubr.msk.f32.mxu1 %vm592_vm0, %v2658_v2  ;;  %v2657_v35 = vadd.f32 %v2643_v34, %v8016_v16 }
 0x9a3   : > { %6834 = vmatmul.mubr.msk.f32.vlgmr.msra.gmra.mxu1 %vm592_vm0, %v2659_v61 }
 0x9a4   : > { %6837 = vmatpush3.msra.mxu1 %v2663_v5  ;;  %6844 = vmatprep.mubr.msk.f32.mxu1 %vm592_vm0, %v2656_v9 }
 0x9a5   : > { %6838 = vmatprep.subr.mxu1 %v2662_v27 }
 0x9a6   : > { %6839 = vmatpush3.msra.mxu1 %v2662_v27 }
 0x9a7   : > { %6840 = vmatprep.subr.mxu1 %v2661_v47 }
 0x9a8   : > { %6841 = vmatpush3.msra.mxu1 %v2661_v47 }
 0x9a9   : > { %6842 = vmatprep.subr.mxu1 %v2660_v22 }
 0x9aa   : > { %6843 = vmatpush3.msra.mxu1 %v2660_v22 }
 0x9ab   : > { %6845 = vmatmul.mubr.msk.f32.vlgmr.msra.gmra.mxu1 %vm592_vm0, %v2657_v35  ;;  %6847 = vmatprep.subr.mxu1 %v6174_v37 }
 0x9ac   : > { %6848 = vmatpush3.msra.mxu1 %v6174_v37 }
 0x9ad   : > { %6849 = vmatprep.subr.mxu1 %v6173_v40 }
 0x9ae   : > { %6850 = vmatpush3.msra.mxu1 %v6173_v40 }
 0x9af   : > { %6851 = vmatprep.subr.mxu1 %v6172_v23 }
 0x9b0   : > { %6852 = vmatpush3.msra.mxu1 %v6172_v23 }
 0x9b1   : > { %6853 = vmatprep.subr.mxu1 %v6171_v58 }
 0x9b2   : > { %6854 = vmatpush3.msra.mxu1 %v6171_v58 }
 0xa63   : > { %v6835_v43 = vpop.f32.mrf.mxu1 }
 0xa65   : > { %v2740_v48 = vpop.f32.mrf.mxu1 }
 0xa6b   : > { %v6846_v1 = vpop.f32.mrf.mxu1 }
 0xa6c   : > { %v8152_v30 = vadd.f32 %v6846_v1, %v6835_v43 }
 0xa6d   : > { %v2821_v63 = vpop.f32.mrf.mxu1 }
 0xa6e   : > { %v8154_v45 = vadd.f32 %v2821_v63, %v2740_v48  ;;  %v2837_v33 = vsel %vm592_vm0, %v8152_v30, 0.0 }
 0xa6f   : > { %2838 = vadd.xlane.f32.xlu1 %v2837_v33 }
 0xa70   : > { %v2834_v46 = vsel %vm592_vm0, %v8154_v45, 0.0 }
 0xa71   : > { %2835 = vadd.xlane.f32.xlu0 %v2834_v46 }
 0xaf8   : > { %v2839_v16 = vpop.xlane.xlu1 %2838 }
 0xaf9   : > { %v2841_v49 = vmul.f32 0.03125, %v2839_v16 }
 0xafa   : > { %v2836_v50 = vpop.xlane.xlu0 %2835 }
 0xafb   : > { %v2843_v32 = vsub.f32 %v8152_v30, %v2841_v49  ;;  %v2840_v36 = vmul.f32 0.03125, %v2836_v50 }
 0xafd   : > { %v2842_v52 = vsub.f32 %v8154_v45, %v2840_v36  ;;  %v2845_v53 = vmul.f32 %v2843_v32, %v2843_v32 }
 0xaff   : > { %v2849_v54 = vsel %vm592_vm0, %v2845_v53, 0.0  ;;  %v2844_v55 = vmul.f32 %v2842_v52, %v2842_v52 }
 0xb00   : > { %2850 = vadd.xlane.f32.xlu1 %v2849_v54 }
 0xb01   : > { %v2846_v56 = vsel %vm592_vm0, %v2844_v55, 0.0 }
 0xb02   : > { %2847 = vadd.xlane.f32.xlu0 %v2846_v56 }
 0xb89   : > { %v2851_v24 = vpop.xlane.xlu1 %2850 }
 0xb8a   : > { %v2853_v41 = vmul.f32 0.03125, %v2851_v24 }
 0xb8b   : > { %v2848_v29 = vpop.xlane.xlu0 %2847 }
 0xb8c   : > { %v2855_v57 = vadd.f32 1e-05, %v2853_v41  ;;  %v2852_v44 = vmul.f32 0.03125, %v2848_v29 }
 0xb8e   : > { %7255 = vrsqrt.f32 %v2855_v57  ;;  %v2854_v51 = vadd.f32 1e-05, %v2852_v44 }
 0xb90   : > { %7257 = vrsqrt.f32 %v2854_v51 }
 0xb9b   : > { %v7256_v62 = vpop.eup %7255 }
 0xb9c   : > { %v2859_v4 = vmul.f32 %v7256_v62, %v2843_v32 }
 0xb9d   : > { %v7258_v3 = vpop.eup %7257 }
 0xb9e   : > { %v2858_v10 = vmul.f32 %v7258_v3, %v2842_v52  ;;  %v2867_v11 = vmul.f32 %v6169_v0, %v2859_v4 }
 0xba0   : > { %v2866_v12 = vmul.f32 %v6169_v0, %v2858_v10  ;;  %v2875_v13 = vadd.f32 %v6170_v59, %v2867_v11 }
 0xba2   : > { %v2874_v8 = vadd.f32 %v6170_v59, %v2866_v12 }
 0xba4   : > { %6855 = vmatprep.mubr.msk.f32.mxu1 %vm592_vm0, %v2874_v8 }
 0xba5   : > { %6856 = vmatmul.mubr.msk.f32.vlgmr.msra.gmra.mxu1 %vm592_vm0, %v2875_v13 }
 0xc65   : > { %v6857_v15 = vpop.f32.mrf.mxu1 }
 0xc66   : > { %v8187_v17 = vadd.f32 %v6857_v15, %v6176_v14 }
 0xc67   : > { %v2961_v18 = vpop.f32.mrf.mxu1 }
 0xc68   : > { %v8189_v20 = vadd.f32 %v6176_v14, %v2961_v18  ;;  %2980 = vrot.lane.b32.xlu1 %v8187_v17, %s7406_s24  ;;  %2974 = vrot.lane.b32.xlu0 %v8187_v17, %s7405_s17  ;;  %v2991_v6 = vmul.f32 0.35355338, %v8187_v17 }
 0xc6a   : > { %v2990_v25 = vmul.f32 0.35355338, %v8189_v20 }
 0xc6c   : > { %2978 = vrot.lane.b32.xlu0 %v8189_v20, %s7406_s24  ;;  %2972 = vrot.lane.b32.xlu1 %v8189_v20, %s7405_s17 }
 0xc6d   : > { %6862 = vmatprep.mubr.msk.f32.mxu1 %vm838_vm1, %v2990_v25 }
 0xc70   : > { %3000 = vrot.lane.b32.xlu0 %v8187_v17, %s7408_s27  ;;  %2986 = vrot.lane.b32.xlu1 %v8187_v17, %s7407_s26 }
 0xc74   : > { %2998 = vrot.lane.b32.xlu0 %v8189_v20, %s7408_s27  ;;  %2984 = vrot.lane.b32.xlu1 %v8189_v20, %s7407_s26 }
 0xcda   : > { %v8209_v28 = vpop.permute.xlu1 %2980  ;;  %v8211_v19 = vpop.permute.xlu0 %2974 }
 0xcdb   : > { %3178 = vrot.lane.b32.xlu0 %v8209_v28, %s7408_s27  ;;  %3089 = vrot.lane.b32.xlu1 %v8211_v19, %s7408_s27  ;;  %v2995_v27 = vmul.f32 0.35355338, %v8209_v28  ;;  %v2993_v47 = vmul.f32 0.35355338, %v8211_v19 }
 0xcde   : > { %v8217_v7 = vpop.permute.xlu0 %2978  ;;  %v8219_v5 = vpop.permute.xlu1 %2972 }
 0xcdf   : > { %v2992_v38 = vmul.f32 0.35355338, %v8219_v5  ;;  %3176 = vrot.lane.b32.xlu0 %v8217_v7, %s7408_s27  ;;  %3087 = vrot.lane.b32.xlu1 %v8219_v5, %s7408_s27  ;;  %v2994_v42 = vmul.f32 0.35355338, %v8217_v7 }
 0xce1   : > { %6869 = vmatprep.mubr.msk.f32.mxu0 %vm838_vm1, %v2992_v38 }
 0xce2   : > { %v3001_v21 = vpop.permute.xlu0 %3000  ;;  %v8227_v31 = vpop.permute.xlu1 %2986 }
 0xce3   : > { %6858 = vmatprep.subr.msk.mxu1 %vm838_vm1, %v3001_v21  ;;  %3267 = vrot.lane.b32.xlu1 %v8227_v31, %s7408_s27  ;;  %v2997_v43 = vmul.f32 0.35355338, %v8227_v31 }
 0xce4   : > { %6859 = vmatpush3.xpose.msk.msra.mxu1 %vm838_vm1, %v3001_v21 }
 0xce6   : > { %v2999_v26 = vpop.permute.xlu0 %2998  ;;  %v8233_v39 = vpop.permute.xlu1 %2984 }
 0xce7   : > { %6860 = vmatprep.subr.msk.mxu1 %vm838_vm1, %v2999_v26  ;;  %3265 = vrot.lane.b32.xlu1 %v8233_v39, %s7408_s27  ;;  %v2996_v34 = vmul.f32 0.35355338, %v8233_v39 }
 0xce8   : > { %6861 = vmatpush3.xpose.msk.msra.mxu1 %vm838_vm1, %v2999_v26 }
 0xceb   : > { %6863 = vmatmul.mubr.msk.f32.vlgmr.msra.gmra.mxu1 %vm838_vm1, %v2991_v6 }
 0xcec   : > { %6876 = vmatprep.mubr.msk.f32.mxu1 %vm838_vm1, %v2994_v42 }
 0xd4d   : > { %v3179_v60 = vpop.permute.xlu0 %3178  ;;  %v3090_v2 = vpop.permute.xlu1 %3089 }
 0xd4e   : > { %6865 = vmatprep.subr.msk.mxu0 %vm838_vm1, %v3090_v2  ;;  %6872 = vmatprep.subr.msk.mxu1 %vm838_vm1, %v3179_v60 }
 0xd4f   : > { %6866 = vmatpush3.xpose.msk.msra.mxu0 %vm838_vm1, %v3090_v2  ;;  %6873 = vmatpush3.xpose.msk.msra.mxu1 %vm838_vm1, %v3179_v60 }
 0xd51   : > { %v3177_v61 = vpop.permute.xlu0 %3176  ;;  %v3088_v9 = vpop.permute.xlu1 %3087 }
 0xd52   : > { %6867 = vmatprep.subr.msk.mxu0 %vm838_vm1, %v3088_v9  ;;  %6874 = vmatprep.subr.msk.mxu1 %vm838_vm1, %v3177_v61 }
 0xd53   : > { %6868 = vmatpush3.xpose.msk.msra.mxu0 %vm838_vm1, %v3088_v9  ;;  %6875 = vmatpush3.xpose.msk.msra.mxu1 %vm838_vm1, %v3177_v61 }
 0xd55   : > { %v3268_v22 = vpop.permute.xlu1 %3267 }
 0xd56   : > { %6870 = vmatmul.mubr.msk.f32.vlgmr.msra.gmra.mxu0 %vm838_vm1, %v2993_v47  ;;  %6877 = vmatmul.mubr.msk.f32.vlgmr.msra.gmra.mxu1 %vm838_vm1, %v2995_v27 }
 0xd57   : > { %6879 = vmatprep.subr.msk.mxu0 %vm838_vm1, %v3268_v22  ;;  %6883 = vmatprep.mubr.msk.f32.mxu0 %vm838_vm1, %v2996_v34 }
 0xd58   : > { %6880 = vmatpush3.xpose.msk.msra.mxu0 %vm838_vm1, %v3268_v22 }
 0xd59   : > { %v3266_v35 = vpop.permute.xlu1 %3265 }
 0xd5a   : > { %6881 = vmatprep.subr.msk.mxu0 %vm838_vm1, %v3266_v35 }
 0xd5c   : > { %6882 = vmatpush3.xpose.msk.msra.mxu0 %vm838_vm1, %v3266_v35 }
 0xd5f   : > { %6884 = vmatmul.mubr.msk.f32.vlgmr.msra.gmra.mxu0 %vm838_vm1, %v2997_v43 }
 0xdab   : > { %v6864_v48 = vpop.f32.mrf.mxu1 }
 0xdac   : > { %v3358_v1 = vsel %vm3354_vm2, %v6864_v48, -inf }
 0xdad   : > { %3359 = vmax.xlane.f32.xlu1 %v3358_v1  ;;  %v3078_v63 = vpop.f32.mrf.mxu1 }
 0xdae   : > { %v3355_v33 = vsel %vm3354_vm2, %v3078_v63, -inf }
 0xdaf   : > { %3356 = vmax.xlane.f32.xlu0 %v3355_v33 }
 0xe16   : > { %v6871_v46 = vpop.f32.mrf.mxu0  ;;  %v6878_v16 = vpop.f32.mrf.mxu1 }
 0xe17   : > { %v3364_v49 = vsel %vm3354_vm2, %v6871_v46, -inf  ;;  %v3370_v50 = vsel %vm3354_vm2, %v6878_v16, -inf }
 0xe18   : > { %v3167_v32 = vpop.f32.mrf.mxu0  ;;  %3365 = vmax.xlane.f32.xlu0 %v3364_v49  ;;  %3371 = vmax.xlane.f32.xlu1 %v3370_v50  ;;  %v3256_v52 = vpop.f32.mrf.mxu1 }
 0xe19   : > { %v3361_v36 = vsel %vm3354_vm2, %v3167_v32, -inf  ;;  %v3367_v54 = vsel %vm3354_vm2, %v3256_v52, -inf }
 0xe1c   : > { %3362 = vmax.xlane.f32.xlu0 %v3361_v36 }
 0xe1f   : > { %v6885_v53 = vpop.f32.mrf.mxu0 }
 0xe20   : > { %v3376_v55 = vsel %vm3354_vm2, %v6885_v53, -inf  ;;  %3368 = vmax.xlane.f32.xlu0 %v3367_v54 }
 0xe21   : > { %v3345_v56 = vpop.f32.mrf.mxu0  ;;  %3377 = vmax.xlane.f32.xlu1 %v3376_v55 }
 0xe22   : > { %v3373_v37 = vsel %vm3354_vm2, %v3345_v56, -inf }
 0xe24   : > { %3374 = vmax.xlane.f32.xlu0 %v3373_v37 }
 0xe32   : > { %3443 = vrot.lane.b32.xlu1 %v8189_v20, %s7409_s0 }
 0xe36   : > { %3532 = vrot.lane.b32.xlu1 %v8211_v19, %s7409_s0  ;;  %v3360_v58 = vpop.xlane.xlu1 %3359 }
 0xe37   : > { %v3380_v41 = vsub.f32 %v6864_v48, %v3360_v58 }
 0xe38   : > { %v3357_v40 = vpop.xlane.xlu0 %3356 }
 0xe39   : > { %v3379_v23 = vsub.f32 %v3078_v63, %v3357_v40  ;;  %v3389_v29 = vmul.f32 1.442695, %v3380_v41 }
 0xe3a   : > { %3530 = vrot.lane.b32.xlu1 %v8219_v5, %s7409_s0  ;;  %3445 = vrot.lane.b32.xlu0 %v8187_v17, %s7409_s0 }
 0xe3b   : > { %v3387_v24 = vmul.f32 1.442695, %v3379_v23 }
 0xe3d   : > { %7259 = vpow2.f32 %v3387_v24 }
 0xe3e   : > { %3617 = vrot.lane.b32.xlu1 %v8217_v7, %s7409_s0  ;;  %3619 = vrot.lane.b32.xlu0 %v8209_v28, %s7409_s0  ;;  %7261 = vpow2.f32 %v3389_v29 }
 0xe4a   : > { %v8283_v57 = vpop.eup %7259 }
 0xe4b   : > { %v3403_v44 = vsel %vm3354_vm2, %v8283_v57, 0.0  ;;  %v8287_v51 = vpop.eup %7261 }
 0xe4c   : > { %v3406_v62 = vsel %vm3354_vm2, %v8287_v51, 0.0 }
 0xe5d   : > { %3404 = vadd.xlane.f32.xlu0 %v3403_v44 }
 0xe62   : > { %3407 = vadd.xlane.f32.xlu1 %v3406_v62 }
 0xea1   : > { %v3366_v0 = vpop.xlane.xlu0 %3365  ;;  %v3372_v4 = vpop.xlane.xlu1 %3371 }
 0xea2   : > { %v3382_v3 = vsub.f32 %v6871_v46, %v3366_v0  ;;  %v3384_v10 = vsub.f32 %v6878_v16, %v3372_v4  ;;  %v6204_v4 = vld [vmem:[%s8784_s9 + $0x28] sm:$0xff] }
 0xea4   : > { %v3393_v11 = vmul.f32 1.442695, %v3382_v3  ;;  %v3397_v59 = vmul.f32 1.442695, %v3384_v10  ;;  %v6205_v3 = vld [vmem:[%s8784_s9 + $0x30] sm:$0xff]  ;;  %v6206_v10 = vld [vmem:[%s8784_s9 + $0x38] sm:$0xff] }
 0xea5   : > { %v3363_v12 = vpop.xlane.xlu0 %3362 }
 0xea6   : > { %7263 = vpow2.f32 %v3393_v11  ;;  %v3381_v8 = vsub.f32 %v3167_v32, %v3363_v12 }
 0xea7   : > { %7265 = vpow2.f32 %v3397_v59 }
 0xea8   : > { %v3391_v13 = vmul.f32 1.442695, %v3381_v8 }
 0xea9   : > { %v3369_v14 = vpop.xlane.xlu0 %3368 }
 0xeaa   : > { %7267 = vpow2.f32 %v3391_v13  ;;  %v3378_v15 = vpop.xlane.xlu1 %3377  ;;  %v3383_v17 = vsub.f32 %v3256_v52, %v3369_v14 }
 0xeab   : > { %v3386_v18 = vsub.f32 %v6885_v53, %v3378_v15 }
 0xeac   : > { %v3395_v20 = vmul.f32 1.442695, %v3383_v17 }
 0xead   : > { %v3401_v25 = vmul.f32 1.442695, %v3386_v18  ;;  %v3375_v28 = vpop.xlane.xlu0 %3374 }
 0xeae   : > { %7269 = vpow2.f32 %v3395_v20  ;;  %v3444_v19 = vpop.permute.xlu1 %3443  ;;  %v3385_v7 = vsub.f32 %v3345_v56, %v3375_v28 }
 0xeaf   : > { %7271 = vpow2.f32 %v3401_v25 }
 0xeb0   : > { %v3399_v5 = vmul.f32 1.442695, %v3385_v7 }
 0xeb1   : > { %v3446_v38 = vpop.permute.xlu0 %3445 }
 0xeb2   : > { %7273 = vpow2.f32 %v3399_v5  ;;  %v3533_v21 = vpop.permute.xlu1 %3532  ;;  %6886 = vmatprep.subr.mxu1 %v3446_v38 }
 0xeb3   : > { %v8291_v26 = vpop.eup %7263  ;;  %6887 = vmatpush3.msra.mxu1 %v3446_v38 }
 0xeb4   : > { %6888 = vmatprep.subr.mxu1 %v3444_v19  ;;  %v3412_v6 = vsel %vm3354_vm2, %v8291_v26, 0.0  ;;  %v8295_v42 = vpop.eup %7265 }
 0xeb5   : > { %3413 = vadd.xlane.f32.xlu1 %v3412_v6  ;;  %6889 = vmatpush3.msra.mxu1 %v3444_v19  ;;  %v3620_v60 = vpop.permute.xlu0 %3619  ;;  %v3418_v9 = vsel %vm3354_vm2, %v8295_v42, 0.0 }
 0xeb6   : > { %v3531_v2 = vpop.permute.xlu1 %3530  ;;  %6893 = vmatprep.subr.mxu1 %v3533_v21  ;;  %6900 = vmatprep.subr.mxu0 %v3620_v60 }
 0xeb7   : > { %v7268_v61 = vpop.eup %7267  ;;  %6901 = vmatpush3.msra.mxu0 %v3620_v60 }
 0xeb8   : > { %v3409_v27 = vsel %vm3354_vm2, %v7268_v61, 0.0 }
 0xeb9   : > { %3419 = vadd.xlane.f32.xlu1 %v3418_v9  ;;  %3410 = vadd.xlane.f32.xlu0 %v3409_v27 }
 0xeba   : > { %v3618_v47 = vpop.permute.xlu1 %3617 }
 0xebb   : > { %v7270_v34 = vpop.eup %7269  ;;  %6902 = vmatprep.subr.mxu0 %v3618_v47 }
 0xebc   : > { %v7272_v22 = vpop.eup %7271  ;;  %6903 = vmatpush3.msra.mxu0 %v3618_v47  ;;  %v3415_v35 = vsel %vm3354_vm2, %v7270_v34, 0.0  ;;  %v6216_v47 = vld [vmem:[%s8785_s10 + $0x1] ss:$0 sm:$0xff] }
 0xebd   : > { %v3424_v43 = vsel %vm3354_vm2, %v7272_v22, 0.0  ;;  %3416 = vadd.xlane.f32.xlu0 %v3415_v35 }
 0xebe   : > { %3425 = vadd.xlane.f32.xlu1 %v3424_v43 }
 0xebf   : > { %v7274_v48 = vpop.eup %7273 }
 0xec0   : > { %v3421_v1 = vsel %vm3354_vm2, %v7274_v48, 0.0 }
 0xec1   : > { %3422 = vadd.xlane.f32.xlu0 %v3421_v1 }
 0xecf   : > { %3704 = vrot.lane.b32.xlu1 %v8233_v39, %s7409_s0 }
 0xed7   : > { %3706 = vrot.lane.b32.xlu0 %v8227_v31, %s7409_s0  ;;  %v6203_v31 = vld [vmem:[%s8784_s9 + $0x20] sm:$0xff] }
 0xed8   : > { %6914 = vmatprep.subr.mxu0 %v6203_v31 }
 0xee6   : > { %v3405_v63 = vpop.xlane.xlu0 %3404 }
 0xee7   : > { %7275 = vrcp.f32 %v3405_v63 }
 0xeeb   : > { %v3408_v33 = vpop.xlane.xlu1 %3407 }
 0xeec   : > { %7277 = vrcp.f32 %v3408_v33 }
 0xef4   : > { %v7276_v46 = vpop.eup %7275 }
 0xef5   : > { %v3435_v16 = vmul.f32 %v7276_v46, %v8283_v57 }
 0xef7   : > { %6890 = vmatprep.mubr.msk.f32.mxu1 %vm3354_vm2, %v3435_v16 }
 0xef9   : > { %v7278_v49 = vpop.eup %7277 }
 0xefa   : > { %v3436_v50 = vmul.f32 %v7278_v49, %v8287_v51 }
 0xefc   : > { %6891 = vmatmul.mubr.msk.f32.vlgmr.msra.gmra.mxu1 %vm3354_vm2, %v3436_v50 }
 0xefd   : > { %6894 = vmatpush3.msra.mxu1 %v3533_v21 }
 0xefe   : > { %6895 = vmatprep.subr.mxu1 %v3531_v2 }
 0xeff   : > { %6896 = vmatpush3.msra.mxu1 %v3531_v2 }
 0xf3e   : > { %v3414_v39 = vpop.xlane.xlu1 %3413 }
 0xf3f   : > { %7279 = vrcp.f32 %v3414_v39 }
 0xf42   : > { %v3420_v32 = vpop.xlane.xlu1 %3419  ;;  %v3411_v36 = vpop.xlane.xlu0 %3410 }
 0xf43   : > { %7281 = vrcp.f32 %v3411_v36 }
 0xf44   : > { %7283 = vrcp.f32 %v3420_v32 }
 0xf46   : > { %v3417_v52 = vpop.xlane.xlu0 %3416 }
 0xf47   : > { %v3426_v53 = vpop.xlane.xlu1 %3425  ;;  %7285 = vrcp.f32 %v3417_v52 }
 0xf48   : > { %7287 = vrcp.f32 %v3426_v53 }
 0xf4a   : > { %v3423_v54 = vpop.xlane.xlu0 %3422 }
 0xf4b   : > { %7289 = vrcp.f32 %v3423_v54  ;;  %v3705_v29 = vpop.permute.xlu1 %3704 }
 0xf4c   : > { %v7280_v56 = vpop.eup %7279 }
 0xf4d   : > { %v3438_v58 = vmul.f32 %v7280_v56, %v8291_v26  ;;  %v6223_v56 = vld [vmem:[%s8788_s13 + $0x30] sm:$0xff] }
 0xf4e   : > { %v3707_v55 = vpop.permute.xlu0 %3706 }
 0xf4f   : > { %6907 = vmatprep.subr.mxu1 %v3707_v55 }
 0xf50   : > { %v7282_v37 = vpop.eup %7281 }
 0xf51   : > { %v3437_v40 = vmul.f32 %v7282_v37, %v7268_v61  ;;  %v7284_v23 = vpop.eup %7283  ;;  %v6222_v37 = vld [vmem:[%s8788_s13 + $0x28] sm:$0xff] }
 0xf52   : > { %v3440_v57 = vmul.f32 %v7284_v23, %v8295_v42 }
 0xf53   : > { %6897 = vmatprep.mubr.msk.f32.mxu1 %vm3354_vm2, %v3437_v40  ;;  %v6221_v40 = vld [vmem:[%s8788_s13 + $0x20] sm:$0xff] }
 0xf54   : > { %v7286_v24 = vpop.eup %7285  ;;  %6898 = vmatmul.mubr.msk.f32.vlgmr.msra.gmra.mxu1 %vm3354_vm2, %v3438_v58 }
 0xf55   : > { %v3439_v41 = vmul.f32 %v7286_v24, %v7270_v34  ;;  %6908 = vmatpush3.msra.mxu1 %v3707_v55  ;;  %v7288_v44 = vpop.eup %7287  ;;  %v6224_v55 = vld [vmem:[%s8788_s13 + $0x38] sm:$0xff] }
 0xf56   : > { %6909 = vmatprep.subr.mxu1 %v3705_v29  ;;  %v3442_v0 = vmul.f32 %v7288_v44, %v7272_v22 }
 0xf57   : > { %6904 = vmatprep.mubr.msk.f32.mxu0 %vm3354_vm2, %v3439_v41  ;;  %6910 = vmatpush3.msra.mxu1 %v3705_v29 }
 0xf58   : > { %v7290_v51 = vpop.eup %7289  ;;  %6905 = vmatmul.mubr.msk.f32.vlgmr.msra.gmra.mxu0 %vm3354_vm2, %v3440_v57  ;;  %6919 = vmatprep.subr.mxu1 %v6204_v4 }
 0xf59   : > { %v3441_v62 = vmul.f32 %v7290_v51, %v7274_v48  ;;  %6915 = vmatpush3.msra.mxu0 %v6203_v31  ;;  %v6219_v51 = vld [vmem:[%s8786_s11 + $0x1] ss:$0 sm:$0xff] }
 0xf5a   : > { %6924 = vmatprep.subr.mxu0 %v6205_v3 }
 0xf5b   : > { %6911 = vmatprep.mubr.msk.f32.mxu1 %vm3354_vm2, %v3441_v62 }
 0xf5c   : > { %6912 = vmatmul.mubr.msk.f32.vlgmr.msra.gmra.mxu1 %vm3354_vm2, %v3442_v0  ;;  %v6220_v0 = vld [vmem:[%s8787_s12 + $0x1] ss:$0 sm:$0xff] }
 0xf5d   : > { %6920 = vmatpush3.msra.mxu1 %v6204_v4 }
 0xf5e   : > { %6929 = vmatprep.subr.mxu1 %v6206_v10 }
 0xfbc   : > { %v6892_v11 = vpop.f32.mrf.mxu1 }
 0xfbe   : > { %v3521_v59 = vpop.f32.mrf.mxu1 }
 0xfbf   : > { %6916 = vmatprep.mubr.msk.f32.mxu0 %vm838_vm1, %v3521_v59 }
 0xfc0   : > { %6917 = vmatmul.mubr.msk.f32.vlgmr.msra.gmra.mxu0 %vm838_vm1, %v6892_v11 }
 0xfc1   : > { %6925 = vmatpush3.msra.mxu0 %v6205_v3 }
 0xfc2   : > { %6934 = vmatprep.subr.mxu0 %v6224_v55 }
0x1014   : > { %v6899_v12 = vpop.f32.mrf.mxu1 }
0x1016   : > { %v3608_v8 = vpop.f32.mrf.mxu1 }
0x1017   : > { %6921 = vmatprep.mubr.msk.f32.mxu1 %vm838_vm1, %v3608_v8  ;;  %v6244_v8 = vld [vmem:[%s8790_s15 + $0xf8] sm:$0xff] }
0x1018   : > { %v6906_v13 = vpop.f32.mrf.mxu0  ;;  %6922 = vmatmul.mubr.msk.f32.vlgmr.msra.gmra.mxu1 %vm838_vm1, %v6899_v12 }
0x1019   : > { %6930 = vmatpush3.msra.mxu1 %v6206_v10 }
0x101a   : > { %v3695_v14 = vpop.f32.mrf.mxu0  ;;  %6945 = vmatprep.subr.mxu1 %v6244_v8 }
0x101b   : > { %6926 = vmatprep.mubr.msk.f32.mxu0 %vm838_vm1, %v3695_v14  ;;  %v6242_v14 = vld [vmem:[%s8790_s15 + $0xe8] sm:$0xff] }
0x101c   : > { %v6913_v15 = vpop.f32.mrf.mxu1  ;;  %6927 = vmatmul.mubr.msk.f32.vlgmr.msra.gmra.mxu0 %vm838_vm1, %v6906_v13  ;;  %v6243_v13 = vld [vmem:[%s8790_s15 + $0xf0] sm:$0xff] }
0x101d   : > { %6935 = vmatpush3.msra.mxu0 %v6224_v55 }
0x101e   : > { %v3782_v17 = vpop.f32.mrf.mxu1  ;;  %6936 = vmatprep.subr.mxu0 %v6223_v56 }
0x101f   : > { %6931 = vmatprep.mubr.msk.f32.mxu1 %vm838_vm1, %v3782_v17  ;;  %6937 = vmatpush3.msra.mxu0 %v6223_v56  ;;  %v6240_v17 = vld [vmem:[%s8790_s15 + $0xd8] sm:$0xff] }
0x1020   : > { %6932 = vmatmul.mubr.msk.f32.vlgmr.msra.gmra.mxu1 %vm838_vm1, %v6913_v15  ;;  %6938 = vmatprep.subr.mxu0 %v6222_v37  ;;  %v6241_v15 = vld [vmem:[%s8790_s15 + $0xe0] sm:$0xff] }
0x1021   : > { %6939 = vmatpush3.msra.mxu0 %v6222_v37  ;;  %6946 = vmatpush3.msra.mxu1 %v6244_v8 }
0x1022   : > { %6940 = vmatprep.subr.mxu0 %v6221_v40  ;;  %6947 = vmatprep.subr.mxu1 %v6243_v13 }
0x1023   : > { %6941 = vmatpush3.msra.mxu0 %v6221_v40  ;;  %6948 = vmatpush3.msra.mxu1 %v6243_v13 }
0x1024   : > { %6949 = vmatprep.subr.mxu1 %v6242_v14 }
0x1025   : > { %6950 = vmatpush3.msra.mxu1 %v6242_v14 }
0x1026   : > { %6951 = vmatprep.subr.mxu1 %v6241_v15 }
0x1027   : > { %6952 = vmatpush3.msra.mxu1 %v6241_v15 }
0x1028   : > { %6953 = vmatprep.subr.mxu1 %v6240_v17 }
0x1029   : > { %6954 = vmatpush3.msra.mxu1 %v6240_v17 }
0x1080   : > { %v6918_v18 = vpop.f32.mrf.mxu0 }
0x1081   : > { %v4127_v5 = vsel %vm592_vm0, %v6918_v18, 0.0  ;;  %v6239_v18 = vld [vmem:[%s8790_s15 + $0xd0] sm:$0xff] }
0x1082   : > { %v3868_v25 = vpop.f32.mrf.mxu0  ;;  %6955 = vmatprep.subr.mxu1 %v6239_v18 }
0x1083   : > { %v4120_v42 = vsel %vm592_vm0, %v3868_v25, 0.0  ;;  %6956 = vmatpush3.msra.mxu1 %v6239_v18  ;;  %v6237_v25 = vld [vmem:[%s8790_s15 + $0xc0] sm:$0xff] }
0x1084   : > { %v6249_v18 = vld [vmem:[%s8780_s5 + $0x2] ss:$0 sm:$0xff] }
0x10d8   : > { %v6923_v20 = vpop.f32.mrf.mxu1 }
0x10d9   : > { %v4128_v28 = vsel %vm592_vm0, %v6923_v20, 0.0  ;;  %v6238_v20 = vld [vmem:[%s8790_s15 + $0xc8] sm:$0xff] }
0x10da   : > { %v3949_v19 = vpop.f32.mrf.mxu1  ;;  %v4129_v26 = vadd.f32 %v4128_v28, %v4127_v5  ;;  %6957 = vmatprep.subr.mxu1 %v6238_v20  ;;  %v6236_v28 = vld [vmem:[%s8790_s15 + $0xb8] sm:$0xff]  ;;  %v6233_v5 = vld [vmem:[%s8790_s15 + $0xa0] sm:$0xff] }
0x10db   : > { %v4121_v38 = vsel %vm592_vm0, %v3949_v19, 0.0  ;;  %6958 = vmatpush3.msra.mxu1 %v6238_v20  ;;  %v6235_v19 = vld [vmem:[%s8790_s15 + $0xb0] sm:$0xff] }
0x10dc   : > { %v6928_v7 = vpop.f32.mrf.mxu0  ;;  %v4122_v2 = vadd.f32 %v4121_v38, %v4120_v42  ;;  %6959 = vmatprep.subr.mxu1 %v6237_v25  ;;  %v6232_v38 = vld [vmem:[%s8790_s15 + $0x98] sm:$0xff]  ;;  %v6226_v42 = vld [vmem:[%s8789_s14 + $0x1] ss:$0 sm:$0xff] }
0x10dd   : > { %v4130_v21 = vsel %vm592_vm0, %v6928_v7, 0.0  ;;  %6960 = vmatpush3.msra.mxu1 %v6237_v25  ;;  %v6234_v7 = vld [vmem:[%s8790_s15 + $0xa8] sm:$0xff] }
0x10de   : > { %v4030_v6 = vpop.f32.mrf.mxu0  ;;  %v4131_v61 = vadd.f32 %v4130_v21, %v4129_v26  ;;  %6961 = vmatprep.subr.mxu1 %v6236_v28  ;;  %v6231_v21 = vld [vmem:[%s8790_s15 + $0x90] sm:$0xff]  ;;  %v6230_v26 = vld [vmem:[%s8790_s15 + $0x88] sm:$0xff] }
0x10df   : > { %v4123_v60 = vsel %vm592_vm0, %v4030_v6, 0.0  ;;  %6962 = vmatpush3.msra.mxu1 %v6236_v28  ;;  %v6229_v6 = vld [vmem:[%s8790_s15 + $0x80] sm:$0xff] }
0x10e0   : > { %v6933_v9 = vpop.f32.mrf.mxu1  ;;  %v4124_v34 = vadd.f32 %v4123_v60, %v4122_v2  ;;  %6963 = vmatprep.subr.mxu1 %v6235_v19 }
0x10e1   : > { %v4132_v27 = vsel %vm592_vm0, %v6933_v9, 0.0  ;;  %6964 = vmatpush3.msra.mxu1 %v6235_v19 }
0x10e2   : > { %v4133_v22 = vadd.f32 %v4132_v27, %v4131_v61  ;;  %v4111_v35 = vpop.f32.mrf.mxu1  ;;  %6965 = vmatprep.subr.mxu1 %v6234_v7 }
0x10e3   : > { %v4125_v43 = vsel %vm592_vm0, %v4111_v35, 0.0  ;;  %6966 = vmatpush3.msra.mxu1 %v6234_v7  ;;  %v6250_v7 = vld [vmem:[%s8781_s6 + $0x2] ss:$0 sm:$0xff] }
0x10e4   : > { %v4143_v48 = vadd.f32 %v6216_v47, %v4133_v22  ;;  %v4126_v1 = vadd.f32 %v4125_v43, %v4124_v34  ;;  %6967 = vmatprep.subr.mxu1 %v6233_v5 }
0x10e5   : > { %6968 = vmatpush3.msra.mxu1 %v6233_v5 }
0x10e6   : > { %v8351_v63 = vadd.f32 %v4143_v48, %v8152_v30  ;;  %v4142_v33 = vadd.f32 %v6216_v47, %v4126_v1  ;;  %6969 = vmatprep.subr.mxu1 %v6232_v38 }
0x10e7   : > { %6970 = vmatpush3.msra.mxu1 %v6232_v38 }
0x10e8   : > { %v8354_v46 = vadd.f32 %v4142_v33, %v8154_v45  ;;  %v4153_v16 = vsel %vm592_vm0, %v8351_v63, 0.0  ;;  %6971 = vmatprep.subr.mxu1 %v6231_v21 }
0x10e9   : > { %4154 = vadd.xlane.f32.xlu1 %v4153_v16  ;;  %6972 = vmatpush3.msra.mxu1 %v6231_v21 }
0x10ea   : > { %v4150_v49 = vsel %vm592_vm0, %v8354_v46, 0.0  ;;  %6973 = vmatprep.subr.mxu1 %v6230_v26 }
0x10eb   : > { %4151 = vadd.xlane.f32.xlu0 %v4150_v49  ;;  %6974 = vmatpush3.msra.mxu1 %v6230_v26  ;;  %v6256_v26 = vld [vmem:[%s8783_s8 + $0x2] ss:$0 sm:$0xff] }
0x10ec   : > { %6975 = vmatprep.subr.mxu1 %v6229_v6 }
0x10ed   : > { %6976 = vmatpush3.msra.mxu1 %v6229_v6 }
0x1172   : > { %v4155_v50 = vpop.xlane.xlu1 %4154 }
0x1173   : > { %v4157_v39 = vmul.f32 0.03125, %v4155_v50 }
0x1174   : > { %v4152_v31 = vpop.xlane.xlu0 %4151 }
0x1175   : > { %v4156_v32 = vmul.f32 0.03125, %v4152_v31  ;;  %v4159_v36 = vsub.f32 %v8351_v63, %v4157_v39 }
0x1177   : > { %v4158_v30 = vsub.f32 %v8354_v46, %v4156_v32  ;;  %v4161_v53 = vmul.f32 %v4159_v36, %v4159_v36 }
0x1179   : > { %v4160_v52 = vmul.f32 %v4158_v30, %v4158_v30  ;;  %v4165_v54 = vsel %vm592_vm0, %v4161_v53, 0.0 }
0x117b   : > { %v4162_v45 = vsel %vm592_vm0, %v4160_v52, 0.0 }
0x117c   : > { %4163 = vadd.xlane.f32.xlu0 %v4162_v45  ;;  %v6246_v45 = vld [vmem:[%s8791_s16 + $0x1] ss:$0 sm:$0xff] }
0x1180   : > { %4166 = vadd.xlane.f32.xlu0 %v4165_v54 }
0x1205   : > { %v4164_v23 = vpop.xlane.xlu0 %4163 }
0x1206   : > { %v4168_v58 = vmul.f32 0.03125, %v4164_v23 }
0x1208   : > { %v4170_v24 = vadd.f32 1e-05, %v4168_v58 }
0x1209   : > { %v4167_v41 = vpop.xlane.xlu0 %4166 }
0x120a   : > { %7291 = vrsqrt.f32 %v4170_v24  ;;  %v4169_v29 = vmul.f32 0.03125, %v4167_v41 }
0x120c   : > { %v4171_v57 = vadd.f32 1e-05, %v4169_v29 }
0x120e   : > { %7293 = vrsqrt.f32 %v4171_v57 }
0x1217   : > { %v7292_v44 = vpop.eup %7291 }
0x1218   : > { %v4174_v62 = vmul.f32 %v7292_v44, %v4158_v30 }
0x121a   : > { %v4182_v4 = vmul.f32 %v6219_v51, %v4174_v62 }
0x121b   : > { %v7294_v3 = vpop.eup %7293 }
0x121c   : > { %v4175_v10 = vmul.f32 %v7294_v3, %v4159_v36  ;;  %v4190_v11 = vadd.f32 %v6220_v0, %v4182_v4  ;;  %v6254_v4 = vld [vmem:[%s8782_s7 + $0x58] sm:$0xff]  ;;  %v6253_v3 = vld [vmem:[%s8782_s7 + $0x50] sm:$0xff] }
0x121d   : > { %6980 = vmatprep.subr.mxu0 %v6254_v4 }
0x121e   : > { %v4183_v59 = vmul.f32 %v6219_v51, %v4175_v10  ;;  %6942 = vmatprep.mubr.msk.f32.mxu0 %vm592_vm0, %v4190_v11  ;;  %v6252_v10 = vld [vmem:[%s8782_s7 + $0x48] sm:$0xff]  ;;  %v6251_v11 = vld [vmem:[%s8782_s7 + $0x40] sm:$0xff] }
0x1220   : > { %v4191_v12 = vadd.f32 %v6220_v0, %v4183_v59 }
0x1222   : > { %6943 = vmatmul.mubr.msk.f32.vlgmr.msra.gmra.mxu0 %vm592_vm0, %v4191_v12 }
0x1223   : > { %6981 = vmatpush3.msra.mxu0 %v6254_v4 }
0x1224   : > { %6982 = vmatprep.subr.mxu0 %v6253_v3 }
0x1225   : > { %6983 = vmatpush3.msra.mxu0 %v6253_v3 }
0x1226   : > { %6984 = vmatprep.subr.mxu0 %v6252_v10 }
0x1227   : > { %6985 = vmatpush3.msra.mxu0 %v6252_v10 }
0x1228   : > { %6986 = vmatprep.subr.mxu0 %v6251_v11 }
0x1229   : > { %6987 = vmatpush3.msra.mxu0 %v6251_v11 }
0x12e2   : > { %v6944_v60 = vpop.f32.mrf.mxu0 }
0x12e3   : > { %v4283_v2 = vadd.f32 %v6944_v60, %v6226_v42 }
0x12e4   : > { %v4277_v61 = vpop.f32.mrf.mxu0 }
0x12e5   : > { %v4287_v9 = vmul.f32 %v4283_v2, %v4283_v2  ;;  %v4278_v27 = vadd.f32 %v6226_v42, %v4277_v61 }
0x12e7   : > { %v4289_v47 = vmul.f32 %v4287_v9, %v4283_v2  ;;  %v4286_v34 = vmul.f32 %v4278_v27, %v4278_v27 }
0x12e9   : > { %v4291_v22 = vmul.f32 0.044715, %v4289_v47  ;;  %v4288_v35 = vmul.f32 %v4286_v34, %v4278_v27 }
0x12eb   : > { %v4293_v43 = vadd.f32 %v4291_v22, %v4283_v2  ;;  %v4290_v48 = vmul.f32 0.044715, %v4288_v35 }
0x12ed   : > { %v4295_v1 = vmul.f32 0.7978846, %v4293_v43  ;;  %v4292_v33 = vadd.f32 %v4290_v48, %v4278_v27 }
0x12ef   : > { %7295 = vtanh.f32 %v4295_v1  ;;  %v4294_v16 = vmul.f32 0.7978846, %v4292_v33 }
0x12f1   : > { %7297 = vtanh.f32 %v4294_v16 }
0x12fc   : > { %v7296_v49 = vpop.eup %7295 }
0x12fd   : > { %v4299_v50 = vadd.f32 1.0, %v7296_v49 }
0x12fe   : > { %v7298_v39 = vpop.eup %7297 }
0x12ff   : > { %v4298_v31 = vadd.f32 1.0, %v7298_v39  ;;  %v4301_v32 = vmul.f32 0.5, %v4299_v50 }
0x1301   : > { %v4300_v36 = vmul.f32 0.5, %v4298_v31  ;;  %v4303_v52 = vmul.f32 %v4301_v32, %v4283_v2 }
0x1303   : > { %v4302_v30 = vmul.f32 %v4300_v36, %v4278_v27 }
0x1305   : > { %6977 = vmatprep.mubr.f32.mxu1 %v4302_v30 }
0x1306   : > { %6978 = vmatmul.mubr.f32.vlgmr.msra.gmra.mxu1 %v4303_v52 }
0x13c6   : > { %v6979_v53 = vpop.f32.mrf.mxu1 }
0x13c7   : > { %v4401_v54 = vadd.f32 %v6979_v53, %v6246_v45 }
0x13c8   : > { %v4395_v55 = vpop.f32.mrf.mxu1 }
0x13c9   : > { %v8439_v56 = vadd.f32 %v4401_v54, %v8351_v63  ;;  %v4396_v37 = vadd.f32 %v6246_v45, %v4395_v55 }
0x13cb   : > { %v8442_v40 = vadd.f32 %v4396_v37, %v8354_v46  ;;  %v4413_v23 = vsel %vm592_vm0, %v8439_v56, 0.0 }
0x13cc   : > { %4414 = vadd.xlane.f32.xlu1 %v4413_v23 }
0x13cd   : > { %v4410_v58 = vsel %vm592_vm0, %v8442_v40, 0.0 }
0x13ce   : > { %4411 = vadd.xlane.f32.xlu0 %v4410_v58 }
0x1455   : > { %v4415_v24 = vpop.xlane.xlu1 %4414 }
0x1456   : > { %v4417_v41 = vmul.f32 0.03125, %v4415_v24 }
0x1457   : > { %v4412_v29 = vpop.xlane.xlu0 %4411 }
0x1458   : > { %v4419_v57 = vsub.f32 %v8439_v56, %v4417_v41  ;;  %v4416_v44 = vmul.f32 0.03125, %v4412_v29 }
0x145a   : > { %v4418_v63 = vsub.f32 %v8442_v40, %v4416_v44  ;;  %v4421_v51 = vmul.f32 %v4419_v57, %v4419_v57 }
0x145c   : > { %v4425_v46 = vsel %vm592_vm0, %v4421_v51, 0.0  ;;  %v4420_v62 = vmul.f32 %v4418_v63, %v4418_v63 }
0x145d   : > { %4426 = vadd.xlane.f32.xlu1 %v4425_v46 }
0x145e   : > { %v4422_v0 = vsel %vm592_vm0, %v4420_v62, 0.0 }
0x145f   : > { %4423 = vadd.xlane.f32.xlu0 %v4422_v0 }
0x14e6   : > { %v4427_v59 = vpop.xlane.xlu1 %4426 }
0x14e7   : > { %v4429_v12 = vmul.f32 0.03125, %v4427_v59 }
0x14e8   : > { %v4424_v8 = vpop.xlane.xlu0 %4423 }
0x14e9   : > { %v4431_v13 = vadd.f32 1e-05, %v4429_v12  ;;  %v4428_v14 = vmul.f32 0.03125, %v4424_v8 }
0x14eb   : > { %7299 = vrsqrt.f32 %v4431_v13  ;;  %v4430_v15 = vadd.f32 1e-05, %v4428_v14 }
0x14ed   : > { %7301 = vrsqrt.f32 %v4430_v15 }
0x14f8   : > { %v7300_v17 = vpop.eup %7299 }
0x14f9   : > { %v4435_v20 = vmul.f32 %v7300_v17, %v4419_v57 }
0x14fa   : > { %v7302_v25 = vpop.eup %7301 }
0x14fb   : > { %v4434_v28 = vmul.f32 %v7302_v25, %v4418_v63  ;;  %v4443_v19 = vmul.f32 %v6249_v18, %v4435_v20 }
0x14fd   : > { %v4442_v5 = vmul.f32 %v6249_v18, %v4434_v28  ;;  %v4451_v21 = vadd.f32 %v6250_v7, %v4443_v19 }
0x14ff   : > { %v4450_v38 = vadd.f32 %v6250_v7, %v4442_v5 }
0x1501   : > { %6988 = vmatprep.mubr.msk.f32.mxu0 %vm592_vm0, %v4450_v38 }
0x1502   : > { %6989 = vmatmul.mubr.msk.f32.vlgmr.msra.gmra.mxu0 %vm592_vm0, %v4451_v21 }
0x15c2   : > { %v6990_v6 = vpop.f32.mrf.mxu0 }
0x15c3   : > { %v8475_v42 = vadd.f32 %v6990_v6, %v6256_v26 }
0x15c4   : > { %v4537_v60 = vpop.f32.mrf.mxu0 }
0x15c5   : > { %v8477_v2 = vadd.f32 %v6256_v26, %v4537_v60  ;;  %4550 = vrot.lane.b32.xlu0 %v8475_v42, %s7405_s17  ;;  %v4567_v33 = vmul.f32 0.35355338, %v8475_v42 }
0x15c7   : > { %4548 = vrot.lane.b32.xlu1 %v8477_v2, %s7405_s17  ;;  %v4566_v61 = vmul.f32 0.35355338, %v8477_v2  ;;  %s554_s17 = sand.u32 1, %s7395_s25  }
0x15c8   : > { %s8735_s28 = scalar_lea.sflag [#allocation3], %s554_s17 }
0x15c9   : > { %4554 = vrot.lane.b32.xlu0 %v8477_v2, %s7406_s24  ;;  %6995 = vmatprep.mubr.msk.f32.mxu0 %vm838_vm1, %v4566_v61 }
0x15cb   : > { %4556 = vrot.lane.b32.xlu1 %v8475_v42, %s7406_s24  ;;  %s6075_s24 = sshll.u32 %s554_s17, 4 }
0x15cc   : > { %s556_s30 = scalar_lea.vmem [#allocation2], %s6075_s24  ;;  %s7347_s24 = sshll.u32 %s7410_s29, 4  ;;  %s7348_s24 = int_to_ptr.vmem [resolvable:$false] %s7347_s24 }
0x15cd   : > { %4576 = vrot.lane.b32.xlu0 %v8475_v42, %s7408_s27  ;;  %s5997_s18 = sshll.u32 %s556_s30, 4  ;;  %s8730_s18 = int_to_ptr.vmem [resolvable:$true] %s5997_s18 }
0x15ce   : > { %s7343_s23 = scalar_lea.vmem %s8730_s18, 256  ;;  %p7350_p0 = scmp.lt.s32.totalorder %s8730_s18, %s7348_s24 }
0x15cf   : > { %4562 = vrot.lane.b32.xlu1 %v8475_v42, %s7407_s26  ;;  %p7344_p11 = scmp.ne.s32.totalorder %s8730_s18, %s7343_s23 }
0x15d1   : > { %p7345_p12 = pnand %p7344_p11, %p7541_p5 }
0x15d3   : > { %4560 = vrot.lane.b32.xlu1 %v8477_v2, %s7407_s26  ;;  %p7346_p13 = pneg %p7345_p12  ;;  %s7349_s26 = scalar_lea.vmem %s7348_s24, 512 }
0x15d4   : > { %p7351_p1 = scmp.lt.s32.totalorder %s7349_s26, %s7343_s23 }
0x15d6   : > { %p7352_p2 = por %p7351_p1, %p7350_p0 }
0x15d7   : > { %4574 = vrot.lane.b32.xlu1 %v8477_v2, %s7408_s27 }
0x15d8   : > { %p7353_p3 = pnand %p7352_p2, %p7346_p13 }
0x1637   : > { %v8497_v9 = vpop.permute.xlu0 %4550 }
0x1638   : > { %4665 = vrot.lane.b32.xlu0 %v8497_v9, %s7408_s27  ;;  %v4569_v31 = vmul.f32 0.35355338, %v8497_v9 }
0x1639   : > { %v8501_v27 = vpop.permute.xlu1 %4548 }
0x163a   : > { %4663 = vrot.lane.b32.xlu1 %v8501_v27, %s7408_s27  ;;  %v4568_v16 = vmul.f32 0.35355338, %v8501_v27 }
0x163b   : > { %v8505_v47 = vpop.permute.xlu0 %4554 }
0x163c   : > { %v4570_v32 = vmul.f32 0.35355338, %v8505_v47 }
0x163d   : > { %v8507_v34 = vpop.permute.xlu1 %4556 }
0x163e   : > { %4754 = vrot.lane.b32.xlu0 %v8507_v34, %s7408_s27  ;;  %v4571_v45 = vmul.f32 0.35355338, %v8507_v34 }
0x163f   : > { %v4577_v22 = vpop.permute.xlu0 %4576 }
0x1640   : > { %6991 = vmatprep.subr.msk.mxu0 %vm838_vm1, %v4577_v22 }
0x1641   : > { %6992 = vmatpush3.xpose.msk.msra.mxu0 %vm838_vm1, %v4577_v22  ;;  %v8513_v35 = vpop.permute.xlu1 %4562 }
0x1642   : > { %4752 = vrot.lane.b32.xlu0 %v8505_v47, %s7408_s27  ;;  %4843 = vrot.lane.b32.xlu1 %v8513_v35, %s7408_s27  ;;  %v4573_v53 = vmul.f32 0.35355338, %v8513_v35 }
0x1645   : > { %v8519_v43 = vpop.permute.xlu1 %4560 }
0x1646   : > { %v4572_v48 = vmul.f32 0.35355338, %v8519_v43  ;;  %4841 = vrot.lane.b32.xlu1 %v8519_v43, %s7408_s27 }
0x1648   : > { %7016 = vmatprep.mubr.msk.f32.mxu1 %vm838_vm1, %v4572_v48 }
0x1649   : > { %v4575_v1 = vpop.permute.xlu1 %4574 }
0x164a   : > { %6993 = vmatprep.subr.msk.mxu0 %vm838_vm1, %v4575_v1 }
0x164b   : > { %6994 = vmatpush3.xpose.msk.msra.mxu0 %vm838_vm1, %v4575_v1 }
0x164e   : > { %6996 = vmatmul.mubr.msk.f32.vlgmr.msra.gmra.mxu0 %vm838_vm1, %v4567_v33 }
0x164f   : > { %7002 = vmatprep.mubr.msk.f32.mxu0 %vm838_vm1, %v4568_v16 }
0x16aa   : > { %v4666_v49 = vpop.permute.xlu0 %4665 }
0x16ab   : > { %6998 = vmatprep.subr.msk.mxu0 %vm838_vm1, %v4666_v49 }
0x16ac   : > { %v4664_v50 = vpop.permute.xlu1 %4663  ;;  %6999 = vmatpush3.xpose.msk.msra.mxu0 %vm838_vm1, %v4666_v49 }
0x16ad   : > { %7000 = vmatprep.subr.msk.mxu0 %vm838_vm1, %v4664_v50 }
0x16b0   : > { %v4755_v39 = vpop.permute.xlu0 %4754  ;;  %7001 = vmatpush3.xpose.msk.msra.mxu0 %vm838_vm1, %v4664_v50 }
0x16b1   : > { %7005 = vmatprep.subr.msk.mxu0 %vm838_vm1, %v4755_v39 }
0x16b3   : > { %7003 = vmatmul.mubr.msk.f32.vlgmr.msra.gmra.mxu0 %vm838_vm1, %v4569_v31 }
0x16b4   : > { %v4753_v36 = vpop.permute.xlu0 %4752  ;;  %v4844_v30 = vpop.permute.xlu1 %4843  ;;  %7006 = vmatpush3.xpose.msk.msra.mxu0 %vm838_vm1, %v4755_v39  ;;  %7009 = vmatprep.mubr.msk.f32.mxu0 %vm838_vm1, %v4570_v32 }
0x16b5   : > { %7007 = vmatprep.subr.msk.mxu0 %vm838_vm1, %v4753_v36  ;;  %7012 = vmatprep.subr.msk.mxu1 %vm838_vm1, %v4844_v30 }
0x16b6   : > { %7013 = vmatpush3.xpose.msk.msra.mxu1 %vm838_vm1, %v4844_v30 }
0x16b8   : > { %v4842_v52 = vpop.permute.xlu1 %4841  ;;  %7008 = vmatpush3.xpose.msk.msra.mxu0 %vm838_vm1, %v4753_v36 }
0x16b9   : > { %7014 = vmatprep.subr.msk.mxu1 %vm838_vm1, %v4842_v52 }
0x16ba   : > { %7015 = vmatpush3.xpose.msk.msra.mxu1 %vm838_vm1, %v4842_v52 }
0x16bb   : > { %7010 = vmatmul.mubr.msk.f32.vlgmr.msra.gmra.mxu0 %vm838_vm1, %v4571_v45 }
0x16bd   : > { %7017 = vmatmul.mubr.msk.f32.vlgmr.msra.gmra.mxu1 %vm838_vm1, %v4573_v53 }
0x170e   : > { %v6997_v54 = vpop.f32.mrf.mxu0 }
0x170f   : > { %v4933_v55 = vsel %vm3354_vm2, %v6997_v54, -inf }
0x1710   : > { %4934 = vmax.xlane.f32.xlu1 %v4933_v55  ;;  %v4654_v37 = vpop.f32.mrf.mxu0 }
0x1711   : > { %v4930_v23 = vsel %vm3354_vm2, %v4654_v37, -inf }
0x1712   : > { %4931 = vmax.xlane.f32.xlu0 %v4930_v23 }
0x1773   : > { %v7004_v58 = vpop.f32.mrf.mxu0 }
0x1774   : > { %v4939_v24 = vsel %vm3354_vm2, %v7004_v58, -inf }
0x1775   : > { %4940 = vmax.xlane.f32.xlu0 %v4939_v24  ;;  %v4743_v41 = vpop.f32.mrf.mxu0 }
0x1776   : > { %v4936_v29 = vsel %vm3354_vm2, %v4743_v41, -inf }
0x1779   : > { %4937 = vmax.xlane.f32.xlu0 %v4936_v29 }
0x177b   : > { %v7011_v57 = vpop.f32.mrf.mxu0 }
0x177c   : > { %v4945_v44 = vsel %vm3354_vm2, %v7011_v57, -inf }
0x177d   : > { %v7018_v63 = vpop.f32.mrf.mxu1  ;;  %4946 = vmax.xlane.f32.xlu1 %v4945_v44  ;;  %v4832_v51 = vpop.f32.mrf.mxu0 }
0x177e   : > { %v4942_v46 = vsel %vm3354_vm2, %v4832_v51, -inf  ;;  %v4951_v0 = vsel %vm3354_vm2, %v7018_v63, -inf }
0x177f   : > { %v4921_v62 = vpop.f32.mrf.mxu1  ;;  %4943 = vmax.xlane.f32.xlu0 %v4942_v46 }
0x1780   : > { %v4948_v4 = vsel %vm3354_vm2, %v4921_v62, -inf }
0x1781   : > { %4952 = vmax.xlane.f32.xlu1 %v4951_v0 }
0x1783   : > { %4949 = vmax.xlane.f32.xlu0 %v4948_v4 }
0x1792   : > { %5018 = vrot.lane.b32.xlu1 %v8477_v2, %s7409_s0 }
0x1796   : > { %5107 = vrot.lane.b32.xlu1 %v8497_v9, %s7409_s0 }
0x1799   : > { %5020 = vrot.lane.b32.xlu0 %v8475_v42, %s7409_s0  ;;  %v4935_v11 = vpop.xlane.xlu1 %4934 }
0x179a   : > { %5105 = vrot.lane.b32.xlu1 %v8501_v27, %s7409_s0  ;;  %v4955_v12 = vsub.f32 %v6997_v54, %v4935_v11 }
0x179b   : > { %v4932_v3 = vpop.xlane.xlu0 %4931 }
0x179c   : > { %v4954_v10 = vsub.f32 %v4654_v37, %v4932_v3  ;;  %v4964_v8 = vmul.f32 1.442695, %v4955_v12 }
0x179d   : > { %5194 = vrot.lane.b32.xlu0 %v8507_v34, %s7409_s0 }
0x179e   : > { %5192 = vrot.lane.b32.xlu1 %v8505_v47, %s7409_s0  ;;  %v4962_v59 = vmul.f32 1.442695, %v4954_v10 }
0x17a0   : > { %7303 = vpow2.f32 %v4962_v59 }
0x17a1   : > { %7305 = vpow2.f32 %v4964_v8 }
0x17ad   : > { %v8571_v13 = vpop.eup %7303 }
0x17ae   : > { %v4978_v14 = vsel %vm3354_vm2, %v8571_v13, 0.0  ;;  %v8575_v15 = vpop.eup %7305 }
0x17af   : > { %v4981_v17 = vsel %vm3354_vm2, %v8575_v15, 0.0 }
0x17bc   : > { %4979 = vadd.xlane.f32.xlu0 %v4978_v14 }
0x17c2   : > { %4982 = vadd.xlane.f32.xlu1 %v4981_v17 }
0x17fe   : > { %v4941_v18 = vpop.xlane.xlu0 %4940 }
0x17ff   : > { %v4957_v20 = vsub.f32 %v7004_v58, %v4941_v18 }
0x1801   : > { %v4968_v25 = vmul.f32 1.442695, %v4957_v20  ;;  %v6284_v20 = vld [vmem:[%s8784_s9 + $0x48] sm:$0xff] }
0x1802   : > { %v4938_v28 = vpop.xlane.xlu0 %4937 }
0x1803   : > { %7307 = vpow2.f32 %v4968_v25  ;;  %v4956_v19 = vsub.f32 %v4743_v41, %v4938_v28  ;;  %v6286_v25 = vld [vmem:[%s8784_s9 + $0x58] sm:$0xff]  ;;  %v6285_v28 = vld [vmem:[%s8784_s9 + $0x50] sm:$0xff] }
0x1805   : > { %v4966_v7 = vmul.f32 1.442695, %v4956_v19 }
0x1806   : > { %v4947_v5 = vpop.xlane.xlu1 %4946 }
0x1807   : > { %7309 = vpow2.f32 %v4966_v7  ;;  %v4959_v38 = vsub.f32 %v7011_v57, %v4947_v5 }
0x1808   : > { %v4944_v21 = vpop.xlane.xlu0 %4943 }
0x1809   : > { %v4958_v6 = vsub.f32 %v4832_v51, %v4944_v21  ;;  %v4972_v60 = vmul.f32 1.442695, %v4959_v38 }
0x180a   : > { %v4953_v26 = vpop.xlane.xlu1 %4952 }
0x180b   : > { %v4961_v42 = vsub.f32 %v7018_v63, %v4953_v26  ;;  %v4970_v47 = vmul.f32 1.442695, %v4958_v6 }
0x180c   : > { %v4950_v2 = vpop.xlane.xlu0 %4949 }
0x180d   : > { %v4976_v61 = vmul.f32 1.442695, %v4961_v42  ;;  %v4960_v9 = vsub.f32 %v4921_v62, %v4950_v2 }
0x180e   : > { %v5019_v27 = vpop.permute.xlu1 %5018 }
0x180f   : > { %7311 = vpow2.f32 %v4976_v61  ;;  %v4974_v34 = vmul.f32 1.442695, %v4960_v9 }
0x1810   : > { %v8579_v22 = vpop.eup %7307  ;;  %7313 = vpow2.f32 %v4972_v60  ;;  %v5021_v48 = vpop.permute.xlu0 %5020 }
0x1811   : > { %7315 = vpow2.f32 %v4974_v34  ;;  %7019 = vmatprep.subr.mxu0 %v5021_v48  ;;  %v4987_v1 = vsel %vm3354_vm2, %v8579_v22, 0.0 }
0x1812   : > { %4988 = vadd.xlane.f32.xlu1 %v4987_v1  ;;  %v5108_v33 = vpop.permute.xlu1 %5107  ;;  %7020 = vmatpush3.msra.mxu0 %v5021_v48  ;;  %7317 = vpow2.f32 %v4970_v47 }
0x1813   : > { %7021 = vmatprep.subr.mxu0 %v5019_v27  ;;  %7026 = vmatprep.subr.mxu1 %v5108_v33 }
0x1814   : > { %v7310_v16 = vpop.eup %7309  ;;  %7022 = vmatpush3.msra.mxu0 %v5019_v27  ;;  %7027 = vmatpush3.msra.mxu1 %v5108_v33  ;;  %v5195_v49 = vpop.permute.xlu0 %5194 }
0x1815   : > { %7033 = vmatprep.subr.mxu0 %v5195_v49  ;;  %v4984_v50 = vsel %vm3354_vm2, %v7310_v16, 0.0 }
0x1816   : > { %v5106_v39 = vpop.permute.xlu1 %5105  ;;  %4985 = vadd.xlane.f32.xlu0 %v4984_v50 }
0x1817   : > { %7028 = vmatprep.subr.mxu1 %v5106_v39 }
0x1818   : > { %7029 = vmatpush3.msra.mxu1 %v5106_v39 }
0x181a   : > { %v5193_v37 = vpop.permute.xlu1 %5192 }
0x181c   : > { %v7312_v31 = vpop.eup %7311 }
0x181d   : > { %v7314_v32 = vpop.eup %7313  ;;  %v4999_v36 = vsel %vm3354_vm2, %v7312_v31, 0.0 }
0x181e   : > { %v7316_v30 = vpop.eup %7315  ;;  %5000 = vadd.xlane.f32.xlu1 %v4999_v36  ;;  %v4993_v53 = vsel %vm3354_vm2, %v7314_v32, 0.0  ;;  %v6296_v36 = vld [vmem:[%s8785_s10 + $0x2] ss:$0 sm:$0xff] }
0x181f   : > { %v4996_v52 = vsel %vm3354_vm2, %v7316_v30, 0.0  ;;  %v7318_v45 = vpop.eup %7317 }
0x1820   : > { %4997 = vadd.xlane.f32.xlu0 %v4996_v52  ;;  %v4990_v54 = vsel %vm3354_vm2, %v7318_v45, 0.0 }
0x1822   : > { %4994 = vadd.xlane.f32.xlu1 %v4993_v53 }
0x1824   : > { %4991 = vadd.xlane.f32.xlu0 %v4990_v54 }
0x1833   : > { %5279 = vrot.lane.b32.xlu1 %v8519_v43, %s7409_s0 }
0x183a   : > { %5281 = vrot.lane.b32.xlu0 %v8513_v35, %s7409_s0  ;;  %v6283_v35 = vld [vmem:[%s8784_s9 + $0x40] sm:$0xff] }
0x1845   : > { %v4980_v55 = vpop.xlane.xlu0 %4979 }
0x1846   : > { %7319 = vrcp.f32 %v4980_v55 }
0x184b   : > { %v4983_v23 = vpop.xlane.xlu1 %4982 }
0x184c   : > { %7321 = vrcp.f32 %v4983_v23 }
0x1853   : > { %v7320_v58 = vpop.eup %7319 }
0x1854   : > { %v5010_v24 = vmul.f32 %v7320_v58, %v8571_v13 }
0x1856   : > { %7023 = vmatprep.mubr.msk.f32.mxu0 %vm3354_vm2, %v5010_v24 }
0x1859   : > { %v7322_v41 = vpop.eup %7321 }
0x185a   : > { %v5011_v29 = vmul.f32 %v7322_v41, %v8575_v15 }
0x185c   : > { %7024 = vmatmul.mubr.msk.f32.vlgmr.msra.gmra.mxu0 %vm3354_vm2, %v5011_v29 }
0x185d   : > { %7034 = vmatpush3.msra.mxu0 %v5195_v49 }
0x185e   : > { %7035 = vmatprep.subr.mxu0 %v5193_v37 }
0x185f   : > { %7036 = vmatpush3.msra.mxu0 %v5193_v37 }
0x1860   : > { %7047 = vmatprep.subr.mxu0 %v6283_v35 }
0x189b   : > { %v4989_v43 = vpop.xlane.xlu1 %4988 }
0x189c   : > { %7323 = vrcp.f32 %v4989_v43 }
0x189f   : > { %v4986_v57 = vpop.xlane.xlu0 %4985 }
0x18a0   : > { %7325 = vrcp.f32 %v4986_v57 }
0x18a7   : > { %v5001_v44 = vpop.xlane.xlu1 %5000 }
0x18a8   : > { %7327 = vrcp.f32 %v5001_v44 }
0x18a9   : > { %v4998_v63 = vpop.xlane.xlu0 %4997  ;;  %v7324_v46 = vpop.eup %7323 }
0x18aa   : > { %7329 = vrcp.f32 %v4998_v63  ;;  %v5013_v3 = vmul.f32 %v7324_v46, %v8579_v22 }
0x18ab   : > { %v4995_v51 = vpop.xlane.xlu1 %4994 }
0x18ac   : > { %7331 = vrcp.f32 %v4995_v51 }
0x18ad   : > { %v7326_v62 = vpop.eup %7325  ;;  %v4992_v0 = vpop.xlane.xlu0 %4991 }
0x18ae   : > { %7333 = vrcp.f32 %v4992_v0  ;;  %v5012_v4 = vmul.f32 %v7326_v62, %v7310_v16  ;;  %v6304_v62 = vld [vmem:[%s8788_s13 + $0x58] sm:$0xff]  ;;  %v6303_v0 = vld [vmem:[%s8788_s13 + $0x50] sm:$0xff] }
0x18af   : > { %v5280_v11 = vpop.permute.xlu1 %5279 }
0x18b0   : > { %7030 = vmatprep.mubr.msk.f32.mxu1 %vm3354_vm2, %v5012_v4  ;;  %v6302_v4 = vld [vmem:[%s8788_s13 + $0x48] sm:$0xff] }
0x18b1   : > { %7031 = vmatmul.mubr.msk.f32.vlgmr.msra.gmra.mxu1 %vm3354_vm2, %v5013_v3  ;;  %v5282_v10 = vpop.permute.xlu0 %5281  ;;  %v6301_v3 = vld [vmem:[%s8788_s13 + $0x40] sm:$0xff] }
0x18b2   : > { %7040 = vmatprep.subr.mxu1 %v5282_v10 }
0x18b3   : > { %7041 = vmatpush3.msra.mxu1 %v5282_v10 }
0x18b4   : > { %7042 = vmatprep.subr.mxu1 %v5280_v11 }
0x18b5   : > { %7043 = vmatpush3.msra.mxu1 %v5280_v11  ;;  %v7328_v59 = vpop.eup %7327 }
0x18b6   : > { %v5017_v13 = vmul.f32 %v7328_v59, %v7312_v31  ;;  %7052 = vmatprep.subr.mxu1 %v6284_v20 }
0x18b7   : > { %v7330_v12 = vpop.eup %7329 }
0x18b8   : > { %v5016_v8 = vmul.f32 %v7330_v12, %v7316_v30 }
0x18b9   : > { %v7332_v14 = vpop.eup %7331 }
0x18ba   : > { %7044 = vmatprep.mubr.msk.f32.mxu1 %vm3354_vm2, %v5016_v8  ;;  %v5015_v18 = vmul.f32 %v7332_v14, %v7314_v32 }
0x18bb   : > { %v7334_v15 = vpop.eup %7333  ;;  %7045 = vmatmul.mubr.msk.f32.vlgmr.msra.gmra.mxu1 %vm3354_vm2, %v5017_v13 }
0x18bc   : > { %v5014_v17 = vmul.f32 %v7334_v15, %v7318_v45  ;;  %7053 = vmatpush3.msra.mxu1 %v6284_v20  ;;  %v6299_v15 = vld [vmem:[%s8786_s11 + $0x2] ss:$0 sm:$0xff] }
0x18bd   : > { %7062 = vmatprep.subr.mxu1 %v6286_v25 }
0x18be   : > { %7037 = vmatprep.mubr.msk.f32.mxu0 %vm3354_vm2, %v5014_v17 }
0x18bf   : > { %7038 = vmatmul.mubr.msk.f32.vlgmr.msra.gmra.mxu0 %vm3354_vm2, %v5015_v18  ;;  %v6300_v18 = vld [vmem:[%s8787_s12 + $0x2] ss:$0 sm:$0xff] }
0x18c0   : > { %7048 = vmatpush3.msra.mxu0 %v6283_v35 }
0x18c1   : > { %7057 = vmatprep.subr.mxu0 %v6285_v28 }
0x191c   : > { %v7025_v19 = vpop.f32.mrf.mxu0 }
0x191e   : > { %v5096_v7 = vpop.f32.mrf.mxu0 }
0x191f   : > { %7049 = vmatprep.mubr.msk.f32.mxu0 %vm838_vm1, %v5096_v7 }
0x1920   : > { %7050 = vmatmul.mubr.msk.f32.vlgmr.msra.gmra.mxu0 %vm838_vm1, %v7025_v19 }
0x1921   : > { %7058 = vmatpush3.msra.mxu0 %v6285_v28 }
0x1922   : > { %7067 = vmatprep.subr.mxu0 %v6304_v62 }
0x1971   : > { %v7032_v5 = vpop.f32.mrf.mxu1 }
0x1973   : > { %v5183_v38 = vpop.f32.mrf.mxu1 }
0x1974   : > { %7054 = vmatprep.mubr.msk.f32.mxu1 %vm838_vm1, %v5183_v38  ;;  %v6324_v38 = vld [vmem:[%s8790_s15 + $0x178] sm:$0xff] }
0x1975   : > { %7055 = vmatmul.mubr.msk.f32.vlgmr.msra.gmra.mxu1 %vm838_vm1, %v7032_v5 }
0x1976   : > { %7063 = vmatpush3.msra.mxu1 %v6286_v25 }
0x1977   : > { %7078 = vmatprep.subr.mxu1 %v6324_v38 }
0x197b   : > { %v7046_v21 = vpop.f32.mrf.mxu1 }
0x197d   : > { %v5357_v26 = vpop.f32.mrf.mxu1 }
0x197e   : > { %7064 = vmatprep.mubr.msk.f32.mxu1 %vm838_vm1, %v5357_v26  ;;  %v6322_v26 = vld [vmem:[%s8790_s15 + $0x168] sm:$0xff] }
0x197f   : > { %v7039_v6 = vpop.f32.mrf.mxu0  ;;  %7065 = vmatmul.mubr.msk.f32.vlgmr.msra.gmra.mxu1 %vm838_vm1, %v7046_v21  ;;  %v6323_v21 = vld [vmem:[%s8790_s15 + $0x170] sm:$0xff] }
0x1980   : > { %7079 = vmatpush3.msra.mxu1 %v6324_v38 }
0x1981   : > { %v5270_v42 = vpop.f32.mrf.mxu0  ;;  %7080 = vmatprep.subr.mxu1 %v6323_v21 }
0x1982   : > { %7059 = vmatprep.mubr.msk.f32.mxu0 %vm838_vm1, %v5270_v42  ;;  %7081 = vmatpush3.msra.mxu1 %v6323_v21  ;;  %v6320_v42 = vld [vmem:[%s8790_s15 + $0x158] sm:$0xff] }
0x1983   : > { %7060 = vmatmul.mubr.msk.f32.vlgmr.msra.gmra.mxu0 %vm838_vm1, %v7039_v6  ;;  %7082 = vmatprep.subr.mxu1 %v6322_v26  ;;  %v6321_v6 = vld [vmem:[%s8790_s15 + $0x160] sm:$0xff] }
0x1984   : > { %7068 = vmatpush3.msra.mxu0 %v6304_v62  ;;  %7083 = vmatpush3.msra.mxu1 %v6322_v26 }
0x1985   : > { %7069 = vmatprep.subr.mxu0 %v6303_v0  ;;  %7084 = vmatprep.subr.mxu1 %v6321_v6 }
0x1986   : > { %7070 = vmatpush3.msra.mxu0 %v6303_v0  ;;  %7085 = vmatpush3.msra.mxu1 %v6321_v6 }
0x1987   : > { %7071 = vmatprep.subr.mxu0 %v6302_v4  ;;  %7086 = vmatprep.subr.mxu1 %v6320_v42 }
0x1988   : > { %7072 = vmatpush3.msra.mxu0 %v6302_v4  ;;  %7087 = vmatpush3.msra.mxu1 %v6320_v42 }
0x1989   : > { %7073 = vmatprep.subr.mxu0 %v6301_v3 }
0x198a   : > { %7074 = vmatpush3.msra.mxu0 %v6301_v3 }
0x19e0   : > { %v7051_v2 = vpop.f32.mrf.mxu0 }
0x19e1   : > { %v5702_v34 = vsel %vm592_vm0, %v7051_v2, 0.0  ;;  %v6318_v2 = vld [vmem:[%s8790_s15 + $0x148] sm:$0xff] }
0x19e2   : > { %v5443_v27 = vpop.f32.mrf.mxu0 }
0x19e3   : > { %v5695_v33 = vsel %vm592_vm0, %v5443_v27, 0.0  ;;  %v6315_v27 = vld [vmem:[%s8790_s15 + $0x130] sm:$0xff] }
0x1a35   : > { %v7056_v60 = vpop.f32.mrf.mxu1 }
0x1a36   : > { %v5703_v9 = vsel %vm592_vm0, %v7056_v60, 0.0  ;;  %v6319_v60 = vld [vmem:[%s8790_s15 + $0x150] sm:$0xff] }
0x1a37   : > { %v5524_v61 = vpop.f32.mrf.mxu1  ;;  %v5704_v48 = vadd.f32 %v5703_v9, %v5702_v34  ;;  %7088 = vmatprep.subr.mxu1 %v6319_v60  ;;  %v6316_v9 = vld [vmem:[%s8790_s15 + $0x138] sm:$0xff]  ;;  %v6313_v34 = vld [vmem:[%s8790_s15 + $0x120] sm:$0xff] }
0x1a38   : > { %v5696_v22 = vsel %vm592_vm0, %v5524_v61, 0.0  ;;  %7089 = vmatpush3.msra.mxu1 %v6319_v60  ;;  %v6317_v61 = vld [vmem:[%s8790_s15 + $0x140] sm:$0xff] }
0x1a39   : > { %v5697_v49 = vadd.f32 %v5696_v22, %v5695_v33  ;;  %7090 = vmatprep.subr.mxu1 %v6318_v2  ;;  %v6312_v22 = vld [vmem:[%s8790_s15 + $0x118] sm:$0xff]  ;;  %v6309_v33 = vld [vmem:[%s8790_s15 + $0x100] sm:$0xff] }
0x1a3a   : > { %7091 = vmatpush3.msra.mxu1 %v6318_v2 }
0x1a3b   : > { %7092 = vmatprep.subr.mxu1 %v6317_v61 }
0x1a3c   : > { %7093 = vmatpush3.msra.mxu1 %v6317_v61 }
0x1a3d   : > { %7094 = vmatprep.subr.mxu1 %v6316_v9 }
0x1a3e   : > { %7095 = vmatpush3.msra.mxu1 %v6316_v9 }
0x1a3f   : > { %v7066_v47 = vpop.f32.mrf.mxu1  ;;  %7096 = vmatprep.subr.mxu1 %v6315_v27 }
0x1a40   : > { %v5707_v32 = vsel %vm592_vm0, %v7066_v47, 0.0  ;;  %v6314_v47 = vld [vmem:[%s8790_s15 + $0x128] sm:$0xff]  ;;  %7097 = vmatpush3.msra.mxu1 %v6315_v27 }
0x1a41   : > { %v5686_v50 = vpop.f32.mrf.mxu1  ;;  %7098 = vmatprep.subr.mxu1 %v6314_v47 }
0x1a42   : > { %v5700_v53 = vsel %vm592_vm0, %v5686_v50, 0.0  ;;  %7099 = vmatpush3.msra.mxu1 %v6314_v47 }
0x1a43   : > { %v7061_v1 = vpop.f32.mrf.mxu0  ;;  %7100 = vmatprep.subr.mxu1 %v6313_v34 }
0x1a44   : > { %v5705_v16 = vsel %vm592_vm0, %v7061_v1, 0.0  ;;  %7101 = vmatpush3.msra.mxu1 %v6313_v34  ;;  %v6310_v1 = vld [vmem:[%s8790_s15 + $0x108] sm:$0xff] }
0x1a45   : > { %v5706_v39 = vadd.f32 %v5705_v16, %v5704_v48  ;;  %v5605_v31 = vpop.f32.mrf.mxu0  ;;  %v6311_v48 = vld [vmem:[%s8790_s15 + $0x110] sm:$0xff]  ;;  %7102 = vmatprep.subr.mxu1 %v6312_v22  ;;  %v6306_v16 = vld [vmem:[%s8789_s14 + $0x2] ss:$0 sm:$0xff] }
0x1a46   : > { %v5698_v30 = vsel %vm592_vm0, %v5605_v31, 0.0  ;;  %7103 = vmatpush3.msra.mxu1 %v6312_v22 }
0x1a47   : > { %v5708_v52 = vadd.f32 %v5707_v32, %v5706_v39  ;;  %v5699_v45 = vadd.f32 %v5698_v30, %v5697_v49  ;;  %7104 = vmatprep.subr.mxu1 %v6311_v48 }
0x1a48   : > { %7105 = vmatpush3.msra.mxu1 %v6311_v48 }
0x1a49   : > { %v5718_v54 = vadd.f32 %v6296_v36, %v5708_v52  ;;  %v5701_v55 = vadd.f32 %v5700_v53, %v5699_v45  ;;  %7106 = vmatprep.subr.mxu1 %v6310_v1 }
0x1a4a   : > { %7107 = vmatpush3.msra.mxu1 %v6310_v1 }
0x1a4b   : > { %v5717_v37 = vadd.f32 %v6296_v36, %v5701_v55  ;;  %v8635_v23 = vadd.f32 %v5718_v54, %v8439_v56  ;;  %7108 = vmatprep.subr.mxu1 %v6309_v33 }
0x1a4c   : > { %7109 = vmatpush3.msra.mxu1 %v6309_v33 }
0x1a4d   : > { %v5728_v58 = vsel %vm592_vm0, %v8635_v23, 0.0  ;;  %v8640_v24 = vadd.f32 %v5717_v37, %v8442_v40 }
0x1a4e   : > { %5729 = vadd.xlane.f32.xlu1 %v5728_v58 }
0x1a4f   : > { %v5725_v41 = vsel %vm592_vm0, %v8640_v24, 0.0 }
0x1a50   : > { %5726 = vadd.xlane.f32.xlu0 %v5725_v41 }
0x1ad7   : > { %v5730_v29 = vpop.xlane.xlu1 %5729 }
0x1ad8   : > { %v5732_v43 = vmul.f32 0.03125, %v5730_v29 }
0x1ad9   : > { %v5727_v35 = vpop.xlane.xlu0 %5726 }
0x1ada   : > { %v5731_v57 = vmul.f32 0.03125, %v5727_v35  ;;  %v5734_v44 = vsub.f32 %v8635_v23, %v5732_v43 }
0x1adc   : > { %v5733_v56 = vsub.f32 %v8640_v24, %v5731_v57  ;;  %v5736_v46 = vmul.f32 %v5734_v44, %v5734_v44 }
0x1ade   : > { %v5735_v63 = vmul.f32 %v5733_v56, %v5733_v56  ;;  %v5740_v40 = vsel %vm592_vm0, %v5736_v46, 0.0 }
0x1ae0   : > { %v5737_v51 = vsel %vm592_vm0, %v5735_v63, 0.0 }
0x1ae1   : > { %5738 = vadd.xlane.f32.xlu0 %v5737_v51  ;;  %v6326_v51 = vld [vmem:[%s8791_s16 + $0x2] ss:$0 sm:$0xff] }
0x1ae5   : > { %5741 = vadd.xlane.f32.xlu0 %v5740_v40 }
0x1b6a   : > { %v5739_v10 = vpop.xlane.xlu0 %5738 }
0x1b6b   : > { %v5743_v11 = vmul.f32 0.03125, %v5739_v10 }
0x1b6d   : > { %v5745_v59 = vadd.f32 1e-05, %v5743_v11 }
0x1b6e   : > { %v5742_v12 = vpop.xlane.xlu0 %5741 }
0x1b6f   : > { %7335 = vrsqrt.f32 %v5745_v59  ;;  %v5744_v8 = vmul.f32 0.03125, %v5742_v12 }
0x1b71   : > { %v5746_v13 = vadd.f32 1e-05, %v5744_v8 }
0x1b73   : > { %7337 = vrsqrt.f32 %v5746_v13 }
0x1b7c   : > { %v7336_v14 = vpop.eup %7335 }
0x1b7d   : > { %v5749_v17 = vmul.f32 %v7336_v14, %v5733_v56 }
0x1b7f   : > { %v5757_v20 = vmul.f32 %v6299_v15, %v5749_v17 }
0x1b80   : > { %v7338_v25 = vpop.eup %7337 }
0x1b81   : > { %v5750_v28 = vmul.f32 %v7338_v25, %v5734_v44  ;;  %v5765_v19 = vadd.f32 %v6300_v18, %v5757_v20 }
0x1b83   : > { %v5758_v7 = vmul.f32 %v6299_v15, %v5750_v28  ;;  %7075 = vmatprep.mubr.msk.f32.mxu0 %vm592_vm0, %v5765_v19 }
0x1b85   : > { %v5766_v5 = vadd.f32 %v6300_v18, %v5758_v7 }
0x1b87   : > { %7076 = vmatmul.mubr.msk.f32.vlgmr.msra.gmra.mxu0 %vm592_vm0, %v5766_v5 }
0x1c47   : > { %v7077_v49 = vpop.f32.mrf.mxu0 }
0x1c48   : > { %v5858_v50 = vadd.f32 %v7077_v49, %v6306_v16 }
0x1c49   : > { %v5852_v39 = vpop.f32.mrf.mxu0 }
0x1c4a   : > { %v5862_v31 = vmul.f32 %v5858_v50, %v5858_v50  ;;  %v5853_v32 = vadd.f32 %v6306_v16, %v5852_v39 }
0x1c4c   : > { %v5864_v36 = vmul.f32 %v5862_v31, %v5858_v50  ;;  %v5861_v30 = vmul.f32 %v5853_v32, %v5853_v32 }
0x1c4e   : > { %v5866_v52 = vmul.f32 0.044715, %v5864_v36  ;;  %v5863_v45 = vmul.f32 %v5861_v30, %v5853_v32 }
0x1c50   : > { %v5868_v53 = vadd.f32 %v5866_v52, %v5858_v50  ;;  %v5865_v54 = vmul.f32 0.044715, %v5863_v45 }
0x1c52   : > { %v5870_v55 = vmul.f32 0.7978846, %v5868_v53  ;;  %v5867_v37 = vadd.f32 %v5865_v54, %v5853_v32 }
0x1c54   : > { %7339 = vtanh.f32 %v5870_v55  ;;  %v5869_v58 = vmul.f32 0.7978846, %v5867_v37 }
0x1c56   : > { %7341 = vtanh.f32 %v5869_v58 }
0x1c61   : > { %v7340_v41 = vpop.eup %7339 }
0x1c62   : > { %v5874_v29 = vadd.f32 1.0, %v7340_v41 }
0x1c63   : > { %v7342_v43 = vpop.eup %7341 }
0x1c64   : > { %v5873_v35 = vadd.f32 1.0, %v7342_v43  ;;  %v5876_v57 = vmul.f32 0.5, %v5874_v29 }
0x1c66   : > { %v5875_v44 = vmul.f32 0.5, %v5873_v35  ;;  %v5878_v63 = vmul.f32 %v5876_v57, %v5858_v50 }
0x1c68   : > { %v5877_v56 = vmul.f32 %v5875_v44, %v5853_v32 }
0x1c6a   : > { %7110 = vmatprep.mubr.f32.mxu1 %v5877_v56 }
0x1c6b   : > { %7111 = vmatmul.mubr.f32.vlgmr.msra.gmra.mxu1 %v5878_v63 }
0x1d2b   : > { %v7112_v46 = vpop.f32.mrf.mxu1 }
0x1d2c   : > { %v5976_v40 = vadd.f32 %v7112_v46, %v6326_v51 }
0x1d2d   : > { %v5970_v62 = vpop.f32.mrf.mxu1 }
0x1d2e   : > { %v5980_v0 = vadd.f32 %v5976_v40, %v8635_v23  ;;  %v5971_v4 = vadd.f32 %v6326_v51, %v5970_v62 }
0x1d30   : > { %5982 = vst.msk [vmem:[%s556_s30 + $0x8] sm:$0xff] %vm592_vm0, %v5980_v0  ;;  %v5979_v3 = vadd.f32 %v5971_v4, %v8640_v24 }
0x1d32   : > { %5981 = vst.msk [vmem:[%s556_s30] sm:$0xff] %vm592_vm0, %v5979_v3 }
0x1d33   : > { %7356 = shalt.err (!%p7353_p3)
}
0x1d34   : > { %s7357_s17 = scalar_lea.hbm %s8728_s22, 256  ;;  %s7361_s19 = scalar_lea.hbm %s8817_s21, 512 }
0x1d35   : > { %p7358_p4 = scmp.ne.s32.totalorder %s8728_s22, %s7357_s17  ;;  %p7362_p9 = scmp.lt.s32.totalorder %s8728_s22, %s8817_s21 }
0x1d36   : > { %p7363_p10 = scmp.lt.s32.totalorder %s7361_s19, %s7357_s17 }
0x1d37   : > { %p7359_p7 = pnand %p7358_p4, %p7541_p5 }
0x1d38   : > { %p7364_p11 = por %p7363_p10, %p7362_p9 }
0x1d39   : > { %p7360_p8 = pneg %p7359_p7 }
0x1d3b   : > { %p7365_p12 = pnand %p7364_p11, %p7360_p8 }
0x1d3d   : > { %7368 = shalt.err (!%p7365_p12)
}
0x1d3e   : > { %s7411_s23 = smov 128   ;;  %s7412_s29 = smov 8  }
0x1d3f   : > { %7121 = dma.vmem_to_hbm [thread:$0]  (%p7541_p5), %s8730_s18, 256, %s8728_s22, %s8735_s28, %s7411_s23, %s7411_s23, %s7412_s29  }
0x1d40 PF: > { %s8818_s24 = sld [smem:[#allocation7_spill]] }
0x1d41   : > { %s8819_s26 = sld [smem:[#allocation5_spill]] }
0x1d46   : > { %p7127_p13 = scmp.ge.s32.totalorder %s8818_s24, 2 }
0x1d47   : > { %s6012_s30 = sand.u32 1, %s8819_s26  }
0x1d48   : > { %p7124_p0 = pnand %p7127_p13, %p7545_p6  ;;  %s6013_s17 = scalar_lea.sflag [#allocation3], %s6012_s30 }
0x1d4a   : > { %p7125_p1 = pneg %p7124_p0 }
0x1d4c   : > { %7386 = dma.done.wait (%p7125_p1), %s6013_s17, 256  }
0x1d4d   : > { %7388 = vsyncadd (%p7125_p1), %s6013_s17, 4294967040  ;;  %s8821_s27 = sld [smem:[#allocation8_spill]]  ;;  %s8824_s24 = smov %s7395_s25 }
0x1d4e   : > { %s8822_s19 = sld [smem:[#allocation6_spill]] }
0x1d4f   : > { %s8823_s26 = sld [smem:[#allocation9_spill]] }
0x1d53   : > { %p27_p2 = scmp.ge.s32.totalorder %s8821_s27, 4  }
0x1d54   : > { %s8825_s25 = smov %s8822_s19 }
0x1d55   :  { %29 = sbr.rel (!%p27_p2) target bundleno = 7 (0x7), region = 151 }
0x1d5a   :  { %6018 = vsyncpa [#allocation3], 1 }
0x1d5b   :  { %6020 = vsyncpa [#allocation3 + $0x1], 1 }

</bundles_post_ra>
